<compile_context>
chip_gen: v7x
topology: tpu7x:2x2x1
jax: 0.10.0
libtpu: 0.0.40
codegen_flags: <defaults>
</compile_context>

<pallas_src>
import functools

import jax
import jax.numpy as jnp
from jax import lax
from jax.experimental import pallas as pl
from jax.experimental.pallas import tpu as pltpu

DILATIONS = (1, 3, 5, 7)
_HALO_BLOCK = 128          # width of the left/right halo blocks (lane aligned)


def _round_up(x, m):
    return (x + m - 1) // m * m


def _leaky_relu(x, negative_slope):
    return jnp.where(x >= 0, x, negative_slope * x)


def _block_kernel(xl_ref, xc_ref, xr_ref, dw_ref, db_ref, cw_ref, cb_ref,
                  o_ref, *, kernel_size, negative_slope, seq_len, tile_len,
                  halo, rf, dilations, compute_dtype):
    """One (batch, L-tile) grid point: full 8-conv chain + residual on a
    halo'd window, storing only the central tile_len columns."""
    c_pad = xc_ref.shape[1]
    t = pl.program_id(1)
    half_k = (kernel_size - 1) // 2

    # Halo'd working window (f32), covering global cols [t*TL - halo, (t+1)*TL + halo).
    buf = jnp.concatenate([xl_ref[0], xc_ref[0], xr_ref[0]], axis=1)
    buf = buf.astype(jnp.float32)
    buf_w = tile_len + 2 * halo

    # Validity mask over the buffer's global columns.  Intermediate
    # activations at columns outside [0, seq_len) must stay zero (that is what
    # Conv1d's zero padding sees), otherwise bias garbage from the padded
    # head/tail would leak into valid outputs near the sequence boundaries.
    gcol = t * tile_len - halo + lax.broadcasted_iota(jnp.int32, (1, buf_w), 1)
    valid = ((gcol >= 0) & (gcol < seq_len)).astype(jnp.float32)

    # The 8 convs: (weights, bias, pair index, dilation) in forward order.
    stages = []
    for i, d in enumerate(dilations):
        stages.append((dw_ref, db_ref, i, d))
        stages.append((cw_ref, cb_ref, i, 1))

    x = buf          # current activation, halo width `h` on each side of TL
    h = halo
    for s, (w_ref, b_ref, pair, d) in enumerate(stages):
        pad = d * half_k
        # After this conv we only need a (rf - pads_so_far)-wide halo.
        h_next = (rf if s == 0 else h) - pad
        w_out = tile_len + 2 * h_next
        base = h - h_next - pad          # lead-in offset of tap k=0 inside x

        # Cast once per conv; taps are static slices of this slab.
        a = _leaky_relu(x, negative_slope).astype(compute_dtype)

        # "same" dilated conv as K accumulating MXU matmuls (f32 accumulator).
        y = jnp.dot(w_ref[pair, 0], a[:, base:base + w_out],
                    preferred_element_type=jnp.float32)
        for k in range(1, kernel_size):
            off = base + k * d
            y = y + jnp.dot(w_ref[pair, k], a[:, off:off + w_out],
                            preferred_element_type=jnp.float32)
        y = y + b_ref[pair]                                   # (C_pad, 1) bias

        # Re-zero out-of-sequence columns before the next conv consumes them.
        x = y * valid[:, halo - h_next:halo - h_next + w_out]
        h = h_next

    # h == 0 here: x covers exactly the central tile_len columns.
    o_ref[0] = (x + xc_ref[0].astype(jnp.float32)).astype(o_ref.dtype)


def dilated_residual_block(x, dil_w, dil_b, con_w, con_b, *, kernel_size,
                           negative_slope, compute_dtype=jnp.bfloat16):
    """Pallas forward of DilatedResidualBlock.

    x            : (N, C, L) activations (NCW, like PyTorch Conv1d).
    dil_w, con_w : (4, C, C, K) conv weights [pair, c_out, c_in, k]
                   (weight_norm already folded in).
    dil_b, con_b : (4, C) biases.
    compute_dtype: dtype fed to the MXU. bf16 = fast default; f32 = exact
                   opt-in. Accumulation / elementwise stay f32 either way.
    """
    N, C, L = x.shape
    K = kernel_size
    assert K % 2 == 1, "kernel_size must be odd for 'same' convs"
    # TODO(synk): even kernel_size changes the output length; not supported.
    n_pairs = dil_w.shape[0]
    assert n_pairs == len(DILATIONS)
    compute_dtype = jnp.dtype(compute_dtype)
    x_dtype = x.dtype
    x_item = jnp.dtype(x_dtype).itemsize

    half = (K - 1) // 2
    rf = sum([d * half + half for d in DILATIONS])     # 8-conv receptive field
    assert rf <= _HALO_BLOCK, "receptive field exceeds one 128-lane halo block"

    # Sublane / lane alignment.
    c_mult = 16 if compute_dtype.itemsize == 2 else 8
    C_pad = _round_up(C, c_mult)

    # ---- generation-aware tile length & VMEM budget ------------------------
    try:
        vmem_cap = int(pltpu.get_tpu_info().vmem_capacity_bytes)
    except Exception:
        vmem_cap = 64 * 1024 * 1024                    # conservative (v7x)
    vmem_limit = int(min(vmem_cap * 0.85, vmem_cap - (8 << 20)))

    weight_bytes = (2 * n_pairs * K * C_pad * C_pad * compute_dtype.itemsize
                    + 2 * n_pairs * C_pad * 4)
    l_ceil = _round_up(L, 128)
    TL = 128
    for cand in (2048, 1024, 512, 256, 128):
        if cand > l_ceil:
            continue
        act_bytes = (4 * C_pad * cand * x_item                 # in/out blocks (2-buf)
                     + 4 * C_pad * _HALO_BLOCK * x_item        # halo blocks (2-buf)
                     + 6 * C_pad * (cand + 2 * _HALO_BLOCK) * 4)  # in-kernel temps
        if weight_bytes + act_bytes <= int(0.85 * vmem_limit):
            TL = cand
            break
    L_pad = _round_up(L, TL)
    T = L_pad // TL
    hb = _HALO_BLOCK
    n_hblk = TL // hb

    # ---- host-side layout ---------------------------------------------------
    # L axis of the padded input: [TL zeros | data (L -> L_pad zeros) | 128 zeros]
    # so that the centre tile, the left halo block and the right halo block are
    # all block-aligned windows of the SAME array (passed three times).
    xpad = jnp.pad(x, ((0, 0), (0, C_pad - C), (TL, (L_pad - L) + hb)))

    def prep_w(w):
        # (P, C, C, K) -> (P, K, C_pad, C_pad): each tap weight is a contiguous
        # MXU tile, no lane-strided K slicing in-kernel.
        w = jnp.pad(w, ((0, 0), (0, C_pad - C), (0, C_pad - C), (0, 0)))
        return jnp.transpose(w, (0, 3, 1, 2)).astype(compute_dtype)

    def prep_b(b):
        b = jnp.pad(b, ((0, 0), (0, C_pad - C)))
        return b[..., None].astype(jnp.float32)                # (P, C_pad, 1)

    dwp, cwp = prep_w(dil_w), prep_w(con_w)
    dbp, cbp = prep_b(dil_b), prep_b(con_b)

    kernel = functools.partial(
        _block_kernel, kernel_size=K, negative_slope=negative_slope,
        seq_len=L, tile_len=TL, halo=hb, rf=rf, dilations=DILATIONS,
        compute_dtype=compute_dtype)

    n_convs = 2 * len(DILATIONS)
    cost = pl.CostEstimate(
        flops=2 * N * T * n_convs * K * C_pad * C_pad * TL,
        transcendentals=0,
        bytes_accessed=int(N * T * C_pad * (2 * TL + 2 * hb) * x_item
                           + weight_bytes),
    )

    def build(weight_mode):
        wkw = {} if weight_mode is None else dict(pipeline_mode=weight_mode)

        def const_spec(shape):
            # Constant block across the grid: DMA'd once, VMEM-resident.
            nd = len(shape)
            return pl.BlockSpec(shape, lambda n, t, _nd=nd: (0,) * _nd, **wkw)

        in_specs = [
            # left halo: 128 cols ending at the tile's first column
            pl.BlockSpec((1, C_pad, hb), lambda n, t: (n, 0, (t + 1) * n_hblk - 1)),
            # centre tile
            pl.BlockSpec((1, C_pad, TL), lambda n, t: (n, 0, t + 1)),
            # right halo: 128 cols starting just past the tile's last column
            pl.BlockSpec((1, C_pad, hb), lambda n, t: (n, 0, (t + 2) * n_hblk)),
            const_spec(dwp.shape),
            const_spec(dbp.shape),
            const_spec(cwp.shape),
            const_spec(cbp.shape),
        ]
        return pl.pallas_call(
            kernel,
            out_shape=jax.ShapeDtypeStruct((N, C_pad, L_pad), x_dtype),
            grid=(N, T),
            in_specs=in_specs,
            out_specs=pl.BlockSpec((1, C_pad, TL), lambda n, t: (n, 0, t)),
            compiler_params=pltpu.CompilerParams(
                # Every (batch, L-tile) point is independent -> both parallel,
                # so v7x's two TCs stay busy even at N == 1.
                dimension_semantics=("parallel", "parallel"),
                vmem_limit_bytes=vmem_limit,
            ),
            cost_estimate=cost,
        )

    args = (xpad, xpad, xpad, dwp, dbp, cwp, cbp)
    try:
        # Single-buffer the constant weight/bias blocks (review: saves ~12-25
        # MiB of VMEM on v7x; they are fetched exactly once).
        out = build(pl.Buffered(1))(*args)
    except Exception:
        # Fallback if this JAX version rejects pipeline_mode / Buffered(1).
        out = build(None)(*args)

    return out[:, :C, :L]


# ----------------------- parameter setup (plain JAX glue) -----------------------

def _init_conv_params(key, channels, kernel_size):
    """Mimics nn.Conv1d init + weight_norm wrapping (g = ||v|| at init)."""
    kv, kb = jax.random.split(key)
    bound = 1.0 / (channels * kernel_size) ** 0.5
    v = jax.random.uniform(kv, (channels, channels, kernel_size),
                           jnp.float32, -bound, bound)
    g = jnp.sqrt(jnp.sum(v * v, axis=(1, 2)))
    b = jax.random.uniform(kb, (channels,), jnp.float32, -bound, bound)
    return v, g, b


def _weight_norm(v, g):
    norm = jnp.sqrt(jnp.sum(v * v, axis=(1, 2), keepdims=True))
    return v * (g[:, None, None] / norm)


def _reference(x, dil_w, dil_b, con_w, con_b, kernel_size, negative_slope):
    """Pure-JAX reference (lax.conv_general_dilated) of the PyTorch forward."""
    def conv(z, w, b, d):
        pad = (kernel_size * d - d) // 2
        y = lax.conv_general_dilated(
            z, w, window_strides=(1,), padding=[(pad, pad)],
            rhs_dilation=(d,), dimension_numbers=("NCH", "OIH", "NCH"),
            precision=lax.Precision.HIGHEST)
        return y + b[None, :, None]

    res = x
    for i, d in enumerate(DILATIONS):
        x = conv(jnp.where(x >= 0, x, negative_slope * x), dil_w[i], dil_b[i], d)
        x = conv(jnp.where(x >= 0, x, negative_slope * x), con_w[i], con_b[i], 1)
    return x + res


if __name__ == "__main__":
    channels, kernel_size, negative_slope = 4, 3, 0.1
    N, L = 2, 16

    key = jax.random.PRNGKey(0)
    keys = jax.random.split(key, 9)
    x = jax.random.normal(keys[0], (N, channels, L), jnp.float32)

    dil_w, dil_b, con_w, con_b = [], [], [], []
    for i in range(4):
        v, g, b = _init_conv_params(keys[1 + i], channels, kernel_size)
        dil_w.append(_weight_norm(v, g)); dil_b.append(b)
        v, g, b = _init_conv_params(keys[5 + i], channels, kernel_size)
        con_w.append(_weight_norm(v, g)); con_b.append(b)
    dil_w = jnp.stack(dil_w)   # (4, C, C, K)
    dil_b = jnp.stack(dil_b)   # (4, C)
    con_w = jnp.stack(con_w)   # (4, C, C, K)
    con_b = jnp.stack(con_b)   # (4, C)

    ref = _reference(x, dil_w, dil_b, con_w, con_b, kernel_size, negative_slope)

    # Exact path: f32-fed MXU, matches the PyTorch module numerics.
    out_f32 = dilated_residual_block(
        x, dil_w, dil_b, con_w, con_b, kernel_size=kernel_size,
        negative_slope=negative_slope, compute_dtype=jnp.float32)
    out_f32 = jax.block_until_ready(out_f32)
    assert out_f32.shape == x.shape
    err_f32 = float(jnp.max(jnp.abs(out_f32 - ref)))
    assert err_f32 < 1e-4, f"f32 path max err {err_f32}"

    # Default fast path: bf16-fed MXU, f32 accumulation / residual.
    out_bf16 = dilated_residual_block(
        x, dil_w, dil_b, con_w, con_b, kernel_size=kernel_size,
        negative_slope=negative_slope)
    out_bf16 = jax.block_until_ready(out_bf16)
    err_bf16 = float(jnp.max(jnp.abs(out_bf16 - ref)))
    assert err_bf16 < 5e-2, f"bf16 path max err {err_bf16}"

    print("KERNEL_OK")
</pallas_src>

<mosaic_0001>
module attributes {stable_mosaic.version = 11 : i64} {
  func.func @_block_kernel(%arg0: i32, %arg1: i32, %arg2: memref<1x8x128xf32, #tpu.memory_space<vmem>>, %arg3: memref<1x8x128xf32, #tpu.memory_space<vmem>>, %arg4: memref<1x8x128xf32, #tpu.memory_space<vmem>>, %arg5: memref<4x3x8x8xf32, #tpu.memory_space<vmem>>, %arg6: memref<4x8x1xf32, #tpu.memory_space<vmem>>, %arg7: memref<4x3x8x8xf32, #tpu.memory_space<vmem>>, %arg8: memref<4x8x1xf32, #tpu.memory_space<vmem>>, %arg9: memref<1x8x128xf32, #tpu.memory_space<vmem>>) attributes {dimension_semantics = [#tpu.dimension_semantics<parallel>, #tpu.dimension_semantics<parallel>], iteration_bounds = array<i64: 2, 1>, scalar_prefetch = 0 : i64, scratch_operands = 0 : i64, tpu.core_type = #tpu.core_type<tc>, window_params = [{transform_indices = @transform_0, window_bounds = array<i64: 1, 8, 128>}, {transform_indices = @transform_1, window_bounds = array<i64: 1, 8, 128>}, {transform_indices = @transform_2, window_bounds = array<i64: 1, 8, 128>}, {pipeline_mode = #tpu.pipeline_mode<synchronous>, transform_indices = @transform_3, window_bounds = array<i64: 4, 3, 8, 8>}, {pipeline_mode = #tpu.pipeline_mode<synchronous>, transform_indices = @transform_4, window_bounds = array<i64: 4, 8, 1>}, {pipeline_mode = #tpu.pipeline_mode<synchronous>, transform_indices = @transform_5, window_bounds = array<i64: 4, 3, 8, 8>}, {pipeline_mode = #tpu.pipeline_mode<synchronous>, transform_indices = @transform_6, window_bounds = array<i64: 4, 8, 1>}, {transform_indices = @transform_7, window_bounds = array<i64: 1, 8, 128>}]} {
    %c0 = arith.constant 0 : index
    %c0_0 = arith.constant 0 : index
    %c0_1 = arith.constant 0 : index
    %0 = vector.load %arg2[%c0, %c0_0, %c0_1] : memref<1x8x128xf32, #tpu.memory_space<vmem>>, vector<1x8x128xf32>
    %1 = vector.shape_cast %0 : vector<1x8x128xf32> to vector<8x128xf32>
    %c0_2 = arith.constant 0 : index
    %c0_3 = arith.constant 0 : index
    %c0_4 = arith.constant 0 : index
    %2 = vector.load %arg3[%c0_2, %c0_3, %c0_4] : memref<1x8x128xf32, #tpu.memory_space<vmem>>, vector<1x8x128xf32>
    %3 = vector.shape_cast %2 : vector<1x8x128xf32> to vector<8x128xf32>
    %c0_5 = arith.constant 0 : index
    %c0_6 = arith.constant 0 : index
    %c0_7 = arith.constant 0 : index
    %4 = vector.load %arg4[%c0_5, %c0_6, %c0_7] : memref<1x8x128xf32, #tpu.memory_space<vmem>>, vector<1x8x128xf32>
    %5 = vector.shape_cast %4 : vector<1x8x128xf32> to vector<8x128xf32>
    %6 = tpu.concatenate %1, %3, %5 in 1 : vector<8x128xf32>, vector<8x128xf32>, vector<8x128xf32> -> vector<8x384xf32>
    %c128_i32 = arith.constant 128 : i32
    %7 = arith.muli %arg1, %c128_i32 : i32
    %c128_i32_8 = arith.constant 128 : i32
    %8 = arith.subi %7, %c128_i32_8 : i32
    %9 = tpu.iota {dimensions = array<i32: 1>} : vector<1x384xi32>
    %10 = vector.broadcast %8 : i32 to vector<1x384xi32>
    %11 = arith.addi %10, %9 : vector<1x384xi32>
    %c0_i32 = arith.constant 0 : i32
    %12 = vector.broadcast %c0_i32 : i32 to vector<1x384xi32>
    %13 = arith.cmpi sge, %11, %12 : vector<1x384xi32>
    %c16_i32 = arith.constant 16 : i32
    %14 = vector.broadcast %c16_i32 : i32 to vector<1x384xi32>
    %15 = arith.cmpi slt, %11, %14 : vector<1x384xi32>
    %16 = arith.andi %13, %15 : vector<1x384xi1>
    %17 = arith.extui %16 : vector<1x384xi1> to vector<1x384xi32>
    %18 = arith.sitofp %17 : vector<1x384xi32> to vector<1x384xf32>
    %cst = arith.constant 0.000000e+00 : f32
    %19 = vector.broadcast %cst : f32 to vector<8x384xf32>
    %20 = arith.cmpf oge, %6, %19 : vector<8x384xf32>
    %cst_9 = arith.constant 1.000000e-01 : f32
    %21 = vector.broadcast %cst_9 : f32 to vector<8x384xf32>
    %22 = arith.mulf %21, %6 : vector<8x384xf32>
    %23 = arith.select %20, %6, %22 : vector<8x384xi1>, vector<8x384xf32>
    %c0_10 = arith.constant 0 : index
    %c0_11 = arith.constant 0 : index
    %c0_12 = arith.constant 0 : index
    %c0_13 = arith.constant 0 : index
    %24 = vector.load %arg5[%c0_10, %c0_11, %c0_12, %c0_13] : memref<4x3x8x8xf32, #tpu.memory_space<vmem>>, vector<1x1x8x8xf32>
    %25 = vector.shape_cast %24 : vector<1x1x8x8xf32> to vector<8x8xf32>
    %26 = vector.extract_strided_slice %23 {offsets = [0, 108], sizes = [8, 166], strides = [1, 1]} : vector<8x384xf32> to vector<8x166xf32>
    %cst_14 = arith.constant dense<0.000000e+00> : vector<8x166xf32>
    %27 = tpu.matmul %25, %26, %cst_14 {dimension_numbers = #tpu.dot_dimension_numbers<[1], [0], [0], [1], [0, 0, 1, 1], [], []>} : vector<8x8xf32>, vector<8x166xf32>, vector<8x166xf32> -> vector<8x166xf32>
    %c0_15 = arith.constant 0 : index
    %c1 = arith.constant 1 : index
    %c0_16 = arith.constant 0 : index
    %c0_17 = arith.constant 0 : index
    %28 = vector.load %arg5[%c0_15, %c1, %c0_16, %c0_17] : memref<4x3x8x8xf32, #tpu.memory_space<vmem>>, vector<1x1x8x8xf32>
    %29 = vector.shape_cast %28 : vector<1x1x8x8xf32> to vector<8x8xf32>
    %30 = vector.extract_strided_slice %23 {offsets = [0, 109], sizes = [8, 166], strides = [1, 1]} : vector<8x384xf32> to vector<8x166xf32>
    %cst_18 = arith.constant dense<0.000000e+00> : vector<8x166xf32>
    %31 = tpu.matmul %29, %30, %cst_18 {dimension_numbers = #tpu.dot_dimension_numbers<[1], [0], [0], [1], [0, 0, 1, 1], [], []>} : vector<8x8xf32>, vector<8x166xf32>, vector<8x166xf32> -> vector<8x166xf32>
    %32 = arith.addf %27, %31 : vector<8x166xf32>
    %c0_19 = arith.constant 0 : index
    %c2 = arith.constant 2 : index
    %c0_20 = arith.constant 0 : index
    %c0_21 = arith.constant 0 : index
    %33 = vector.load %arg5[%c0_19, %c2, %c0_20, %c0_21] : memref<4x3x8x8xf32, #tpu.memory_space<vmem>>, vector<1x1x8x8xf32>
    %34 = vector.shape_cast %33 : vector<1x1x8x8xf32> to vector<8x8xf32>
    %35 = vector.extract_strided_slice %23 {offsets = [0, 110], sizes = [8, 166], strides = [1, 1]} : vector<8x384xf32> to vector<8x166xf32>
    %cst_22 = arith.constant dense<0.000000e+00> : vector<8x166xf32>
    %36 = tpu.matmul %34, %35, %cst_22 {dimension_numbers = #tpu.dot_dimension_numbers<[1], [0], [0], [1], [0, 0, 1, 1], [], []>} : vector<8x8xf32>, vector<8x166xf32>, vector<8x166xf32> -> vector<8x166xf32>
    %37 = arith.addf %32, %36 : vector<8x166xf32>
    %c0_23 = arith.constant 0 : index
    %c0_24 = arith.constant 0 : index
    %c0_25 = arith.constant 0 : index
    %38 = vector.load %arg6[%c0_23, %c0_24, %c0_25] : memref<4x8x1xf32, #tpu.memory_space<vmem>>, vector<1x8x1xf32>
    %39 = vector.shape_cast %38 : vector<1x8x1xf32> to vector<8x1xf32>
    %40 = vector.broadcast %39 : vector<8x1xf32> to vector<8x166xf32>
    %41 = arith.addf %37, %40 : vector<8x166xf32>
    %42 = vector.extract_strided_slice %18 {offsets = [0, 109], sizes = [1, 166], strides = [1, 1]} : vector<1x384xf32> to vector<1x166xf32>
    %43 = vector.broadcast %42 : vector<1x166xf32> to vector<8x166xf32>
    %44 = arith.mulf %41, %43 : vector<8x166xf32>
    %cst_26 = arith.constant 0.000000e+00 : f32
    %45 = vector.broadcast %cst_26 : f32 to vector<8x166xf32>
    %46 = arith.cmpf oge, %44, %45 : vector<8x166xf32>
    %cst_27 = arith.constant 1.000000e-01 : f32
    %47 = vector.broadcast %cst_27 : f32 to vector<8x166xf32>
    %48 = arith.mulf %47, %44 : vector<8x166xf32>
    %49 = arith.select %46, %44, %48 : vector<8x166xi1>, vector<8x166xf32>
    %c0_28 = arith.constant 0 : index
    %c0_29 = arith.constant 0 : index
    %c0_30 = arith.constant 0 : index
    %c0_31 = arith.constant 0 : index
    %50 = vector.load %arg7[%c0_28, %c0_29, %c0_30, %c0_31] : memref<4x3x8x8xf32, #tpu.memory_space<vmem>>, vector<1x1x8x8xf32>
    %51 = vector.shape_cast %50 : vector<1x1x8x8xf32> to vector<8x8xf32>
    %52 = vector.extract_strided_slice %49 {offsets = [0, 0], sizes = [8, 164], strides = [1, 1]} : vector<8x166xf32> to vector<8x164xf32>
    %cst_32 = arith.constant dense<0.000000e+00> : vector<8x164xf32>
    %53 = tpu.matmul %51, %52, %cst_32 {dimension_numbers = #tpu.dot_dimension_numbers<[1], [0], [0], [1], [0, 0, 1, 1], [], []>} : vector<8x8xf32>, vector<8x164xf32>, vector<8x164xf32> -> vector<8x164xf32>
    %c0_33 = arith.constant 0 : index
    %c1_34 = arith.constant 1 : index
    %c0_35 = arith.constant 0 : index
    %c0_36 = arith.constant 0 : index
    %54 = vector.load %arg7[%c0_33, %c1_34, %c0_35, %c0_36] : memref<4x3x8x8xf32, #tpu.memory_space<vmem>>, vector<1x1x8x8xf32>
    %55 = vector.shape_cast %54 : vector<1x1x8x8xf32> to vector<8x8xf32>
    %56 = vector.extract_strided_slice %49 {offsets = [0, 1], sizes = [8, 164], strides = [1, 1]} : vector<8x166xf32> to vector<8x164xf32>
    %cst_37 = arith.constant dense<0.000000e+00> : vector<8x164xf32>
    %57 = tpu.matmul %55, %56, %cst_37 {dimension_numbers = #tpu.dot_dimension_numbers<[1], [0], [0], [1], [0, 0, 1, 1], [], []>} : vector<8x8xf32>, vector<8x164xf32>, vector<8x164xf32> -> vector<8x164xf32>
    %58 = arith.addf %53, %57 : vector<8x164xf32>
    %c0_38 = arith.constant 0 : index
    %c2_39 = arith.constant 2 : index
    %c0_40 = arith.constant 0 : index
    %c0_41 = arith.constant 0 : index
    %59 = vector.load %arg7[%c0_38, %c2_39, %c0_40, %c0_41] : memref<4x3x8x8xf32, #tpu.memory_space<vmem>>, vector<1x1x8x8xf32>
    %60 = vector.shape_cast %59 : vector<1x1x8x8xf32> to vector<8x8xf32>
    %61 = vector.extract_strided_slice %49 {offsets = [0, 2], sizes = [8, 164], strides = [1, 1]} : vector<8x166xf32> to vector<8x164xf32>
    %cst_42 = arith.constant dense<0.000000e+00> : vector<8x164xf32>
    %62 = tpu.matmul %60, %61, %cst_42 {dimension_numbers = #tpu.dot_dimension_numbers<[1], [0], [0], [1], [0, 0, 1, 1], [], []>} : vector<8x8xf32>, vector<8x164xf32>, vector<8x164xf32> -> vector<8x164xf32>
    %63 = arith.addf %58, %62 : vector<8x164xf32>
    %c0_43 = arith.constant 0 : index
    %c0_44 = arith.constant 0 : index
    %c0_45 = arith.constant 0 : index
    %64 = vector.load %arg8[%c0_43, %c0_44, %c0_45] : memref<4x8x1xf32, #tpu.memory_space<vmem>>, vector<1x8x1xf32>
    %65 = vector.shape_cast %64 : vector<1x8x1xf32> to vector<8x1xf32>
    %66 = vector.broadcast %65 : vector<8x1xf32> to vector<8x164xf32>
    %67 = arith.addf %63, %66 : vector<8x164xf32>
    %68 = vector.extract_strided_slice %18 {offsets = [0, 110], sizes = [1, 164], strides = [1, 1]} : vector<1x384xf32> to vector<1x164xf32>
    %69 = vector.broadcast %68 : vector<1x164xf32> to vector<8x164xf32>
    %70 = arith.mulf %67, %69 : vector<8x164xf32>
    %cst_46 = arith.constant 0.000000e+00 : f32
    %71 = vector.broadcast %cst_46 : f32 to vector<8x164xf32>
    %72 = arith.cmpf oge, %70, %71 : vector<8x164xf32>
    %cst_47 = arith.constant 1.000000e-01 : f32
    %73 = vector.broadcast %cst_47 : f32 to vector<8x164xf32>
    %74 = arith.mulf %73, %70 : vector<8x164xf32>
    %75 = arith.select %72, %70, %74 : vector<8x164xi1>, vector<8x164xf32>
    %c1_48 = arith.constant 1 : index
    %c0_49 = arith.constant 0 : index
    %c0_50 = arith.constant 0 : index
    %c0_51 = arith.constant 0 : index
    %76 = vector.load %arg5[%c1_48, %c0_49, %c0_50, %c0_51] : memref<4x3x8x8xf32, #tpu.memory_space<vmem>>, vector<1x1x8x8xf32>
    %77 = vector.shape_cast %76 : vector<1x1x8x8xf32> to vector<8x8xf32>
    %78 = vector.extract_strided_slice %75 {offsets = [0, 0], sizes = [8, 158], strides = [1, 1]} : vector<8x164xf32> to vector<8x158xf32>
    %cst_52 = arith.constant dense<0.000000e+00> : vector<8x158xf32>
    %79 = tpu.matmul %77, %78, %cst_52 {dimension_numbers = #tpu.dot_dimension_numbers<[1], [0], [0], [1], [0, 0, 1, 1], [], []>} : vector<8x8xf32>, vector<8x158xf32>, vector<8x158xf32> -> vector<8x158xf32>
    %c1_53 = arith.constant 1 : index
    %c1_54 = arith.constant 1 : index
    %c0_55 = arith.constant 0 : index
    %c0_56 = arith.constant 0 : index
    %80 = vector.load %arg5[%c1_53, %c1_54, %c0_55, %c0_56] : memref<4x3x8x8xf32, #tpu.memory_space<vmem>>, vector<1x1x8x8xf32>
    %81 = vector.shape_cast %80 : vector<1x1x8x8xf32> to vector<8x8xf32>
    %82 = vector.extract_strided_slice %75 {offsets = [0, 3], sizes = [8, 158], strides = [1, 1]} : vector<8x164xf32> to vector<8x158xf32>
    %cst_57 = arith.constant dense<0.000000e+00> : vector<8x158xf32>
    %83 = tpu.matmul %81, %82, %cst_57 {dimension_numbers = #tpu.dot_dimension_numbers<[1], [0], [0], [1], [0, 0, 1, 1], [], []>} : vector<8x8xf32>, vector<8x158xf32>, vector<8x158xf32> -> vector<8x158xf32>
    %84 = arith.addf %79, %83 : vector<8x158xf32>
    %c1_58 = arith.constant 1 : index
    %c2_59 = arith.constant 2 : index
    %c0_60 = arith.constant 0 : index
    %c0_61 = arith.constant 0 : index
    %85 = vector.load %arg5[%c1_58, %c2_59, %c0_60, %c0_61] : memref<4x3x8x8xf32, #tpu.memory_space<vmem>>, vector<1x1x8x8xf32>
    %86 = vector.shape_cast %85 : vector<1x1x8x8xf32> to vector<8x8xf32>
    %87 = vector.extract_strided_slice %75 {offsets = [0, 6], sizes = [8, 158], strides = [1, 1]} : vector<8x164xf32> to vector<8x158xf32>
    %cst_62 = arith.constant dense<0.000000e+00> : vector<8x158xf32>
    %88 = tpu.matmul %86, %87, %cst_62 {dimension_numbers = #tpu.dot_dimension_numbers<[1], [0], [0], [1], [0, 0, 1, 1], [], []>} : vector<8x8xf32>, vector<8x158xf32>, vector<8x158xf32> -> vector<8x158xf32>
    %89 = arith.addf %84, %88 : vector<8x158xf32>
    %c1_63 = arith.constant 1 : index
    %c0_64 = arith.constant 0 : index
    %c0_65 = arith.constant 0 : index
    %90 = vector.load %arg6[%c1_63, %c0_64, %c0_65] : memref<4x8x1xf32, #tpu.memory_space<vmem>>, vector<1x8x1xf32>
    %91 = vector.shape_cast %90 : vector<1x8x1xf32> to vector<8x1xf32>
    %92 = vector.broadcast %91 : vector<8x1xf32> to vector<8x158xf32>
    %93 = arith.addf %89, %92 : vector<8x158xf32>
    %94 = vector.extract_strided_slice %18 {offsets = [0, 113], sizes = [1, 158], strides = [1, 1]} : vector<1x384xf32> to vector<1x158xf32>
    %95 = vector.broadcast %94 : vector<1x158xf32> to vector<8x158xf32>
    %96 = arith.mulf %93, %95 : vector<8x158xf32>
    %cst_66 = arith.constant 0.000000e+00 : f32
    %97 = vector.broadcast %cst_66 : f32 to vector<8x158xf32>
    %98 = arith.cmpf oge, %96, %97 : vector<8x158xf32>
    %cst_67 = arith.constant 1.000000e-01 : f32
    %99 = vector.broadcast %cst_67 : f32 to vector<8x158xf32>
    %100 = arith.mulf %99, %96 : vector<8x158xf32>
    %101 = arith.select %98, %96, %100 : vector<8x158xi1>, vector<8x158xf32>
    %c1_68 = arith.constant 1 : index
    %c0_69 = arith.constant 0 : index
    %c0_70 = arith.constant 0 : index
    %c0_71 = arith.constant 0 : index
    %102 = vector.load %arg7[%c1_68, %c0_69, %c0_70, %c0_71] : memref<4x3x8x8xf32, #tpu.memory_space<vmem>>, vector<1x1x8x8xf32>
    %103 = vector.shape_cast %102 : vector<1x1x8x8xf32> to vector<8x8xf32>
    %104 = vector.extract_strided_slice %101 {offsets = [0, 0], sizes = [8, 156], strides = [1, 1]} : vector<8x158xf32> to vector<8x156xf32>
    %cst_72 = arith.constant dense<0.000000e+00> : vector<8x156xf32>
    %105 = tpu.matmul %103, %104, %cst_72 {dimension_numbers = #tpu.dot_dimension_numbers<[1], [0], [0], [1], [0, 0, 1, 1], [], []>} : vector<8x8xf32>, vector<8x156xf32>, vector<8x156xf32> -> vector<8x156xf32>
    %c1_73 = arith.constant 1 : index
    %c1_74 = arith.constant 1 : index
    %c0_75 = arith.constant 0 : index
    %c0_76 = arith.constant 0 : index
    %106 = vector.load %arg7[%c1_73, %c1_74, %c0_75, %c0_76] : memref<4x3x8x8xf32, #tpu.memory_space<vmem>>, vector<1x1x8x8xf32>
    %107 = vector.shape_cast %106 : vector<1x1x8x8xf32> to vector<8x8xf32>
    %108 = vector.extract_strided_slice %101 {offsets = [0, 1], sizes = [8, 156], strides = [1, 1]} : vector<8x158xf32> to vector<8x156xf32>
    %cst_77 = arith.constant dense<0.000000e+00> : vector<8x156xf32>
    %109 = tpu.matmul %107, %108, %cst_77 {dimension_numbers = #tpu.dot_dimension_numbers<[1], [0], [0], [1], [0, 0, 1, 1], [], []>} : vector<8x8xf32>, vector<8x156xf32>, vector<8x156xf32> -> vector<8x156xf32>
    %110 = arith.addf %105, %109 : vector<8x156xf32>
    %c1_78 = arith.constant 1 : index
    %c2_79 = arith.constant 2 : index
    %c0_80 = arith.constant 0 : index
    %c0_81 = arith.constant 0 : index
    %111 = vector.load %arg7[%c1_78, %c2_79, %c0_80, %c0_81] : memref<4x3x8x8xf32, #tpu.memory_space<vmem>>, vector<1x1x8x8xf32>
    %112 = vector.shape_cast %111 : vector<1x1x8x8xf32> to vector<8x8xf32>
    %113 = vector.extract_strided_slice %101 {offsets = [0, 2], sizes = [8, 156], strides = [1, 1]} : vector<8x158xf32> to vector<8x156xf32>
    %cst_82 = arith.constant dense<0.000000e+00> : vector<8x156xf32>
    %114 = tpu.matmul %112, %113, %cst_82 {dimension_numbers = #tpu.dot_dimension_numbers<[1], [0], [0], [1], [0, 0, 1, 1], [], []>} : vector<8x8xf32>, vector<8x156xf32>, vector<8x156xf32> -> vector<8x156xf32>
    %115 = arith.addf %110, %114 : vector<8x156xf32>
    %c1_83 = arith.constant 1 : index
    %c0_84 = arith.constant 0 : index
    %c0_85 = arith.constant 0 : index
    %116 = vector.load %arg8[%c1_83, %c0_84, %c0_85] : memref<4x8x1xf32, #tpu.memory_space<vmem>>, vector<1x8x1xf32>
    %117 = vector.shape_cast %116 : vector<1x8x1xf32> to vector<8x1xf32>
    %118 = vector.broadcast %117 : vector<8x1xf32> to vector<8x156xf32>
    %119 = arith.addf %115, %118 : vector<8x156xf32>
    %120 = vector.extract_strided_slice %18 {offsets = [0, 114], sizes = [1, 156], strides = [1, 1]} : vector<1x384xf32> to vector<1x156xf32>
    %121 = vector.broadcast %120 : vector<1x156xf32> to vector<8x156xf32>
    %122 = arith.mulf %119, %121 : vector<8x156xf32>
    %cst_86 = arith.constant 0.000000e+00 : f32
    %123 = vector.broadcast %cst_86 : f32 to vector<8x156xf32>
    %124 = arith.cmpf oge, %122, %123 : vector<8x156xf32>
    %cst_87 = arith.constant 1.000000e-01 : f32
    %125 = vector.broadcast %cst_87 : f32 to vector<8x156xf32>
    %126 = arith.mulf %125, %122 : vector<8x156xf32>
    %127 = arith.select %124, %122, %126 : vector<8x156xi1>, vector<8x156xf32>
    %c2_88 = arith.constant 2 : index
    %c0_89 = arith.constant 0 : index
    %c0_90 = arith.constant 0 : index
    %c0_91 = arith.constant 0 : index
    %128 = vector.load %arg5[%c2_88, %c0_89, %c0_90, %c0_91] : memref<4x3x8x8xf32, #tpu.memory_space<vmem>>, vector<1x1x8x8xf32>
    %129 = vector.shape_cast %128 : vector<1x1x8x8xf32> to vector<8x8xf32>
    %130 = vector.extract_strided_slice %127 {offsets = [0, 0], sizes = [8, 146], strides = [1, 1]} : vector<8x156xf32> to vector<8x146xf32>
    %cst_92 = arith.constant dense<0.000000e+00> : vector<8x146xf32>
    %131 = tpu.matmul %129, %130, %cst_92 {dimension_numbers = #tpu.dot_dimension_numbers<[1], [0], [0], [1], [0, 0, 1, 1], [], []>} : vector<8x8xf32>, vector<8x146xf32>, vector<8x146xf32> -> vector<8x146xf32>
    %c2_93 = arith.constant 2 : index
    %c1_94 = arith.constant 1 : index
    %c0_95 = arith.constant 0 : index
    %c0_96 = arith.constant 0 : index
    %132 = vector.load %arg5[%c2_93, %c1_94, %c0_95, %c0_96] : memref<4x3x8x8xf32, #tpu.memory_space<vmem>>, vector<1x1x8x8xf32>
    %133 = vector.shape_cast %132 : vector<1x1x8x8xf32> to vector<8x8xf32>
    %134 = vector.extract_strided_slice %127 {offsets = [0, 5], sizes = [8, 146], strides = [1, 1]} : vector<8x156xf32> to vector<8x146xf32>
    %cst_97 = arith.constant dense<0.000000e+00> : vector<8x146xf32>
    %135 = tpu.matmul %133, %134, %cst_97 {dimension_numbers = #tpu.dot_dimension_numbers<[1], [0], [0], [1], [0, 0, 1, 1], [], []>} : vector<8x8xf32>, vector<8x146xf32>, vector<8x146xf32> -> vector<8x146xf32>
    %136 = arith.addf %131, %135 : vector<8x146xf32>
    %c2_98 = arith.constant 2 : index
    %c2_99 = arith.constant 2 : index
    %c0_100 = arith.constant 0 : index
    %c0_101 = arith.constant 0 : index
    %137 = vector.load %arg5[%c2_98, %c2_99, %c0_100, %c0_101] : memref<4x3x8x8xf32, #tpu.memory_space<vmem>>, vector<1x1x8x8xf32>
    %138 = vector.shape_cast %137 : vector<1x1x8x8xf32> to vector<8x8xf32>
    %139 = vector.extract_strided_slice %127 {offsets = [0, 10], sizes = [8, 146], strides = [1, 1]} : vector<8x156xf32> to vector<8x146xf32>
    %cst_102 = arith.constant dense<0.000000e+00> : vector<8x146xf32>
    %140 = tpu.matmul %138, %139, %cst_102 {dimension_numbers = #tpu.dot_dimension_numbers<[1], [0], [0], [1], [0, 0, 1, 1], [], []>} : vector<8x8xf32>, vector<8x146xf32>, vector<8x146xf32> -> vector<8x146xf32>
    %141 = arith.addf %136, %140 : vector<8x146xf32>
    %c2_103 = arith.constant 2 : index
    %c0_104 = arith.constant 0 : index
    %c0_105 = arith.constant 0 : index
    %142 = vector.load %arg6[%c2_103, %c0_104, %c0_105] : memref<4x8x1xf32, #tpu.memory_space<vmem>>, vector<1x8x1xf32>
    %143 = vector.shape_cast %142 : vector<1x8x1xf32> to vector<8x1xf32>
    %144 = vector.broadcast %143 : vector<8x1xf32> to vector<8x146xf32>
    %145 = arith.addf %141, %144 : vector<8x146xf32>
    %146 = vector.extract_strided_slice %18 {offsets = [0, 119], sizes = [1, 146], strides = [1, 1]} : vector<1x384xf32> to vector<1x146xf32>
    %147 = vector.broadcast %146 : vector<1x146xf32> to vector<8x146xf32>
    %148 = arith.mulf %145, %147 : vector<8x146xf32>
    %cst_106 = arith.constant 0.000000e+00 : f32
    %149 = vector.broadcast %cst_106 : f32 to vector<8x146xf32>
    %150 = arith.cmpf oge, %148, %149 : vector<8x146xf32>
    %cst_107 = arith.constant 1.000000e-01 : f32
    %151 = vector.broadcast %cst_107 : f32 to vector<8x146xf32>
    %152 = arith.mulf %151, %148 : vector<8x146xf32>
    %153 = arith.select %150, %148, %152 : vector<8x146xi1>, vector<8x146xf32>
    %c2_108 = arith.constant 2 : index
    %c0_109 = arith.constant 0 : index
    %c0_110 = arith.constant 0 : index
    %c0_111 = arith.constant 0 : index
    %154 = vector.load %arg7[%c2_108, %c0_109, %c0_110, %c0_111] : memref<4x3x8x8xf32, #tpu.memory_space<vmem>>, vector<1x1x8x8xf32>
    %155 = vector.shape_cast %154 : vector<1x1x8x8xf32> to vector<8x8xf32>
    %156 = vector.extract_strided_slice %153 {offsets = [0, 0], sizes = [8, 144], strides = [1, 1]} : vector<8x146xf32> to vector<8x144xf32>
    %cst_112 = arith.constant dense<0.000000e+00> : vector<8x144xf32>
    %157 = tpu.matmul %155, %156, %cst_112 {dimension_numbers = #tpu.dot_dimension_numbers<[1], [0], [0], [1], [0, 0, 1, 1], [], []>} : vector<8x8xf32>, vector<8x144xf32>, vector<8x144xf32> -> vector<8x144xf32>
    %c2_113 = arith.constant 2 : index
    %c1_114 = arith.constant 1 : index
    %c0_115 = arith.constant 0 : index
    %c0_116 = arith.constant 0 : index
    %158 = vector.load %arg7[%c2_113, %c1_114, %c0_115, %c0_116] : memref<4x3x8x8xf32, #tpu.memory_space<vmem>>, vector<1x1x8x8xf32>
    %159 = vector.shape_cast %158 : vector<1x1x8x8xf32> to vector<8x8xf32>
    %160 = vector.extract_strided_slice %153 {offsets = [0, 1], sizes = [8, 144], strides = [1, 1]} : vector<8x146xf32> to vector<8x144xf32>
    %cst_117 = arith.constant dense<0.000000e+00> : vector<8x144xf32>
    %161 = tpu.matmul %159, %160, %cst_117 {dimension_numbers = #tpu.dot_dimension_numbers<[1], [0], [0], [1], [0, 0, 1, 1], [], []>} : vector<8x8xf32>, vector<8x144xf32>, vector<8x144xf32> -> vector<8x144xf32>
    %162 = arith.addf %157, %161 : vector<8x144xf32>
    %c2_118 = arith.constant 2 : index
    %c2_119 = arith.constant 2 : index
    %c0_120 = arith.constant 0 : index
    %c0_121 = arith.constant 0 : index
    %163 = vector.load %arg7[%c2_118, %c2_119, %c0_120, %c0_121] : memref<4x3x8x8xf32, #tpu.memory_space<vmem>>, vector<1x1x8x8xf32>
    %164 = vector.shape_cast %163 : vector<1x1x8x8xf32> to vector<8x8xf32>
    %165 = vector.extract_strided_slice %153 {offsets = [0, 2], sizes = [8, 144], strides = [1, 1]} : vector<8x146xf32> to vector<8x144xf32>
    %cst_122 = arith.constant dense<0.000000e+00> : vector<8x144xf32>
    %166 = tpu.matmul %164, %165, %cst_122 {dimension_numbers = #tpu.dot_dimension_numbers<[1], [0], [0], [1], [0, 0, 1, 1], [], []>} : vector<8x8xf32>, vector<8x144xf32>, vector<8x144xf32> -> vector<8x144xf32>
    %167 = arith.addf %162, %166 : vector<8x144xf32>
    %c2_123 = arith.constant 2 : index
    %c0_124 = arith.constant 0 : index
    %c0_125 = arith.constant 0 : index
    %168 = vector.load %arg8[%c2_123, %c0_124, %c0_125] : memref<4x8x1xf32, #tpu.memory_space<vmem>>, vector<1x8x1xf32>
    %169 = vector.shape_cast %168 : vector<1x8x1xf32> to vector<8x1xf32>
    %170 = vector.broadcast %169 : vector<8x1xf32> to vector<8x144xf32>
    %171 = arith.addf %167, %170 : vector<8x144xf32>
    %172 = vector.extract_strided_slice %18 {offsets = [0, 120], sizes = [1, 144], strides = [1, 1]} : vector<1x384xf32> to vector<1x144xf32>
    %173 = vector.broadcast %172 : vector<1x144xf32> to vector<8x144xf32>
    %174 = arith.mulf %171, %173 : vector<8x144xf32>
    %cst_126 = arith.constant 0.000000e+00 : f32
    %175 = vector.broadcast %cst_126 : f32 to vector<8x144xf32>
    %176 = arith.cmpf oge, %174, %175 : vector<8x144xf32>
    %cst_127 = arith.constant 1.000000e-01 : f32
    %177 = vector.broadcast %cst_127 : f32 to vector<8x144xf32>
    %178 = arith.mulf %177, %174 : vector<8x144xf32>
    %179 = arith.select %176, %174, %178 : vector<8x144xi1>, vector<8x144xf32>
    %c3 = arith.constant 3 : index
    %c0_128 = arith.constant 0 : index
    %c0_129 = arith.constant 0 : index
    %c0_130 = arith.constant 0 : index
    %180 = vector.load %arg5[%c3, %c0_128, %c0_129, %c0_130] : memref<4x3x8x8xf32, #tpu.memory_space<vmem>>, vector<1x1x8x8xf32>
    %181 = vector.shape_cast %180 : vector<1x1x8x8xf32> to vector<8x8xf32>
    %182 = vector.extract_strided_slice %179 {offsets = [0, 0], sizes = [8, 130], strides = [1, 1]} : vector<8x144xf32> to vector<8x130xf32>
    %cst_131 = arith.constant dense<0.000000e+00> : vector<8x130xf32>
    %183 = tpu.matmul %181, %182, %cst_131 {dimension_numbers = #tpu.dot_dimension_numbers<[1], [0], [0], [1], [0, 0, 1, 1], [], []>} : vector<8x8xf32>, vector<8x130xf32>, vector<8x130xf32> -> vector<8x130xf32>
    %c3_132 = arith.constant 3 : index
    %c1_133 = arith.constant 1 : index
    %c0_134 = arith.constant 0 : index
    %c0_135 = arith.constant 0 : index
    %184 = vector.load %arg5[%c3_132, %c1_133, %c0_134, %c0_135] : memref<4x3x8x8xf32, #tpu.memory_space<vmem>>, vector<1x1x8x8xf32>
    %185 = vector.shape_cast %184 : vector<1x1x8x8xf32> to vector<8x8xf32>
    %186 = vector.extract_strided_slice %179 {offsets = [0, 7], sizes = [8, 130], strides = [1, 1]} : vector<8x144xf32> to vector<8x130xf32>
    %cst_136 = arith.constant dense<0.000000e+00> : vector<8x130xf32>
    %187 = tpu.matmul %185, %186, %cst_136 {dimension_numbers = #tpu.dot_dimension_numbers<[1], [0], [0], [1], [0, 0, 1, 1], [], []>} : vector<8x8xf32>, vector<8x130xf32>, vector<8x130xf32> -> vector<8x130xf32>
    %188 = arith.addf %183, %187 : vector<8x130xf32>
    %c3_137 = arith.constant 3 : index
    %c2_138 = arith.constant 2 : index
    %c0_139 = arith.constant 0 : index
    %c0_140 = arith.constant 0 : index
    %189 = vector.load %arg5[%c3_137, %c2_138, %c0_139, %c0_140] : memref<4x3x8x8xf32, #tpu.memory_space<vmem>>, vector<1x1x8x8xf32>
    %190 = vector.shape_cast %189 : vector<1x1x8x8xf32> to vector<8x8xf32>
    %191 = vector.extract_strided_slice %179 {offsets = [0, 14], sizes = [8, 130], strides = [1, 1]} : vector<8x144xf32> to vector<8x130xf32>
    %cst_141 = arith.constant dense<0.000000e+00> : vector<8x130xf32>
    %192 = tpu.matmul %190, %191, %cst_141 {dimension_numbers = #tpu.dot_dimension_numbers<[1], [0], [0], [1], [0, 0, 1, 1], [], []>} : vector<8x8xf32>, vector<8x130xf32>, vector<8x130xf32> -> vector<8x130xf32>
    %193 = arith.addf %188, %192 : vector<8x130xf32>
    %c3_142 = arith.constant 3 : index
    %c0_143 = arith.constant 0 : index
    %c0_144 = arith.constant 0 : index
    %194 = vector.load %arg6[%c3_142, %c0_143, %c0_144] : memref<4x8x1xf32, #tpu.memory_space<vmem>>, vector<1x8x1xf32>
    %195 = vector.shape_cast %194 : vector<1x8x1xf32> to vector<8x1xf32>
    %196 = vector.broadcast %195 : vector<8x1xf32> to vector<8x130xf32>
    %197 = arith.addf %193, %196 : vector<8x130xf32>
    %198 = vector.extract_strided_slice %18 {offsets = [0, 127], sizes = [1, 130], strides = [1, 1]} : vector<1x384xf32> to vector<1x130xf32>
    %199 = vector.broadcast %198 : vector<1x130xf32> to vector<8x130xf32>
    %200 = arith.mulf %197, %199 : vector<8x130xf32>
    %cst_145 = arith.constant 0.000000e+00 : f32
    %201 = vector.broadcast %cst_145 : f32 to vector<8x130xf32>
    %202 = arith.cmpf oge, %200, %201 : vector<8x130xf32>
    %cst_146 = arith.constant 1.000000e-01 : f32
    %203 = vector.broadcast %cst_146 : f32 to vector<8x130xf32>
    %204 = arith.mulf %203, %200 : vector<8x130xf32>
    %205 = arith.select %202, %200, %204 : vector<8x130xi1>, vector<8x130xf32>
    %c3_147 = arith.constant 3 : index
    %c0_148 = arith.constant 0 : index
    %c0_149 = arith.constant 0 : index
    %c0_150 = arith.constant 0 : index
    %206 = vector.load %arg7[%c3_147, %c0_148, %c0_149, %c0_150] : memref<4x3x8x8xf32, #tpu.memory_space<vmem>>, vector<1x1x8x8xf32>
    %207 = vector.shape_cast %206 : vector<1x1x8x8xf32> to vector<8x8xf32>
    %208 = vector.extract_strided_slice %205 {offsets = [0, 0], sizes = [8, 128], strides = [1, 1]} : vector<8x130xf32> to vector<8x128xf32>
    %cst_151 = arith.constant dense<0.000000e+00> : vector<8x128xf32>
    %209 = tpu.matmul %207, %208, %cst_151 {dimension_numbers = #tpu.dot_dimension_numbers<[1], [0], [0], [1], [0, 0, 1, 1], [], []>} : vector<8x8xf32>, vector<8x128xf32>, vector<8x128xf32> -> vector<8x128xf32>
    %c3_152 = arith.constant 3 : index
    %c1_153 = arith.constant 1 : index
    %c0_154 = arith.constant 0 : index
    %c0_155 = arith.constant 0 : index
    %210 = vector.load %arg7[%c3_152, %c1_153, %c0_154, %c0_155] : memref<4x3x8x8xf32, #tpu.memory_space<vmem>>, vector<1x1x8x8xf32>
    %211 = vector.shape_cast %210 : vector<1x1x8x8xf32> to vector<8x8xf32>
    %212 = vector.extract_strided_slice %205 {offsets = [0, 1], sizes = [8, 128], strides = [1, 1]} : vector<8x130xf32> to vector<8x128xf32>
    %cst_156 = arith.constant dense<0.000000e+00> : vector<8x128xf32>
    %213 = tpu.matmul %211, %212, %cst_156 {dimension_numbers = #tpu.dot_dimension_numbers<[1], [0], [0], [1], [0, 0, 1, 1], [], []>} : vector<8x8xf32>, vector<8x128xf32>, vector<8x128xf32> -> vector<8x128xf32>
    %214 = arith.addf %209, %213 : vector<8x128xf32>
    %c3_157 = arith.constant 3 : index
    %c2_158 = arith.constant 2 : index
    %c0_159 = arith.constant 0 : index
    %c0_160 = arith.constant 0 : index
    %215 = vector.load %arg7[%c3_157, %c2_158, %c0_159, %c0_160] : memref<4x3x8x8xf32, #tpu.memory_space<vmem>>, vector<1x1x8x8xf32>
    %216 = vector.shape_cast %215 : vector<1x1x8x8xf32> to vector<8x8xf32>
    %217 = vector.extract_strided_slice %205 {offsets = [0, 2], sizes = [8, 128], strides = [1, 1]} : vector<8x130xf32> to vector<8x128xf32>
    %cst_161 = arith.constant dense<0.000000e+00> : vector<8x128xf32>
    %218 = tpu.matmul %216, %217, %cst_161 {dimension_numbers = #tpu.dot_dimension_numbers<[1], [0], [0], [1], [0, 0, 1, 1], [], []>} : vector<8x8xf32>, vector<8x128xf32>, vector<8x128xf32> -> vector<8x128xf32>
    %219 = arith.addf %214, %218 : vector<8x128xf32>
    %c3_162 = arith.constant 3 : index
    %c0_163 = arith.constant 0 : index
    %c0_164 = arith.constant 0 : index
    %220 = vector.load %arg8[%c3_162, %c0_163, %c0_164] : memref<4x8x1xf32, #tpu.memory_space<vmem>>, vector<1x8x1xf32>
    %221 = vector.shape_cast %220 : vector<1x8x1xf32> to vector<8x1xf32>
    %222 = vector.broadcast %221 : vector<8x1xf32> to vector<8x128xf32>
    %223 = arith.addf %219, %222 : vector<8x128xf32>
    %224 = vector.extract_strided_slice %18 {offsets = [0, 128], sizes = [1, 128], strides = [1, 1]} : vector<1x384xf32> to vector<1x128xf32>
    %225 = vector.broadcast %224 : vector<1x128xf32> to vector<8x128xf32>
    %226 = arith.mulf %223, %225 : vector<8x128xf32>
    %c0_165 = arith.constant 0 : index
    %c0_166 = arith.constant 0 : index
    %c0_167 = arith.constant 0 : index
    %227 = vector.load %arg3[%c0_165, %c0_166, %c0_167] : memref<1x8x128xf32, #tpu.memory_space<vmem>>, vector<1x8x128xf32>
    %228 = vector.shape_cast %227 : vector<1x8x128xf32> to vector<8x128xf32>
    %229 = arith.addf %226, %228 : vector<8x128xf32>
    %c0_168 = arith.constant 0 : index
    %c0_169 = arith.constant 0 : index
    %c0_170 = arith.constant 0 : index
    %230 = vector.load %arg9[%c0_168, %c0_169, %c0_170] : memref<1x8x128xf32, #tpu.memory_space<vmem>>, vector<1x8x128xf32>
    %231 = vector.shape_cast %230 : vector<1x8x128xf32> to vector<8x128xf32>
    %232 = vector.shape_cast %229 : vector<8x128xf32> to vector<1x8x128xf32>
    tpu.vector_store %arg9[%c0_168, %c0_169, %c0_170], %232 {strides = array<i32>} : memref<1x8x128xf32, #tpu.memory_space<vmem>>, vector<1x8x128xf32>,
    return
  }
  func.func @transform_0(%arg0: i32, %arg1: i32) -> (i32, i32, i32) {
    %c1_i32 = arith.constant 1 : i32
    %0 = arith.addi %arg1, %c1_i32 : i32
    %c1_i32_0 = arith.constant 1 : i32
    %1 = arith.muli %0, %c1_i32_0 : i32
    %c1_i32_1 = arith.constant 1 : i32
    %2 = arith.subi %1, %c1_i32_1 : i32
    %c0_i32 = arith.constant 0 : i32
    %c0_i32_2 = arith.constant 0 : i32
    return %arg0, %c0_i32, %2 : i32, i32, i32
  }
  func.func @transform_1(%arg0: i32, %arg1: i32) -> (i32, i32, i32) {
    %c1_i32 = arith.constant 1 : i32
    %0 = arith.addi %arg1, %c1_i32 : i32
    %c0_i32 = arith.constant 0 : i32
    %c0_i32_0 = arith.constant 0 : i32
    return %arg0, %c0_i32, %0 : i32, i32, i32
  }
  func.func @transform_2(%arg0: i32, %arg1: i32) -> (i32, i32, i32) {
    %c2_i32 = arith.constant 2 : i32
    %0 = arith.addi %arg1, %c2_i32 : i32
    %c1_i32 = arith.constant 1 : i32
    %1 = arith.muli %0, %c1_i32 : i32
    %c0_i32 = arith.constant 0 : i32
    %c0_i32_0 = arith.constant 0 : i32
    return %arg0, %c0_i32, %1 : i32, i32, i32
  }
  func.func @transform_3(%arg0: i32, %arg1: i32) -> (i32, i32, i32, i32) {
    %c0_i32 = arith.constant 0 : i32
    %c0_i32_0 = arith.constant 0 : i32
    %c0_i32_1 = arith.constant 0 : i32
    %c0_i32_2 = arith.constant 0 : i32
    %c0_i32_3 = arith.constant 0 : i32
    return %c0_i32, %c0_i32_0, %c0_i32_1, %c0_i32_2 : i32, i32, i32, i32
  }
  func.func @transform_4(%arg0: i32, %arg1: i32) -> (i32, i32, i32) {
    %c0_i32 = arith.constant 0 : i32
    %c0_i32_0 = arith.constant 0 : i32
    %c0_i32_1 = arith.constant 0 : i32
    %c0_i32_2 = arith.constant 0 : i32
    return %c0_i32, %c0_i32_0, %c0_i32_1 : i32, i32, i32
  }
  func.func @transform_5(%arg0: i32, %arg1: i32) -> (i32, i32, i32, i32) {
    %c0_i32 = arith.constant 0 : i32
    %c0_i32_0 = arith.constant 0 : i32
    %c0_i32_1 = arith.constant 0 : i32
    %c0_i32_2 = arith.constant 0 : i32
    %c0_i32_3 = arith.constant 0 : i32
    return %c0_i32, %c0_i32_0, %c0_i32_1, %c0_i32_2 : i32, i32, i32, i32
  }
  func.func @transform_6(%arg0: i32, %arg1: i32) -> (i32, i32, i32) {
    %c0_i32 = arith.constant 0 : i32
    %c0_i32_0 = arith.constant 0 : i32
    %c0_i32_1 = arith.constant 0 : i32
    %c0_i32_2 = arith.constant 0 : i32
    return %c0_i32, %c0_i32_0, %c0_i32_1 : i32, i32, i32
  }
  func.func @transform_7(%arg0: i32, %arg1: i32) -> (i32, i32, i32) {
    %c0_i32 = arith.constant 0 : i32
    %c0_i32_0 = arith.constant 0 : i32
    return %arg0, %c0_i32, %arg1 : i32, i32, i32
  }
}

module attributes {stable_mosaic.version = 11 : i64} {
  func.func @_block_kernel(%arg0: i32, %arg1: i32, %arg2: memref<1x8x128xf32, #tpu.memory_space<vmem>>, %arg3: memref<1x8x128xf32, #tpu.memory_space<vmem>>, %arg4: memref<1x8x128xf32, #tpu.memory_space<vmem>>, %arg5: memref<4x3x8x8xf32, #tpu.memory_space<vmem>>, %arg6: memref<4x8x1xf32, #tpu.memory_space<vmem>>, %arg7: memref<4x3x8x8xf32, #tpu.memory_space<vmem>>, %arg8: memref<4x8x1xf32, #tpu.memory_space<vmem>>, %arg9: memref<1x8x128xf32, #tpu.memory_space<vmem>>) attributes {dimension_semantics = [#tpu.dimension_semantics<parallel>, #tpu.dimension_semantics<parallel>], iteration_bounds = array<i64: 2, 1>, scalar_prefetch = 0 : i64, scratch_operands = 0 : i64, tpu.core_type = #tpu.core_type<tc>, window_params = [{transform_indices = @transform_0, window_bounds = array<i64: 1, 8, 128>}, {transform_indices = @transform_1, window_bounds = array<i64: 1, 8, 128>}, {transform_indices = @transform_2, window_bounds = array<i64: 1, 8, 128>}, {pipeline_mode = #tpu.pipeline_mode<synchronous>, transform_indices = @transform_3, window_bounds = array<i64: 4, 3, 8, 8>}, {pipeline_mode = #tpu.pipeline_mode<synchronous>, transform_indices = @transform_4, window_bounds = array<i64: 4, 8, 1>}, {pipeline_mode = #tpu.pipeline_mode<synchronous>, transform_indices = @transform_5, window_bounds = array<i64: 4, 3, 8, 8>}, {pipeline_mode = #tpu.pipeline_mode<synchronous>, transform_indices = @transform_6, window_bounds = array<i64: 4, 8, 1>}, {transform_indices = @transform_7, window_bounds = array<i64: 1, 8, 128>}]} {
    %c0 = arith.constant 0 : index
    %c0_0 = arith.constant 0 : index
    %c0_1 = arith.constant 0 : index
    %0 = vector.load %arg2[%c0, %c0_0, %c0_1] : memref<1x8x128xf32, #tpu.memory_space<vmem>>, vector<1x8x128xf32>
    %1 = vector.shape_cast %0 : vector<1x8x128xf32> to vector<8x128xf32>
    %c0_2 = arith.constant 0 : index
    %c0_3 = arith.constant 0 : index
    %c0_4 = arith.constant 0 : index
    %2 = vector.load %arg3[%c0_2, %c0_3, %c0_4] : memref<1x8x128xf32, #tpu.memory_space<vmem>>, vector<1x8x128xf32>
    %3 = vector.shape_cast %2 : vector<1x8x128xf32> to vector<8x128xf32>
    %c0_5 = arith.constant 0 : index
    %c0_6 = arith.constant 0 : index
    %c0_7 = arith.constant 0 : index
    %4 = vector.load %arg4[%c0_5, %c0_6, %c0_7] : memref<1x8x128xf32, #tpu.memory_space<vmem>>, vector<1x8x128xf32>
    %5 = vector.shape_cast %4 : vector<1x8x128xf32> to vector<8x128xf32>
    %6 = tpu.concatenate %1, %3, %5 in 1 : vector<8x128xf32>, vector<8x128xf32>, vector<8x128xf32> -> vector<8x384xf32>
    %c128_i32 = arith.constant 128 : i32
    %7 = arith.muli %arg1, %c128_i32 : i32
    %c128_i32_8 = arith.constant 128 : i32
    %8 = arith.subi %7, %c128_i32_8 : i32
    %9 = tpu.iota {dimensions = array<i32: 1>} : vector<1x384xi32>
    %10 = vector.broadcast %8 : i32 to vector<1x384xi32>
    %11 = arith.addi %10, %9 : vector<1x384xi32>
    %c0_i32 = arith.constant 0 : i32
    %12 = vector.broadcast %c0_i32 : i32 to vector<1x384xi32>
    %13 = arith.cmpi sge, %11, %12 : vector<1x384xi32>
    %c16_i32 = arith.constant 16 : i32
    %14 = vector.broadcast %c16_i32 : i32 to vector<1x384xi32>
    %15 = arith.cmpi slt, %11, %14 : vector<1x384xi32>
    %16 = arith.andi %13, %15 : vector<1x384xi1>
    %17 = arith.extui %16 : vector<1x384xi1> to vector<1x384xi32>
    %18 = arith.sitofp %17 : vector<1x384xi32> to vector<1x384xf32>
    %cst = arith.constant 0.000000e+00 : f32
    %19 = vector.broadcast %cst : f32 to vector<8x384xf32>
    %20 = arith.cmpf oge, %6, %19 : vector<8x384xf32>
    %cst_9 = arith.constant 1.000000e-01 : f32
    %21 = vector.broadcast %cst_9 : f32 to vector<8x384xf32>
    %22 = arith.mulf %21, %6 : vector<8x384xf32>
    %23 = arith.select %20, %6, %22 : vector<8x384xi1>, vector<8x384xf32>
    %c0_10 = arith.constant 0 : index
    %c0_11 = arith.constant 0 : index
    %c0_12 = arith.constant 0 : index
    %c0_13 = arith.constant 0 : index
    %24 = vector.load %arg5[%c0_10, %c0_11, %c0_12, %c0_13] : memref<4x3x8x8xf32, #tpu.memory_space<vmem>>, vector<1x1x8x8xf32>
    %25 = vector.shape_cast %24 : vector<1x1x8x8xf32> to vector<8x8xf32>
    %26 = vector.extract_strided_slice %23 {offsets = [0, 108], sizes = [8, 166], strides = [1, 1]} : vector<8x384xf32> to vector<8x166xf32>
    %cst_14 = arith.constant dense<0.000000e+00> : vector<8x166xf32>
    %27 = tpu.matmul %25, %26, %cst_14 {dimension_numbers = #tpu.dot_dimension_numbers<[1], [0], [0], [1], [0, 0, 1, 1], [], []>} : vector<8x8xf32>, vector<8x166xf32>, vector<8x166xf32> -> vector<8x166xf32>
    %c0_15 = arith.constant 0 : index
    %c1 = arith.constant 1 : index
    %c0_16 = arith.constant 0 : index
    %c0_17 = arith.constant 0 : index
    %28 = vector.load %arg5[%c0_15, %c1, %c0_16, %c0_17] : memref<4x3x8x8xf32, #tpu.memory_space<vmem>>, vector<1x1x8x8xf32>
    %29 = vector.shape_cast %28 : vector<1x1x8x8xf32> to vector<8x8xf32>
    %30 = vector.extract_strided_slice %23 {offsets = [0, 109], sizes = [8, 166], strides = [1, 1]} : vector<8x384xf32> to vector<8x166xf32>
    %cst_18 = arith.constant dense<0.000000e+00> : vector<8x166xf32>
    %31 = tpu.matmul %29, %30, %cst_18 {dimension_numbers = #tpu.dot_dimension_numbers<[1], [0], [0], [1], [0, 0, 1, 1], [], []>} : vector<8x8xf32>, vector<8x166xf32>, vector<8x166xf32> -> vector<8x166xf32>
    %32 = arith.addf %27, %31 : vector<8x166xf32>
    %c0_19 = arith.constant 0 : index
    %c2 = arith.constant 2 : index
    %c0_20 = arith.constant 0 : index
    %c0_21 = arith.constant 0 : index
    %33 = vector.load %arg5[%c0_19, %c2, %c0_20, %c0_21] : memref<4x3x8x8xf32, #tpu.memory_space<vmem>>, vector<1x1x8x8xf32>
    %34 = vector.shape_cast %33 : vector<1x1x8x8xf32> to vector<8x8xf32>
    %35 = vector.extract_strided_slice %23 {offsets = [0, 110], sizes = [8, 166], strides = [1, 1]} : vector<8x384xf32> to vector<8x166xf32>
    %cst_22 = arith.constant dense<0.000000e+00> : vector<8x166xf32>
    %36 = tpu.matmul %34, %35, %cst_22 {dimension_numbers = #tpu.dot_dimension_numbers<[1], [0], [0], [1], [0, 0, 1, 1], [], []>} : vector<8x8xf32>, vector<8x166xf32>, vector<8x166xf32> -> vector<8x166xf32>
    %37 = arith.addf %32, %36 : vector<8x166xf32>
    %c0_23 = arith.constant 0 : index
    %c0_24 = arith.constant 0 : index
    %c0_25 = arith.constant 0 : index
    %38 = vector.load %arg6[%c0_23, %c0_24, %c0_25] : memref<4x8x1xf32, #tpu.memory_space<vmem>>, vector<1x8x1xf32>
    %39 = vector.shape_cast %38 : vector<1x8x1xf32> to vector<8x1xf32>
    %40 = vector.broadcast %39 : vector<8x1xf32> to vector<8x166xf32>
    %41 = arith.addf %37, %40 : vector<8x166xf32>
    %42 = vector.extract_strided_slice %18 {offsets = [0, 109], sizes = [1, 166], strides = [1, 1]} : vector<1x384xf32> to vector<1x166xf32>
    %43 = vector.broadcast %42 : vector<1x166xf32> to vector<8x166xf32>
    %44 = arith.mulf %41, %43 : vector<8x166xf32>
    %cst_26 = arith.constant 0.000000e+00 : f32
    %45 = vector.broadcast %cst_26 : f32 to vector<8x166xf32>
    %46 = arith.cmpf oge, %44, %45 : vector<8x166xf32>
    %cst_27 = arith.constant 1.000000e-01 : f32
    %47 = vector.broadcast %cst_27 : f32 to vector<8x166xf32>
    %48 = arith.mulf %47, %44 : vector<8x166xf32>
    %49 = arith.select %46, %44, %48 : vector<8x166xi1>, vector<8x166xf32>
    %c0_28 = arith.constant 0 : index
    %c0_29 = arith.constant 0 : index
    %c0_30 = arith.constant 0 : index
    %c0_31 = arith.constant 0 : index
    %50 = vector.load %arg7[%c0_28, %c0_29, %c0_30, %c0_31] : memref<4x3x8x8xf32, #tpu.memory_space<vmem>>, vector<1x1x8x8xf32>
    %51 = vector.shape_cast %50 : vector<1x1x8x8xf32> to vector<8x8xf32>
    %52 = vector.extract_strided_slice %49 {offsets = [0, 0], sizes = [8, 164], strides = [1, 1]} : vector<8x166xf32> to vector<8x164xf32>
    %cst_32 = arith.constant dense<0.000000e+00> : vector<8x164xf32>
    %53 = tpu.matmul %51, %52, %cst_32 {dimension_numbers = #tpu.dot_dimension_numbers<[1], [0], [0], [1], [0, 0, 1, 1], [], []>} : vector<8x8xf32>, vector<8x164xf32>, vector<8x164xf32> -> vector<8x164xf32>
    %c0_33 = arith.constant 0 : index
    %c1_34 = arith.constant 1 : index
    %c0_35 = arith.constant 0 : index
    %c0_36 = arith.constant 0 : index
    %54 = vector.load %arg7[%c0_33, %c1_34, %c0_35, %c0_36] : memref<4x3x8x8xf32, #tpu.memory_space<vmem>>, vector<1x1x8x8xf32>
    %55 = vector.shape_cast %54 : vector<1x1x8x8xf32> to vector<8x8xf32>
    %56 = vector.extract_strided_slice %49 {offsets = [0, 1], sizes = [8, 164], strides = [1, 1]} : vector<8x166xf32> to vector<8x164xf32>
    %cst_37 = arith.constant dense<0.000000e+00> : vector<8x164xf32>
    %57 = tpu.matmul %55, %56, %cst_37 {dimension_numbers = #tpu.dot_dimension_numbers<[1], [0], [0], [1], [0, 0, 1, 1], [], []>} : vector<8x8xf32>, vector<8x164xf32>, vector<8x164xf32> -> vector<8x164xf32>
    %58 = arith.addf %53, %57 : vector<8x164xf32>
    %c0_38 = arith.constant 0 : index
    %c2_39 = arith.constant 2 : index
    %c0_40 = arith.constant 0 : index
    %c0_41 = arith.constant 0 : index
    %59 = vector.load %arg7[%c0_38, %c2_39, %c0_40, %c0_41] : memref<4x3x8x8xf32, #tpu.memory_space<vmem>>, vector<1x1x8x8xf32>
    %60 = vector.shape_cast %59 : vector<1x1x8x8xf32> to vector<8x8xf32>
    %61 = vector.extract_strided_slice %49 {offsets = [0, 2], sizes = [8, 164], strides = [1, 1]} : vector<8x166xf32> to vector<8x164xf32>
    %cst_42 = arith.constant dense<0.000000e+00> : vector<8x164xf32>
    %62 = tpu.matmul %60, %61, %cst_42 {dimension_numbers = #tpu.dot_dimension_numbers<[1], [0], [0], [1], [0, 0, 1, 1], [], []>} : vector<8x8xf32>, vector<8x164xf32>, vector<8x164xf32> -> vector<8x164xf32>
    %63 = arith.addf %58, %62 : vector<8x164xf32>
    %c0_43 = arith.constant 0 : index
    %c0_44 = arith.constant 0 : index
    %c0_45 = arith.constant 0 : index
    %64 = vector.load %arg8[%c0_43, %c0_44, %c0_45] : memref<4x8x1xf32, #tpu.memory_space<vmem>>, vector<1x8x1xf32>
    %65 = vector.shape_cast %64 : vector<1x8x1xf32> to vector<8x1xf32>
    %66 = vector.broadcast %65 : vector<8x1xf32> to vector<8x164xf32>
    %67 = arith.addf %63, %66 : vector<8x164xf32>
    %68 = vector.extract_strided_slice %18 {offsets = [0, 110], sizes = [1, 164], strides = [1, 1]} : vector<1x384xf32> to vector<1x164xf32>
    %69 = vector.broadcast %68 : vector<1x164xf32> to vector<8x164xf32>
    %70 = arith.mulf %67, %69 : vector<8x164xf32>
    %cst_46 = arith.constant 0.000000e+00 : f32
    %71 = vector.broadcast %cst_46 : f32 to vector<8x164xf32>
    %72 = arith.cmpf oge, %70, %71 : vector<8x164xf32>
    %cst_47 = arith.constant 1.000000e-01 : f32
    %73 = vector.broadcast %cst_47 : f32 to vector<8x164xf32>
    %74 = arith.mulf %73, %70 : vector<8x164xf32>
    %75 = arith.select %72, %70, %74 : vector<8x164xi1>, vector<8x164xf32>
    %c1_48 = arith.constant 1 : index
    %c0_49 = arith.constant 0 : index
    %c0_50 = arith.constant 0 : index
    %c0_51 = arith.constant 0 : index
    %76 = vector.load %arg5[%c1_48, %c0_49, %c0_50, %c0_51] : memref<4x3x8x8xf32, #tpu.memory_space<vmem>>, vector<1x1x8x8xf32>
    %77 = vector.shape_cast %76 : vector<1x1x8x8xf32> to vector<8x8xf32>
    %78 = vector.extract_strided_slice %75 {offsets = [0, 0], sizes = [8, 158], strides = [1, 1]} : vector<8x164xf32> to vector<8x158xf32>
    %cst_52 = arith.constant dense<0.000000e+00> : vector<8x158xf32>
    %79 = tpu.matmul %77, %78, %cst_52 {dimension_numbers = #tpu.dot_dimension_numbers<[1], [0], [0], [1], [0, 0, 1, 1], [], []>} : vector<8x8xf32>, vector<8x158xf32>, vector<8x158xf32> -> vector<8x158xf32>
    %c1_53 = arith.constant 1 : index
    %c1_54 = arith.constant 1 : index
    %c0_55 = arith.constant 0 : index
    %c0_56 = arith.constant 0 : index
    %80 = vector.load %arg5[%c1_53, %c1_54, %c0_55, %c0_56] : memref<4x3x8x8xf32, #tpu.memory_space<vmem>>, vector<1x1x8x8xf32>
    %81 = vector.shape_cast %80 : vector<1x1x8x8xf32> to vector<8x8xf32>
    %82 = vector.extract_strided_slice %75 {offsets = [0, 3], sizes = [8, 158], strides = [1, 1]} : vector<8x164xf32> to vector<8x158xf32>
    %cst_57 = arith.constant dense<0.000000e+00> : vector<8x158xf32>
    %83 = tpu.matmul %81, %82, %cst_57 {dimension_numbers = #tpu.dot_dimension_numbers<[1], [0], [0], [1], [0, 0, 1, 1], [], []>} : vector<8x8xf32>, vector<8x158xf32>, vector<8x158xf32> -> vector<8x158xf32>
    %84 = arith.addf %79, %83 : vector<8x158xf32>
    %c1_58 = arith.constant 1 : index
    %c2_59 = arith.constant 2 : index
    %c0_60 = arith.constant 0 : index
    %c0_61 = arith.constant 0 : index
    %85 = vector.load %arg5[%c1_58, %c2_59, %c0_60, %c0_61] : memref<4x3x8x8xf32, #tpu.memory_space<vmem>>, vector<1x1x8x8xf32>
    %86 = vector.shape_cast %85 : vector<1x1x8x8xf32> to vector<8x8xf32>
    %87 = vector.extract_strided_slice %75 {offsets = [0, 6], sizes = [8, 158], strides = [1, 1]} : vector<8x164xf32> to vector<8x158xf32>
    %cst_62 = arith.constant dense<0.000000e+00> : vector<8x158xf32>
    %88 = tpu.matmul %86, %87, %cst_62 {dimension_numbers = #tpu.dot_dimension_numbers<[1], [0], [0], [1], [0, 0, 1, 1], [], []>} : vector<8x8xf32>, vector<8x158xf32>, vector<8x158xf32> -> vector<8x158xf32>
    %89 = arith.addf %84, %88 : vector<8x158xf32>
    %c1_63 = arith.constant 1 : index
    %c0_64 = arith.constant 0 : index
    %c0_65 = arith.constant 0 : index
    %90 = vector.load %arg6[%c1_63, %c0_64, %c0_65] : memref<4x8x1xf32, #tpu.memory_space<vmem>>, vector<1x8x1xf32>
    %91 = vector.shape_cast %90 : vector<1x8x1xf32> to vector<8x1xf32>
    %92 = vector.broadcast %91 : vector<8x1xf32> to vector<8x158xf32>
    %93 = arith.addf %89, %92 : vector<8x158xf32>
    %94 = vector.extract_strided_slice %18 {offsets = [0, 113], sizes = [1, 158], strides = [1, 1]} : vector<1x384xf32> to vector<1x158xf32>
    %95 = vector.broadcast %94 : vector<1x158xf32> to vector<8x158xf32>
    %96 = arith.mulf %93, %95 : vector<8x158xf32>
    %cst_66 = arith.constant 0.000000e+00 : f32
    %97 = vector.broadcast %cst_66 : f32 to vector<8x158xf32>
    %98 = arith.cmpf oge, %96, %97 : vector<8x158xf32>
    %cst_67 = arith.constant 1.000000e-01 : f32
    %99 = vector.broadcast %cst_67 : f32 to vector<8x158xf32>
    %100 = arith.mulf %99, %96 : vector<8x158xf32>
    %101 = arith.select %98, %96, %100 : vector<8x158xi1>, vector<8x158xf32>
    %c1_68 = arith.constant 1 : index
    %c0_69 = arith.constant 0 : index
    %c0_70 = arith.constant 0 : index
    %c0_71 = arith.constant 0 : index
    %102 = vector.load %arg7[%c1_68, %c0_69, %c0_70, %c0_71] : memref<4x3x8x8xf32, #tpu.memory_space<vmem>>, vector<1x1x8x8xf32>
    %103 = vector.shape_cast %102 : vector<1x1x8x8xf32> to vector<8x8xf32>
    %104 = vector.extract_strided_slice %101 {offsets = [0, 0], sizes = [8, 156], strides = [1, 1]} : vector<8x158xf32> to vector<8x156xf32>
    %cst_72 = arith.constant dense<0.000000e+00> : vector<8x156xf32>
    %105 = tpu.matmul %103, %104, %cst_72 {dimension_numbers = #tpu.dot_dimension_numbers<[1], [0], [0], [1], [0, 0, 1, 1], [], []>} : vector<8x8xf32>, vector<8x156xf32>, vector<8x156xf32> -> vector<8x156xf32>
    %c1_73 = arith.constant 1 : index
    %c1_74 = arith.constant 1 : index
    %c0_75 = arith.constant 0 : index
    %c0_76 = arith.constant 0 : index
    %106 = vector.load %arg7[%c1_73, %c1_74, %c0_75, %c0_76] : memref<4x3x8x8xf32, #tpu.memory_space<vmem>>, vector<1x1x8x8xf32>
    %107 = vector.shape_cast %106 : vector<1x1x8x8xf32> to vector<8x8xf32>
    %108 = vector.extract_strided_slice %101 {offsets = [0, 1], sizes = [8, 156], strides = [1, 1]} : vector<8x158xf32> to vector<8x156xf32>
    %cst_77 = arith.constant dense<0.000000e+00> : vector<8x156xf32>
    %109 = tpu.matmul %107, %108, %cst_77 {dimension_numbers = #tpu.dot_dimension_numbers<[1], [0], [0], [1], [0, 0, 1, 1], [], []>} : vector<8x8xf32>, vector<8x156xf32>, vector<8x156xf32> -> vector<8x156xf32>
    %110 = arith.addf %105, %109 : vector<8x156xf32>
    %c1_78 = arith.constant 1 : index
    %c2_79 = arith.constant 2 : index
    %c0_80 = arith.constant 0 : index
    %c0_81 = arith.constant 0 : index
    %111 = vector.load %arg7[%c1_78, %c2_79, %c0_80, %c0_81] : memref<4x3x8x8xf32, #tpu.memory_space<vmem>>, vector<1x1x8x8xf32>
    %112 = vector.shape_cast %111 : vector<1x1x8x8xf32> to vector<8x8xf32>
    %113 = vector.extract_strided_slice %101 {offsets = [0, 2], sizes = [8, 156], strides = [1, 1]} : vector<8x158xf32> to vector<8x156xf32>
    %cst_82 = arith.constant dense<0.000000e+00> : vector<8x156xf32>
    %114 = tpu.matmul %112, %113, %cst_82 {dimension_numbers = #tpu.dot_dimension_numbers<[1], [0], [0], [1], [0, 0, 1, 1], [], []>} : vector<8x8xf32>, vector<8x156xf32>, vector<8x156xf32> -> vector<8x156xf32>
    %115 = arith.addf %110, %114 : vector<8x156xf32>
    %c1_83 = arith.constant 1 : index
    %c0_84 = arith.constant 0 : index
    %c0_85 = arith.constant 0 : index
    %116 = vector.load %arg8[%c1_83, %c0_84, %c0_85] : memref<4x8x1xf32, #tpu.memory_space<vmem>>, vector<1x8x1xf32>
    %117 = vector.shape_cast %116 : vector<1x8x1xf32> to vector<8x1xf32>
    %118 = vector.broadcast %117 : vector<8x1xf32> to vector<8x156xf32>
    %119 = arith.addf %115, %118 : vector<8x156xf32>
    %120 = vector.extract_strided_slice %18 {offsets = [0, 114], sizes = [1, 156], strides = [1, 1]} : vector<1x384xf32> to vector<1x156xf32>
    %121 = vector.broadcast %120 : vector<1x156xf32> to vector<8x156xf32>
    %122 = arith.mulf %119, %121 : vector<8x156xf32>
    %cst_86 = arith.constant 0.000000e+00 : f32
    %123 = vector.broadcast %cst_86 : f32 to vector<8x156xf32>
    %124 = arith.cmpf oge, %122, %123 : vector<8x156xf32>
    %cst_87 = arith.constant 1.000000e-01 : f32
    %125 = vector.broadcast %cst_87 : f32 to vector<8x156xf32>
    %126 = arith.mulf %125, %122 : vector<8x156xf32>
    %127 = arith.select %124, %122, %126 : vector<8x156xi1>, vector<8x156xf32>
    %c2_88 = arith.constant 2 : index
    %c0_89 = arith.constant 0 : index
    %c0_90 = arith.constant 0 : index
    %c0_91 = arith.constant 0 : index
    %128 = vector.load %arg5[%c2_88, %c0_89, %c0_90, %c0_91] : memref<4x3x8x8xf32, #tpu.memory_space<vmem>>, vector<1x1x8x8xf32>
    %129 = vector.shape_cast %128 : vector<1x1x8x8xf32> to vector<8x8xf32>
    %130 = vector.extract_strided_slice %127 {offsets = [0, 0], sizes = [8, 146], strides = [1, 1]} : vector<8x156xf32> to vector<8x146xf32>
    %cst_92 = arith.constant dense<0.000000e+00> : vector<8x146xf32>
    %131 = tpu.matmul %129, %130, %cst_92 {dimension_numbers = #tpu.dot_dimension_numbers<[1], [0], [0], [1], [0, 0, 1, 1], [], []>} : vector<8x8xf32>, vector<8x146xf32>, vector<8x146xf32> -> vector<8x146xf32>
    %c2_93 = arith.constant 2 : index
    %c1_94 = arith.constant 1 : index
    %c0_95 = arith.constant 0 : index
    %c0_96 = arith.constant 0 : index
    %132 = vector.load %arg5[%c2_93, %c1_94, %c0_95, %c0_96] : memref<4x3x8x8xf32, #tpu.memory_space<vmem>>, vector<1x1x8x8xf32>
    %133 = vector.shape_cast %132 : vector<1x1x8x8xf32> to vector<8x8xf32>
    %134 = vector.extract_strided_slice %127 {offsets = [0, 5], sizes = [8, 146], strides = [1, 1]} : vector<8x156xf32> to vector<8x146xf32>
    %cst_97 = arith.constant dense<0.000000e+00> : vector<8x146xf32>
    %135 = tpu.matmul %133, %134, %cst_97 {dimension_numbers = #tpu.dot_dimension_numbers<[1], [0], [0], [1], [0, 0, 1, 1], [], []>} : vector<8x8xf32>, vector<8x146xf32>, vector<8x146xf32> -> vector<8x146xf32>
    %136 = arith.addf %131, %135 : vector<8x146xf32>
    %c2_98 = arith.constant 2 : index
    %c2_99 = arith.constant 2 : index
    %c0_100 = arith.constant 0 : index
    %c0_101 = arith.constant 0 : index
    %137 = vector.load %arg5[%c2_98, %c2_99, %c0_100, %c0_101] : memref<4x3x8x8xf32, #tpu.memory_space<vmem>>, vector<1x1x8x8xf32>
    %138 = vector.shape_cast %137 : vector<1x1x8x8xf32> to vector<8x8xf32>
    %139 = vector.extract_strided_slice %127 {offsets = [0, 10], sizes = [8, 146], strides = [1, 1]} : vector<8x156xf32> to vector<8x146xf32>
    %cst_102 = arith.constant dense<0.000000e+00> : vector<8x146xf32>
    %140 = tpu.matmul %138, %139, %cst_102 {dimension_numbers = #tpu.dot_dimension_numbers<[1], [0], [0], [1], [0, 0, 1, 1], [], []>} : vector<8x8xf32>, vector<8x146xf32>, vector<8x146xf32> -> vector<8x146xf32>
    %141 = arith.addf %136, %140 : vector<8x146xf32>
    %c2_103 = arith.constant 2 : index
    %c0_104 = arith.constant 0 : index
    %c0_105 = arith.constant 0 : index
    %142 = vector.load %arg6[%c2_103, %c0_104, %c0_105] : memref<4x8x1xf32, #tpu.memory_space<vmem>>, vector<1x8x1xf32>
    %143 = vector.shape_cast %142 : vector<1x8x1xf32> to vector<8x1xf32>
    %144 = vector.broadcast %143 : vector<8x1xf32> to vector<8x146xf32>
    %145 = arith.addf %141, %144 : vector<8x146xf32>
    %146 = vector.extract_strided_slice %18 {offsets = [0, 119], sizes = [1, 146], strides = [1, 1]} : vector<1x384xf32> to vector<1x146xf32>
    %147 = vector.broadcast %146 : vector<1x146xf32> to vector<8x146xf32>
    %148 = arith.mulf %145, %147 : vector<8x146xf32>
    %cst_106 = arith.constant 0.000000e+00 : f32
    %149 = vector.broadcast %cst_106 : f32 to vector<8x146xf32>
    %150 = arith.cmpf oge, %148, %149 : vector<8x146xf32>
    %cst_107 = arith.constant 1.000000e-01 : f32
    %151 = vector.broadcast %cst_107 : f32 to vector<8x146xf32>
    %152 = arith.mulf %151, %148 : vector<8x146xf32>
    %153 = arith.select %150, %148, %152 : vector<8x146xi1>, vector<8x146xf32>
    %c2_108 = arith.constant 2 : index
    %c0_109 = arith.constant 0 : index
    %c0_110 = arith.constant 0 : index
    %c0_111 = arith.constant 0 : index
    %154 = vector.load %arg7[%c2_108, %c0_109, %c0_110, %c0_111] : memref<4x3x8x8xf32, #tpu.memory_space<vmem>>, vector<1x1x8x8xf32>
    %155 = vector.shape_cast %154 : vector<1x1x8x8xf32> to vector<8x8xf32>
    %156 = vector.extract_strided_slice %153 {offsets = [0, 0], sizes = [8, 144], strides = [1, 1]} : vector<8x146xf32> to vector<8x144xf32>
    %cst_112 = arith.constant dense<0.000000e+00> : vector<8x144xf32>
    %157 = tpu.matmul %155, %156, %cst_112 {dimension_numbers = #tpu.dot_dimension_numbers<[1], [0], [0], [1], [0, 0, 1, 1], [], []>} : vector<8x8xf32>, vector<8x144xf32>, vector<8x144xf32> -> vector<8x144xf32>
    %c2_113 = arith.constant 2 : index
    %c1_114 = arith.constant 1 : index
    %c0_115 = arith.constant 0 : index
    %c0_116 = arith.constant 0 : index
    %158 = vector.load %arg7[%c2_113, %c1_114, %c0_115, %c0_116] : memref<4x3x8x8xf32, #tpu.memory_space<vmem>>, vector<1x1x8x8xf32>
    %159 = vector.shape_cast %158 : vector<1x1x8x8xf32> to vector<8x8xf32>
    %160 = vector.extract_strided_slice %153 {offsets = [0, 1], sizes = [8, 144], strides = [1, 1]} : vector<8x146xf32> to vector<8x144xf32>
    %cst_117 = arith.constant dense<0.000000e+00> : vector<8x144xf32>
    %161 = tpu.matmul %159, %160, %cst_117 {dimension_numbers = #tpu.dot_dimension_numbers<[1], [0], [0], [1], [0, 0, 1, 1], [], []>} : vector<8x8xf32>, vector<8x144xf32>, vector<8x144xf32> -> vector<8x144xf32>
    %162 = arith.addf %157, %161 : vector<8x144xf32>
    %c2_118 = arith.constant 2 : index
    %c2_119 = arith.constant 2 : index
    %c0_120 = arith.constant 0 : index
    %c0_121 = arith.constant 0 : index
    %163 = vector.load %arg7[%c2_118, %c2_119, %c0_120, %c0_121] : memref<4x3x8x8xf32, #tpu.memory_space<vmem>>, vector<1x1x8x8xf32>
    %164 = vector.shape_cast %163 : vector<1x1x8x8xf32> to vector<8x8xf32>
    %165 = vector.extract_strided_slice %153 {offsets = [0, 2], sizes = [8, 144], strides = [1, 1]} : vector<8x146xf32> to vector<8x144xf32>
    %cst_122 = arith.constant dense<0.000000e+00> : vector<8x144xf32>
    %166 = tpu.matmul %164, %165, %cst_122 {dimension_numbers = #tpu.dot_dimension_numbers<[1], [0], [0], [1], [0, 0, 1, 1], [], []>} : vector<8x8xf32>, vector<8x144xf32>, vector<8x144xf32> -> vector<8x144xf32>
    %167 = arith.addf %162, %166 : vector<8x144xf32>
    %c2_123 = arith.constant 2 : index
    %c0_124 = arith.constant 0 : index
    %c0_125 = arith.constant 0 : index
    %168 = vector.load %arg8[%c2_123, %c0_124, %c0_125] : memref<4x8x1xf32, #tpu.memory_space<vmem>>, vector<1x8x1xf32>
    %169 = vector.shape_cast %168 : vector<1x8x1xf32> to vector<8x1xf32>
    %170 = vector.broadcast %169 : vector<8x1xf32> to vector<8x144xf32>
    %171 = arith.addf %167, %170 : vector<8x144xf32>
    %172 = vector.extract_strided_slice %18 {offsets = [0, 120], sizes = [1, 144], strides = [1, 1]} : vector<1x384xf32> to vector<1x144xf32>
    %173 = vector.broadcast %172 : vector<1x144xf32> to vector<8x144xf32>
    %174 = arith.mulf %171, %173 : vector<8x144xf32>
    %cst_126 = arith.constant 0.000000e+00 : f32
    %175 = vector.broadcast %cst_126 : f32 to vector<8x144xf32>
    %176 = arith.cmpf oge, %174, %175 : vector<8x144xf32>
    %cst_127 = arith.constant 1.000000e-01 : f32
    %177 = vector.broadcast %cst_127 : f32 to vector<8x144xf32>
    %178 = arith.mulf %177, %174 : vector<8x144xf32>
    %179 = arith.select %176, %174, %178 : vector<8x144xi1>, vector<8x144xf32>
    %c3 = arith.constant 3 : index
    %c0_128 = arith.constant 0 : index
    %c0_129 = arith.constant 0 : index
    %c0_130 = arith.constant 0 : index
    %180 = vector.load %arg5[%c3, %c0_128, %c0_129, %c0_130] : memref<4x3x8x8xf32, #tpu.memory_space<vmem>>, vector<1x1x8x8xf32>
    %181 = vector.shape_cast %180 : vector<1x1x8x8xf32> to vector<8x8xf32>
    %182 = vector.extract_strided_slice %179 {offsets = [0, 0], sizes = [8, 130], strides = [1, 1]} : vector<8x144xf32> to vector<8x130xf32>
    %cst_131 = arith.constant dense<0.000000e+00> : vector<8x130xf32>
    %183 = tpu.matmul %181, %182, %cst_131 {dimension_numbers = #tpu.dot_dimension_numbers<[1], [0], [0], [1], [0, 0, 1, 1], [], []>} : vector<8x8xf32>, vector<8x130xf32>, vector<8x130xf32> -> vector<8x130xf32>
    %c3_132 = arith.constant 3 : index
    %c1_133 = arith.constant 1 : index
    %c0_134 = arith.constant 0 : index
    %c0_135 = arith.constant 0 : index
    %184 = vector.load %arg5[%c3_132, %c1_133, %c0_134, %c0_135] : memref<4x3x8x8xf32, #tpu.memory_space<vmem>>, vector<1x1x8x8xf32>
    %185 = vector.shape_cast %184 : vector<1x1x8x8xf32> to vector<8x8xf32>
    %186 = vector.extract_strided_slice %179 {offsets = [0, 7], sizes = [8, 130], strides = [1, 1]} : vector<8x144xf32> to vector<8x130xf32>
    %cst_136 = arith.constant dense<0.000000e+00> : vector<8x130xf32>
    %187 = tpu.matmul %185, %186, %cst_136 {dimension_numbers = #tpu.dot_dimension_numbers<[1], [0], [0], [1], [0, 0, 1, 1], [], []>} : vector<8x8xf32>, vector<8x130xf32>, vector<8x130xf32> -> vector<8x130xf32>
    %188 = arith.addf %183, %187 : vector<8x130xf32>
    %c3_137 = arith.constant 3 : index
    %c2_138 = arith.constant 2 : index
    %c0_139 = arith.constant 0 : index
    %c0_140 = arith.constant 0 : index
    %189 = vector.load %arg5[%c3_137, %c2_138, %c0_139, %c0_140] : memref<4x3x8x8xf32, #tpu.memory_space<vmem>>, vector<1x1x8x8xf32>
    %190 = vector.shape_cast %189 : vector<1x1x8x8xf32> to vector<8x8xf32>
    %191 = vector.extract_strided_slice %179 {offsets = [0, 14], sizes = [8, 130], strides = [1, 1]} : vector<8x144xf32> to vector<8x130xf32>
    %cst_141 = arith.constant dense<0.000000e+00> : vector<8x130xf32>
    %192 = tpu.matmul %190, %191, %cst_141 {dimension_numbers = #tpu.dot_dimension_numbers<[1], [0], [0], [1], [0, 0, 1, 1], [], []>} : vector<8x8xf32>, vector<8x130xf32>, vector<8x130xf32> -> vector<8x130xf32>
    %193 = arith.addf %188, %192 : vector<8x130xf32>
    %c3_142 = arith.constant 3 : index
    %c0_143 = arith.constant 0 : index
    %c0_144 = arith.constant 0 : index
    %194 = vector.load %arg6[%c3_142, %c0_143, %c0_144] : memref<4x8x1xf32, #tpu.memory_space<vmem>>, vector<1x8x1xf32>
    %195 = vector.shape_cast %194 : vector<1x8x1xf32> to vector<8x1xf32>
    %196 = vector.broadcast %195 : vector<8x1xf32> to vector<8x130xf32>
    %197 = arith.addf %193, %196 : vector<8x130xf32>
    %198 = vector.extract_strided_slice %18 {offsets = [0, 127], sizes = [1, 130], strides = [1, 1]} : vector<1x384xf32> to vector<1x130xf32>
    %199 = vector.broadcast %198 : vector<1x130xf32> to vector<8x130xf32>
    %200 = arith.mulf %197, %199 : vector<8x130xf32>
    %cst_145 = arith.constant 0.000000e+00 : f32
    %201 = vector.broadcast %cst_145 : f32 to vector<8x130xf32>
    %202 = arith.cmpf oge, %200, %201 : vector<8x130xf32>
    %cst_146 = arith.constant 1.000000e-01 : f32
    %203 = vector.broadcast %cst_146 : f32 to vector<8x130xf32>
    %204 = arith.mulf %203, %200 : vector<8x130xf32>
    %205 = arith.select %202, %200, %204 : vector<8x130xi1>, vector<8x130xf32>
    %c3_147 = arith.constant 3 : index
    %c0_148 = arith.constant 0 : index
    %c0_149 = arith.constant 0 : index
    %c0_150 = arith.constant 0 : index
    %206 = vector.load %arg7[%c3_147, %c0_148, %c0_149, %c0_150] : memref<4x3x8x8xf32, #tpu.memory_space<vmem>>, vector<1x1x8x8xf32>
    %207 = vector.shape_cast %206 : vector<1x1x8x8xf32> to vector<8x8xf32>
    %208 = vector.extract_strided_slice %205 {offsets = [0, 0], sizes = [8, 128], strides = [1, 1]} : vector<8x130xf32> to vector<8x128xf32>
    %cst_151 = arith.constant dense<0.000000e+00> : vector<8x128xf32>
    %209 = tpu.matmul %207, %208, %cst_151 {dimension_numbers = #tpu.dot_dimension_numbers<[1], [0], [0], [1], [0, 0, 1, 1], [], []>} : vector<8x8xf32>, vector<8x128xf32>, vector<8x128xf32> -> vector<8x128xf32>
    %c3_152 = arith.constant 3 : index
    %c1_153 = arith.constant 1 : index
    %c0_154 = arith.constant 0 : index
    %c0_155 = arith.constant 0 : index
    %210 = vector.load %arg7[%c3_152, %c1_153, %c0_154, %c0_155] : memref<4x3x8x8xf32, #tpu.memory_space<vmem>>, vector<1x1x8x8xf32>
    %211 = vector.shape_cast %210 : vector<1x1x8x8xf32> to vector<8x8xf32>
    %212 = vector.extract_strided_slice %205 {offsets = [0, 1], sizes = [8, 128], strides = [1, 1]} : vector<8x130xf32> to vector<8x128xf32>
    %cst_156 = arith.constant dense<0.000000e+00> : vector<8x128xf32>
    %213 = tpu.matmul %211, %212, %cst_156 {dimension_numbers = #tpu.dot_dimension_numbers<[1], [0], [0], [1], [0, 0, 1, 1], [], []>} : vector<8x8xf32>, vector<8x128xf32>, vector<8x128xf32> -> vector<8x128xf32>
    %214 = arith.addf %209, %213 : vector<8x128xf32>
    %c3_157 = arith.constant 3 : index
    %c2_158 = arith.constant 2 : index
    %c0_159 = arith.constant 0 : index
    %c0_160 = arith.constant 0 : index
    %215 = vector.load %arg7[%c3_157, %c2_158, %c0_159, %c0_160] : memref<4x3x8x8xf32, #tpu.memory_space<vmem>>, vector<1x1x8x8xf32>
    %216 = vector.shape_cast %215 : vector<1x1x8x8xf32> to vector<8x8xf32>
    %217 = vector.extract_strided_slice %205 {offsets = [0, 2], sizes = [8, 128], strides = [1, 1]} : vector<8x130xf32> to vector<8x128xf32>
    %cst_161 = arith.constant dense<0.000000e+00> : vector<8x128xf32>
    %218 = tpu.matmul %216, %217, %cst_161 {dimension_numbers = #tpu.dot_dimension_numbers<[1], [0], [0], [1], [0, 0, 1, 1], [], []>} : vector<8x8xf32>, vector<8x128xf32>, vector<8x128xf32> -> vector<8x128xf32>
    %219 = arith.addf %214, %218 : vector<8x128xf32>
    %c3_162 = arith.constant 3 : index
    %c0_163 = arith.constant 0 : index
    %c0_164 = arith.constant 0 : index
    %220 = vector.load %arg8[%c3_162, %c0_163, %c0_164] : memref<4x8x1xf32, #tpu.memory_space<vmem>>, vector<1x8x1xf32>
    %221 = vector.shape_cast %220 : vector<1x8x1xf32> to vector<8x1xf32>
    %222 = vector.broadcast %221 : vector<8x1xf32> to vector<8x128xf32>
    %223 = arith.addf %219, %222 : vector<8x128xf32>
    %224 = vector.extract_strided_slice %18 {offsets = [0, 128], sizes = [1, 128], strides = [1, 1]} : vector<1x384xf32> to vector<1x128xf32>
    %225 = vector.broadcast %224 : vector<1x128xf32> to vector<8x128xf32>
    %226 = arith.mulf %223, %225 : vector<8x128xf32>
    %c0_165 = arith.constant 0 : index
    %c0_166 = arith.constant 0 : index
    %c0_167 = arith.constant 0 : index
    %227 = vector.load %arg3[%c0_165, %c0_166, %c0_167] : memref<1x8x128xf32, #tpu.memory_space<vmem>>, vector<1x8x128xf32>
    %228 = vector.shape_cast %227 : vector<1x8x128xf32> to vector<8x128xf32>
    %229 = arith.addf %226, %228 : vector<8x128xf32>
    %c0_168 = arith.constant 0 : index
    %c0_169 = arith.constant 0 : index
    %c0_170 = arith.constant 0 : index
    %230 = vector.load %arg9[%c0_168, %c0_169, %c0_170] : memref<1x8x128xf32, #tpu.memory_space<vmem>>, vector<1x8x128xf32>
    %231 = vector.shape_cast %230 : vector<1x8x128xf32> to vector<8x128xf32>
    %232 = vector.shape_cast %229 : vector<8x128xf32> to vector<1x8x128xf32>
    tpu.vector_store %arg9[%c0_168, %c0_169, %c0_170], %232 {strides = array<i32>} : memref<1x8x128xf32, #tpu.memory_space<vmem>>, vector<1x8x128xf32>,
    return
  }
  func.func @transform_0(%arg0: i32, %arg1: i32) -> (i32, i32, i32) {
    %c1_i32 = arith.constant 1 : i32
    %0 = arith.addi %arg1, %c1_i32 : i32
    %c1_i32_0 = arith.constant 1 : i32
    %1 = arith.muli %0, %c1_i32_0 : i32
    %c1_i32_1 = arith.constant 1 : i32
    %2 = arith.subi %1, %c1_i32_1 : i32
    %c0_i32 = arith.constant 0 : i32
    %c0_i32_2 = arith.constant 0 : i32
    return %arg0, %c0_i32, %2 : i32, i32, i32
  }
  func.func @transform_1(%arg0: i32, %arg1: i32) -> (i32, i32, i32) {
    %c1_i32 = arith.constant 1 : i32
    %0 = arith.addi %arg1, %c1_i32 : i32
    %c0_i32 = arith.constant 0 : i32
    %c0_i32_0 = arith.constant 0 : i32
    return %arg0, %c0_i32, %0 : i32, i32, i32
  }
  func.func @transform_2(%arg0: i32, %arg1: i32) -> (i32, i32, i32) {
    %c2_i32 = arith.constant 2 : i32
    %0 = arith.addi %arg1, %c2_i32 : i32
    %c1_i32 = arith.constant 1 : i32
    %1 = arith.muli %0, %c1_i32 : i32
    %c0_i32 = arith.constant 0 : i32
    %c0_i32_0 = arith.constant 0 : i32
    return %arg0, %c0_i32, %1 : i32, i32, i32
  }
  func.func @transform_3(%arg0: i32, %arg1: i32) -> (i32, i32, i32, i32) {
    %c0_i32 = arith.constant 0 : i32
    %c0_i32_0 = arith.constant 0 : i32
    %c0_i32_1 = arith.constant 0 : i32
    %c0_i32_2 = arith.constant 0 : i32
    %c0_i32_3 = arith.constant 0 : i32
    return %c0_i32, %c0_i32_0, %c0_i32_1, %c0_i32_2 : i32, i32, i32, i32
  }
  func.func @transform_4(%arg0: i32, %arg1: i32) -> (i32, i32, i32) {
    %c0_i32 = arith.constant 0 : i32
    %c0_i32_0 = arith.constant 0 : i32
    %c0_i32_1 = arith.constant 0 : i32
    %c0_i32_2 = arith.constant 0 : i32
    return %c0_i32, %c0_i32_0, %c0_i32_1 : i32, i32, i32
  }
  func.func @transform_5(%arg0: i32, %arg1: i32) -> (i32, i32, i32, i32) {
    %c0_i32 = arith.constant 0 : i32
    %c0_i32_0 = arith.constant 0 : i32
    %c0_i32_1 = arith.constant 0 : i32
    %c0_i32_2 = arith.constant 0 : i32
    %c0_i32_3 = arith.constant 0 : i32
    return %c0_i32, %c0_i32_0, %c0_i32_1, %c0_i32_2 : i32, i32, i32, i32
  }
  func.func @transform_6(%arg0: i32, %arg1: i32) -> (i32, i32, i32) {
    %c0_i32 = arith.constant 0 : i32
    %c0_i32_0 = arith.constant 0 : i32
    %c0_i32_1 = arith.constant 0 : i32
    %c0_i32_2 = arith.constant 0 : i32
    return %c0_i32, %c0_i32_0, %c0_i32_1 : i32, i32, i32
  }
  func.func @transform_7(%arg0: i32, %arg1: i32) -> (i32, i32, i32) {
    %c0_i32 = arith.constant 0 : i32
    %c0_i32_0 = arith.constant 0 : i32
    return %arg0, %c0_i32, %arg1 : i32, i32, i32
  }
}

</mosaic_0001>

<bundles_post_ra>
// kernel: tpu_custom_call.1
= control target key start
LH: loop header
LB: loop body
LE: loop exit
PB: predicated region body
PF: predicated region fallthrough
CT: control target
= control target key end

     0   :  { %s3785_s0 = inlined_call_operand.vmem [shape: f32[2,8,384], index: 0, kind: input, shape index: {}]   ;;  %s3786_s1 = inlined_call_operand.hbm [shape: f32[2,8,384], index: 1, kind: input, shape index: {}]   ;;  %s3787_s2 = inlined_call_operand.hbm [shape: f32[2,8,384], index: 2, kind: input, shape index: {}]   ;;  %s3788_s3 = inlined_call_operand.hbm [shape: f32[4,3,8,8], index: 3, kind: input, shape index: {}]   ;;  %s3789_s4 = inlined_call_operand.vmem [shape: f32[4,8,1], index: 4, kind: input, shape index: {}]   ;;  %s3790_s5 = inlined_call_operand.hbm [shape: f32[4,3,8,8], index: 5, kind: input, shape index: {}]   ;;  %s3791_s6 = inlined_call_operand.vmem [shape: f32[4,8,1], index: 6, kind: input, shape index: {}]   ;;  %s3792_s7 = inlined_call_operand.hbm [shape: f32[2,8,128], index: 7, kind: output, shape index: {}]  }
   0x1   :  { %3800 = sst [smem:[#allocation18_spill]] %s3786_s1 }
   0x2   :  { %3801 = sst [smem:[#allocation19_spill]] %s3788_s3 }
   0x3   :  { %3802 = sst [smem:[#allocation20_spill]] %s3790_s5 }
   0x4   :  { %12 = vsyncpa [#allocation3], 0 }
   0x5   :  { %14 = vsyncpa [#allocation3 + $0x1], 0 }
   0x6   :  { %15 = vsyncpa [#allocation6], 0 }
   0x7   :  { %17 = vsyncpa [#allocation6 + $0x1], 0 }
   0x8   :  { %18 = vsyncpa [#allocation9], 0 }
   0x9   :  { %19 = vsyncpa [#allocation4], 0 }
   0xa   :  { %21 = vsyncpa [#allocation4 + $0x1], 0  ;;  %s3340_s24 = smov 0   ;;  %s3342_s25 = smov 0  }
   0xb   :  { %s3344_s26 = smov 0   ;;  %s3346_s27 = smov 0  }
   0xc   :  { %s3348_s28 = smov 0   ;;  %s3350_s29 = smov 0  }
   0xd LB: > { %s3371_s30 = sadd.s32 4294967295, %s3272_s29   ;;  %s2813_s8 = sadd.s32 4294967294, %s3272_s29   ;;  %s3272_s29 = sphi %s3350_s29, %s27_s29   ;;  %s3268_s28 = sphi %s3348_s28, %s3832_s28   ;;  %s3264_s27 = sphi %s3346_s27, %s3831_s27   ;;  %s3260_s26 = sphi %s3344_s26, %s3830_s26   ;;  %s3256_s25 = sphi %s3342_s25, %s3829_s25   ;;  %s3252_s24 = sphi %s3340_s24, %s3828_s24  }
   0xe   : > { %p91_p0 = scmp.ne.s32.totalorder %s3256_s25, %s3252_s24  ;;  %p3793_p1 = scmp.eq.s32.totalorder %s3371_s30, 0 }
   0xf   : > { %p237_p3 = scmp.eq.s32.totalorder %s2813_s8, 1  ;;  %p2814_p5 = scmp.ge.s32.totalorder %s3272_s29, 1 }
  0x10   : > { %p3380_p4 = por %p3793_p1, %p91_p0  ;;  %p244_p7 = scmp.lt.s32.totalorder %s3272_s29, 3 }
  0x11   : > { %p3385_p6 = por %p237_p3, %p91_p0  ;;  %s3274_s12 = smov [#allocation7]  }
  0x12   : > { %s3803_s9 = scalar_select %p3380_p4, 1, 0 }
  0x13   : > { %s3804_s10 = scalar_select %p3385_p6, 1, 0 }
  0x14   : > { %p3390_p8 = pnand %p2814_p5, %p244_p7  ;;  %s256_s13 = sshll.u32 %s3274_s12, 4  ;;  %s3394_s13 = int_to_ptr.vmem [resolvable:$true] %s256_s13 }
  0x15   : > { %3805 = sst [smem:[#allocation16_spill]] %s3804_s10  ;;  %s3275_s15 = smov [#allocation8]  }
  0x16   : > { %s3806_s11 = scalar_select %p3390_p8, 1, 0 }
  0x17   : > { %p2928_p9 = pneg %p3390_p8  ;;  %s272_s16 = sshll.u32 %s3275_s15, 4  ;;  %s3405_s16 = int_to_ptr.vmem [resolvable:$true] %s272_s16 }
  0x18   : > { %s3808_s3 = sld [smem:[#allocation19_spill]] }
  0x19   : > { %p3401_p11 = pnand %p2928_p9, %p3793_p1 }
  0x1b   : > { %p3062_p13 = pneg %p3401_p11 }
  0x1e   : > { %s3060_s19 = scalar_lea.hbm %s3808_s3, 1536 }
  0x1f   : > { %p3061_p12 = scmp.ne.s32.totalorder %s3808_s3, %s3060_s19  ;;  %p3067_p5 = scmp.lt.u32.totalorder %s3060_s19, %s3808_s3 }
  0x21   : > { %p3063_p0 = pnand %p3062_p13, %p3061_p12 }
  0x23   : > { %p3064_p3 = pneg %p3063_p0 }
  0x25   : > { %p3069_p7 = pnand %p3067_p5, %p3064_p3 }
  0x27   : > { %3072 = shalt.err (!%p3069_p7)
}
  0x28   : > { %s3073_s8 = scalar_lea.vmem %s3394_s13, 1536  ;;  %p3081_p2 = scmp.lt.s32.totalorder %s3394_s13, %s3394_s13 }
  0x29   : > { %p3074_p9 = scmp.ne.s32.totalorder %s3394_s13, %s3073_s8  ;;  %p3082_p12 = scmp.lt.s32.totalorder %s3073_s8, %s3073_s8 }
  0x2b   : > { %p3076_p10 = pnand %p3074_p9, %p3062_p13  ;;  %p3083_p0 = por %p3082_p12, %p3081_p2 }
  0x2d   : > { %p3077_p1 = pneg %p3076_p10 }
  0x2f   : > { %p3084_p6 = pnand %p3083_p0, %p3077_p1 }
  0x31   : > { %3087 = shalt.err (!%p3084_p6)
}
  0x32   : > { %s3276_s12 = smov 128   ;;  %s3277_s15 = smov 8  }
  0x33   : > { %2931 = dma.hbm_to_vmem [thread:$0]  (!%p3401_p11), %s3808_s3, 1536, %s3394_s13, [#allocation6], %s3276_s12, %s3276_s12, %s3277_s15  }
  0x34   : > { %s3809_s5 = sld [smem:[#allocation20_spill]] }
  0x3a   : > { %s3088_s21 = scalar_lea.hbm %s3809_s5, 1536 }
  0x3b   : > { %p3089_p2 = scmp.ne.s32.totalorder %s3809_s5, %s3088_s21  ;;  %p3095_p10 = scmp.lt.u32.totalorder %s3088_s21, %s3809_s5 }
  0x3d   : > { %p3091_p1 = pnand %p3089_p2, %p3062_p13 }
  0x3f   : > { %p3092_p6 = pneg %p3091_p1 }
  0x41   : > { %p3097_p3 = pnand %p3095_p10, %p3092_p6 }
  0x43   : > { %3100 = shalt.err (!%p3097_p3)
}
  0x44   : > { %s3101_s13 = scalar_lea.vmem %s3405_s16, 1536  ;;  %p3109_p12 = scmp.lt.s32.totalorder %s3405_s16, %s3405_s16 }
  0x45   : > { %p3102_p5 = scmp.ne.s32.totalorder %s3405_s16, %s3101_s13  ;;  %p3110_p0 = scmp.lt.s32.totalorder %s3101_s13, %s3101_s13 }
  0x47   : > { %p3104_p7 = pnand %p3102_p5, %p3062_p13  ;;  %p3111_p2 = por %p3110_p0, %p3109_p12 }
  0x49   : > { %p3105_p9 = pneg %p3104_p7 }
  0x4b   : > { %p3112_p1 = pnand %p3111_p2, %p3105_p9 }
  0x4d   : > { %3115 = shalt.err (!%p3112_p1)
}
  0x4e   : > { %2934 = dma.hbm_to_vmem [thread:$0]  (!%p3401_p11), %s3809_s5, 1536, %s3405_s16, [#allocation9], %s3276_s12, %s3276_s12, %s3277_s15  }
  0x4f   : > { %s39_s18 = sadd.s32 1, %s3268_s28  ;;  %s78_s19 = sadd.s32 1, %s3260_s26 }
  0x50   : > { %p41_p13 = scmp.ge.s32.totalorder %s39_s18, 2  ;;  %p85_p6 = scmp.ne.s32.totalorder %s3260_s26, %s3256_s25 }
  0x51   : > { %p86_p10 = scmp.eq.s32.totalorder %s3272_s29, 0  ;;  %p2948_p3 = scmp.lt.s32.totalorder %s3272_s29, 2 }
  0x52   : > { %s3834_s18 = smov (%p41_p13, %s39_s18), 0  ;;  %p3812_p7 = scmp.eq.s32.totalorder %s3371_s30, 1 }
  0x53   : > { %3810 = sst [smem:[#allocation17_spill]] %s3834_s18  ;;  %p3467_p5 = por %p86_p10, %p85_p6 }
  0x54   : > { %p3473_p9 = por %p3812_p7, %p85_p6  ;;  %s73_s12 = ssub.s32 %s3268_s28, %s3834_s18 }
  0x55   : > { %s300_s15 = sand.u32 1, %s3260_s26   ;;  %p76_p11 = scmp.eq.s32.totalorder %s73_s12, 0 }
  0x56   : > { %s3813_s16 = scalar_select %p3473_p9, 1, 0 }
  0x57   : > { %s3480_s20 = sshll.u32 %s300_s15, 3  ;;  %s3795_s21 = smul.u32 384, %s3268_s28 }
  0x58   : > { %s3484_s22 = scalar_select %p76_p11, %s3260_s26, %s78_s19  }
  0x59   : > { %s3814_s1 = sld [smem:[#allocation18_spill]]  ;;  %s304_s17 = scalar_lea.vmem [#allocation2], %s3480_s20 }
  0x5a   : > { %s314_s3 = sshll.u32 %s304_s17, 4  ;;  %p3500_p12 = pnand %p2948_p3, %p3467_p5  ;;  %s3494_s3 = int_to_ptr.vmem [resolvable:$true] %s314_s3 }
  0x5b   : > { %s321_s19 = sand.u32 1, %s3272_s29   ;;  %s301_s23 = scalar_lea.sflag [#allocation3], %s300_s15 }
  0x5c   : > { %p3118_p2 = pneg %p3500_p12 }
  0x5f   : > { %s2705_s13 = scalar_lea.hbm %s3814_s1, %s3795_s21  ;;  %s3121_s14 = scalar_lea.hbm %s3814_s1, 768 }
  0x60   : > { %s3491_s10 = scalar_lea.hbm %s2705_s13, 128  ;;  %s3146_s8 = scalar_lea.hbm %s2705_s13, 256 }
  0x61   : > { %p3117_p0 = scmp.ne.s32.totalorder %s3491_s10, %s3146_s8  ;;  %p3122_p6 = scmp.lt.u32.totalorder %s3491_s10, %s3814_s1 }
  0x62   : > { %p3123_p10 = scmp.lt.u32.totalorder %s3121_s14, %s3146_s8  ;;  %p3125_p5 = scmp.lt.u32.totalorder %s3146_s8, %s3491_s10 }
  0x63   : > { %p3119_p1 = pnand %p3118_p2, %p3117_p0 }
  0x64   : > { %p3124_p3 = por %p3123_p10, %p3122_p6 }
  0x65   : > { %p3120_p13 = pneg %p3119_p1 }
  0x66   : > { %p3126_p7 = por %p3125_p5, %p3124_p3 }
  0x68   : > { %p3127_p11 = pnand %p3126_p7, %p3120_p13 }
  0x6a   : > { %3130 = shalt.err (!%p3127_p11)
}
  0x6b   : > { %s3131_s15 = scalar_lea.vmem %s3494_s3, 128  ;;  %s3278_s21 = smov [#allocation2]  }
  0x6c   : > { %p3132_p0 = scmp.ne.s32.totalorder %s3494_s3, %s3131_s15  ;;  %s3136_s13 = sshll.u32 %s3278_s21, 4  ;;  %s3137_s13 = int_to_ptr.vmem [resolvable:$false] %s3136_s13 }
  0x6d   : > { %s3138_s5 = scalar_lea.vmem %s3137_s13, 256  ;;  %p3139_p4 = scmp.lt.s32.totalorder %s3494_s3, %s3137_s13 }
  0x6e   : > { %p3134_p1 = pnand %p3132_p0, %p3118_p2  ;;  %p3140_p6 = scmp.lt.s32.totalorder %s3138_s5, %s3131_s15 }
  0x70   : > { %p3135_p9 = pneg %p3134_p1  ;;  %p3141_p10 = por %p3140_p6, %p3139_p4 }
  0x72   : > { %p3142_p3 = pnand %p3141_p10, %p3135_p9 }
  0x74   : > { %3145 = shalt.err (!%p3142_p3)
}
  0x75   : > { %2938 = dma.hbm_to_vmem [thread:$0]  (!%p3500_p12), %s3491_s10, 128, %s3494_s3, %s301_s23  }
  0x76   : > { %s3816_s18 = smul.u32 384, %s3268_s28  ;;  %s325_s21 = scalar_lea.vmem [#allocation5], %s3480_s20 }
  0x77   : > { %s335_s13 = sshll.u32 %s325_s21, 4  ;;  %s322_s5 = scalar_lea.sflag [#allocation6], %s321_s19  ;;  %s336_s13 = int_to_ptr.vmem [resolvable:$true] %s335_s13 }
  0x78   : > { %s2713_s14 = scalar_lea.hbm %s3787_s2, %s3816_s18  ;;  %s3152_s23 = scalar_lea.hbm %s3787_s2, 768 }
  0x79   : > { %s3535_s15 = scalar_lea.hbm %s2713_s14, 256  ;;  %s3177_s1 = scalar_lea.hbm %s2713_s14, 384 }
  0x7a   : > { %p3148_p4 = scmp.ne.s32.totalorder %s3535_s15, %s3177_s1  ;;  %p3153_p5 = scmp.lt.u32.totalorder %s3535_s15, %s3787_s2 }
  0x7b   : > { %p3154_p7 = scmp.lt.u32.totalorder %s3152_s23, %s3177_s1  ;;  %p3156_p0 = scmp.lt.u32.totalorder %s3177_s1, %s3535_s15 }
  0x7c   : > { %p3150_p9 = pnand %p3148_p4, %p3118_p2 }
  0x7d   : > { %p3155_p11 = por %p3154_p7, %p3153_p5 }
  0x7e   : > { %p3151_p13 = pneg %p3150_p9 }
  0x7f   : > { %p3157_p1 = por %p3156_p0, %p3155_p11 }
  0x81   : > { %p3158_p6 = pnand %p3157_p1, %p3151_p13 }
  0x83   : > { %3161 = shalt.err (!%p3158_p6)
}
  0x84   : > { %s3162_s19 = scalar_lea.vmem %s336_s13, 128  ;;  %s3279_s8 = smov [#allocation5]  }
  0x85   : > { %p3163_p10 = scmp.ne.s32.totalorder %s336_s13, %s3162_s19  ;;  %s3167_s17 = sshll.u32 %s3279_s8, 4  ;;  %s3168_s17 = int_to_ptr.vmem [resolvable:$false] %s3167_s17 }
  0x86   : > { %s3169_s14 = scalar_lea.vmem %s3168_s17, 256  ;;  %p3170_p9 = scmp.lt.s32.totalorder %s336_s13, %s3168_s17 }
  0x87   : > { %p3165_p3 = pnand %p3163_p10, %p3118_p2  ;;  %p3171_p8 = scmp.lt.s32.totalorder %s3169_s14, %s3162_s19 }
  0x89   : > { %p3166_p4 = pneg %p3165_p3  ;;  %p3172_p5 = por %p3171_p8, %p3170_p9 }
  0x8b   : > { %p3173_p7 = pnand %p3172_p5, %p3166_p4 }
  0x8d   : > { %3176 = shalt.err (!%p3173_p7)
}
  0x8e   : > { %2941 = dma.hbm_to_vmem [thread:$0]  (!%p3500_p12), %s3535_s15, 128, %s336_s13, %s322_s5  }
  0x8f   : > { %p3817_p13 = scmp.ne.s32.totalorder %s3806_s11, 0 }
  0x90   : > { %s3560_s1 = sand.u32 (!%p3817_p13), 1, %s3256_s25   ;;  %p3818_p8 = scmp.ne.s32.totalorder (!%p3817_p13), %s3803_s9, 0 }
  0x91   : > { %344 = sbr.rel (%p3817_p13) target bundleno = 3004 (0xbbc), region = 48  ;;  %s3563_s21 = sshll.u32 (!%p3817_p13), %s3560_s1, 3 }
  0x92   : > { %s347_s3 = scalar_lea.sflag (!%p3817_p13), [#allocation3], %s3560_s1  ;;  %s350_s10 = scalar_lea.vmem (!%p3817_p13), [#allocation2], %s3563_s21 }
  0x98   : > { %3231 = dma.done.wait (%p3818_p8), %s347_s3, 128  }
  0x99   : > { %3233 = vsyncadd (%p3818_p8), %s347_s3, 4294967168  ;;  %s355_s11 = sand.u32 1, %s3371_s30   ;;  %s359_s13 = scalar_lea.vmem [#allocation5], %s3563_s21 }
  0x9a   : > { %s356_s12 = scalar_lea.sflag [#allocation6], %s355_s11 }
  0x9b   : > { %3235 = dma.done.wait (%p3818_p8), %s356_s12, 128  }
  0x9c   : > { %3237 = vsyncadd (%p3818_p8), %s356_s12, 4294967168  ;;  %p3819_p12 = scmp.eq.s32.totalorder %s3371_s30, 0 }
  0x9e   : > { %3239 = dma.done.wait (%p3819_p12), [#allocation6], 1536   ;;  %p3820_p2 = pmov %p3819_p12 }
  0xa0   : > { %3241 = vsyncadd (%p3820_p2), [#allocation6], 4294965760  ;;  %p3821_p11 = pmov %p3820_p2 }
  0xa1   : > { %p3822_p0 = pmov %p3820_p2 }
  0xa2   : > { %3243 = dma.done.wait (%p3821_p11), [#allocation9], 1536  }
  0xa3   : > { %3245 = vsyncadd (%p3822_p0), [#allocation9], 4294965760  ;;  %p411_p1 = scmp.lt.s32.totalorder %s3264_s27, 1  ;;  %v3280_v0 = vmov 0.0   ;;  %v3592_v1 = vld [vmem:[%s350_s10] sm:$0xff]  ;;  %v423_v3 = vld [vmem:[%s359_s13] sm:$0xff]  ;;  %v426_v10 = vlaneseq }
  0xa4   : > { %543 = vmatprep.mubr.f32.mxu0 %v3280_v0  ;;  %833 = vmatprep.mubr.f32.mxu1 %v3280_v0  ;;  %vm450_vm0 = vcmp.ge.f32.partialorder %v3592_v1, 0.0  ;;  %v453_v4 = vmul.f32 0.1, %v3592_v1  ;;  %vm451_vm2 = vcmp.ge.f32.partialorder %v423_v3, 0.0  ;;  %v454_v6 = vmul.f32 0.1, %v423_v3 }
  0xa5   : > { %s412_s15 = scalar_select %p411_p1, %s3264_s27, 1  ;;  %v3283_v11 = vmov 0   ;;  %v427_v12 = vand.u32 127, %v426_v10  ;;  %v724_v13 = vld [vmem:[%s3789_s4] sm:$0xff]  ;;  %vm470_vm4 = vcmask 154624   ;;  %v460_v22 = vld [vmem:[#allocation7 + $0x8] sm:$0xff] }
  0xa6   : > { %v456_v7 = vsel %vm450_vm0, %v3592_v1, %v453_v4  ;;  %s3281_s30 = smov 19   ;;  %v457_v9 = vsel %vm451_vm2, %v423_v3, %v454_v6  ;;  %s3282_s18 = smov 20   ;;  %3023 = vset.pattern.permute.xlu1 %v3283_v11  ;;  %3029 = vset.pattern.permute.xlu0 %v3283_v11  ;;  %vm475_vm5 = vcmask 64512   ;;  %vm556_vm6 = vcmask 162816   ;;  %v458_v31 = vld [vmem:[#allocation7] sm:$0xff]  ;;  %v636_v34 = vld [vmem:[#allocation7 + $0x10] sm:$0xff] }
  0xa7   : > { %s2913_s5 = smul.u32 24, %s412_s15  ;;  %466 = vrot.lane.b32.xlu0 %v456_v7, %s3281_s30  ;;  %s3284_s19 = smov 18   ;;  %v428_v14 = vadd.s32 128, %v427_v12  ;;  %vm643_vm7 = vcmask 146432   ;;  %v1000_v52 = vld [vmem:[%s3791_s6] sm:$0xff]  ;;  %vm762_vm10 = vcmask 1039360  }
  0xa8   : > { %s3285_s14 = smov 127   ;;  %s3286_s3 = smov 126   ;;  %v755_v55 = vld [vmem:[#allocation8 + $0x8] sm:$0xff]  ;;  %vm920_vm11 = vcmask 1031168   ;;  %v753_v59 = vld [vmem:[#allocation8] sm:$0xff]  ;;  %v915_v61 = vld [vmem:[#allocation8 + $0x10] sm:$0xff] }
  0xa9   : > { %s418_s20 = scalar_lea.vmem %s3785_s0, %s2913_s5  ;;  %v432_v15 = vadd.s32 4294967168, %v428_v14  ;;  %s3287_s12 = smov 125   ;;  %vm1036_vm14 = vcmask 1022976   ;;  %vm1194_vm15 = vcmask 998400   ;;  %vm1289_vm0 = vcmask 121856  }
  0xaa   : > { %v421_v2 = vld [vmem:[%s418_s20] sm:$0xff]  ;;  %s3288_s13 = smov 122   ;;  %s3289_s9 = smov 15  }
  0xab   : > { %vm449_vm1 = vcmp.ge.f32.partialorder %v421_v2, 0.0  ;;  %v452_v5 = vmul.f32 0.1, %v421_v2  ;;  %468 = vrot.lane.b32.xlu0 %v457_v9, %s3281_s30  ;;  %vm438_vm3 = vcmp.lt.s32.totalorder %v432_v15, 16  ;;  %s3293_s10 = smov 9   ;;  %s3295_s15 = smov 121  }
  0xac   : > { %v3604_v16 = vsel %vm438_vm3, 1.0, %v3280_v0  ;;  %vm1563_vm3 = vcmask 113664   ;;  %s3296_s5 = smov 114   ;;  %s3297_s20 = smov 1  }
  0xad   : > { %v455_v8 = vsel %vm449_vm1, %v421_v2, %v452_v5  ;;  %s2653_s11 = scalar_lea.sflag [#allocation4], %s3560_s1  ;;  %p3823_p10 = scmp.ne.s32.totalorder %s3813_s16, 0 }
  0xae   : > { %464 = vrot.lane.b32.xlu1 %v455_v8, %s3281_s30 }
  0xaf   : > { %554 = vrot.lane.b32.xlu0 %v457_v9, %s3282_s18 }
  0xb2   : > { %552 = vrot.lane.b32.xlu1 %v456_v7, %s3282_s18 }
  0xb3   : > { %639 = vrot.lane.b32.xlu0 %v456_v7, %s3284_s19 }
  0xb6   : > { %550 = vrot.lane.b32.xlu1 %v455_v8, %s3282_s18  ;;  %s3291_s18 = smov 123  }
  0xb7   : > { %637 = vrot.lane.b32.xlu0 %v455_v8, %s3284_s19 }
  0xba   : > { %641 = vrot.lane.b32.xlu1 %v457_v9, %s3284_s19 }
  0xbb   : > { %3025 = vrot.lane.b32.xlu0 %v3604_v16, %s3281_s30 }
  0xbe   : > { %727 = vperm.xlu1 %3023, %v724_v13  }
  0xc2   : > { %739 = vrot.lane.b32.xlu1 %v3280_v0, %s3281_s30  ;;  %s3290_s30 = smov 14  }
 0x119   : > { %v467_v17 = vpop.permute.xlu0 %466 }
 0x11d   : > { %v469_v19 = vpop.permute.xlu0 %468 }
 0x11e   : > { %v472_v21 = vsel %vm470_vm4, %v467_v17, %v469_v19 }
 0x11f   : > { %479 = vmatprep.subr.mxu0 %v472_v21  ;;  %v1029_v21 = vld [vmem:[#allocation7 + $0x20] sm:$0xff] }
 0x120   : > { %v465_v18 = vpop.permute.xlu1 %464 }
 0x121   : > { %v471_v23 = vsel %vm470_vm4, %v465_v18, %v467_v17  ;;  %v555_v24 = vpop.permute.xlu0 %554  ;;  %v2839_v18 = vld [vmem:[%s3789_s4 + $0x8] sm:$0xff] }
 0x122   : > { %480 = vmatpush1.msra.mxu0 %v471_v23 }
 0x123   : > { %2830 = vmatmul.mubr.msk.f32.vlgmr.msra.gmra.mrb[0].mxu0 %vm475_vm5, %v460_v22 }
 0x124   : > { %v553_v20 = vpop.permute.xlu1 %552  ;;  %628 = vmatprep.mubr.f32.mxu0 %v3280_v0 }
 0x125   : > { %v558_v27 = vsel %vm556_vm6, %v553_v20, %v555_v24  ;;  %v640_v28 = vpop.permute.xlu0 %639 }
 0x126   : > { %564 = vmatprep.subr.mxu0 %v558_v27  ;;  %v1189_v27 = vld [vmem:[#allocation7 + $0x28] sm:$0xff] }
 0x128   : > { %v551_v25 = vpop.permute.xlu1 %550 }
 0x129   : > { %v557_v26 = vsel %vm556_vm6, %v551_v25, %v553_v20  ;;  %v638_v32 = vpop.permute.xlu0 %637  ;;  %v1027_v25 = vld [vmem:[#allocation7 + $0x18] sm:$0xff] }
 0x12a   : > { %565 = vmatpush1.msra.mxu0 %v557_v26  ;;  %v644_v33 = vsel %vm643_vm7, %v638_v32, %v640_v28 }
 0x12b   : > { %2831 = vmatmul.mubr.msk.f32.vlgmr.msra.gmra.mrb[0].mxu0 %vm475_vm5, %v458_v31 }
 0x12c   : > { %v642_v29 = vpop.permute.xlu1 %641  ;;  %715 = vmatprep.mubr.f32.mxu0 %v3280_v0 }
 0x12d   : > { %v645_v30 = vsel %vm643_vm7, %v640_v28, %v642_v29  ;;  %v3026_v36 = vpop.permute.xlu0 %3025 }
 0x12e   : > { %651 = vmatprep.subr.mxu0 %v645_v30  ;;  %v3028_v37 = vunpack.i.h.bf16 %v3026_v36  ;;  %v3027_v38 = vunpack.i.l.bf16 %v3026_v36 }
 0x12f   : > { %652 = vmatpush1.msra.mxu0 %v644_v33 }
 0x130   : > { %v741_v41 = vsel %vm470_vm4, %v3027_v38, %v3028_v37 }
 0x133   : > { %2832 = vmatmul.mubr.msk.f32.vlgmr.msra.gmra.mrb[0].mxu0 %vm475_vm5, %v636_v34 }
 0x134   : > { %1107 = vmatprep.mubr.f32.mxu0 %v3280_v0 }
 0x13d   : > { %v728_v35 = vpop.permute.xlu1 %727 }
 0x141   : > { %v740_v39 = vpop.permute.xlu1 %739 }
 0x142   : > { %v742_v44 = vsel %vm470_vm4, %v3028_v37, %v740_v39 }
 0x206   : > { %v717_v40 = vpop.f32.mrb[0].mxu0 }
 0x207   : > { %v730_v42 = vadd.f32 %v728_v35, %v717_v40  ;;  %v719_v43 = vpop.f32.mrb[1].mxu0 }
 0x208   : > { %v731_v45 = vadd.f32 %v728_v35, %v719_v43 }
 0x209   : > { %v745_v46 = vmul.f32 %v741_v41, %v730_v42 }
 0x20a   : > { %v746_v47 = vmul.f32 %v742_v44, %v731_v45  ;;  %v2843_v45 = vld [vmem:[%s3791_s6 + $0x8] sm:$0xff] }
 0x20b   : > { %vm747_vm8 = vcmp.ge.f32.partialorder %v745_v46, 0.0  ;;  %v749_v48 = vmul.f32 0.1, %v745_v46 }
 0x20c   : > { %vm748_vm9 = vcmp.ge.f32.partialorder %v746_v47, 0.0  ;;  %v750_v49 = vmul.f32 0.1, %v746_v47 }
 0x20d   : > { %v751_v50 = vsel %vm747_vm8, %v745_v46, %v749_v48  ;;  %v1305_v48 = vld [vmem:[#allocation8 + $0x20] sm:$0xff]  ;;  %vm1744_vm8 = vcmask 965632  }
 0x20e   : > { %758 = vrot.lane.b32.xlu0 %v751_v50, %s3285_s14  ;;  %v752_v51 = vsel %vm748_vm9, %v746_v47, %v750_v49  ;;  %vm1839_vm9 = vcmask 72704  }
 0x20f   : > { %760 = vrot.lane.b32.xlu1 %v752_v51, %s3285_s14 }
 0x212   : > { %916 = vrot.lane.b32.xlu0 %v751_v50, %s3286_s3 }
 0x213   : > { %918 = vrot.lane.b32.xlu1 %v752_v51, %s3286_s3 }
 0x216   : > { %1003 = vperm.xlu0 %3029, %v1000_v52   ;;  %v1303_v52 = vld [vmem:[#allocation8 + $0x18] sm:$0xff] }
 0x217   : > { %3031 = vrot.lane.b32.xlu1 %v3604_v16, %s3284_s19 }
 0x21b   : > { %1012 = vrot.lane.b32.xlu1 %v3280_v0, %s3284_s19  ;;  %s3292_s19 = smov 118  }
 0x280   : > { %v759_v53 = vpop.permute.xlu0 %758 }
 0x281   : > { %v761_v54 = vpop.permute.xlu1 %760 }
 0x282   : > { %769 = vmatprep.subr.mxu1 %v761_v54  ;;  %v763_v56 = vsel %vm762_vm10, %v759_v53, %v761_v54  ;;  %v1464_v54 = vld [vmem:[#allocation8 + $0x28] sm:$0xff] }
 0x283   : > { %770 = vmatpush1.msra.mxu1 %v763_v56 }
 0x284   : > { %2833 = vmatmul.mubr.msk.f32.vlgmr.msra.gmra.mrb[0].mxu1 %vm475_vm5, %v755_v55  ;;  %843 = vmatprep.subr.mxu1 %v752_v51  ;;  %v917_v58 = vpop.permute.xlu0 %916 }
 0x285   : > { %844 = vmatpush1.msra.mxu1 %v751_v50  ;;  %v919_v57 = vpop.permute.xlu1 %918  ;;  %907 = vmatprep.mubr.f32.mxu1 %v3280_v0 }
 0x286   : > { %927 = vmatprep.subr.mxu1 %v919_v57  ;;  %v921_v60 = vsel %vm920_vm11, %v917_v58, %v919_v57 }
 0x289   : > { %v3032_v62 = vpop.permute.xlu1 %3031 }
 0x28a   : > { %v3034_v63 = vunpack.i.h.bf16 %v3032_v62  ;;  %v3033_v2 = vunpack.i.l.bf16 %v3032_v62 }
 0x28c   : > { %2834 = vmatmul.mubr.msk.f32.vlgmr.msra.gmra.mrb[0].mxu1 %vm475_vm5, %v753_v59  ;;  %v1014_v5 = vsel %vm643_vm7, %v3033_v2, %v3034_v63 }
 0x28d   : > { %928 = vmatpush1.msra.mxu1 %v921_v60  ;;  %991 = vmatprep.mubr.f32.mxu1 %v3280_v0  ;;  %v1013_v6 = vpop.permute.xlu1 %1012 }
 0x28e   : > { %v1015_v11 = vsel %vm643_vm7, %v3034_v63, %v1013_v6  ;;  %vm1586_vm7 = vcmask 1006592  }
 0x294   : > { %2835 = vmatmul.mubr.msk.f32.vlgmr.msra.gmra.mrb[0].mxu1 %vm475_vm5, %v915_v61 }
 0x295   : > { %1382 = vmatprep.mubr.f32.mxu1 %v3280_v0  ;;  %v1004_v3 = vpop.permute.xlu0 %1003 }
 0x367   : > { %v993_v4 = vpop.f32.mrb[0].mxu1 }
 0x368   : > { %v1006_v7 = vadd.f32 %v1004_v3, %v993_v4  ;;  %v995_v8 = vpop.f32.mrb[1].mxu1 }
 0x369   : > { %v1007_v9 = vadd.f32 %v1004_v3, %v995_v8 }
 0x36a   : > { %v1018_v10 = vmul.f32 %v1014_v5, %v1006_v7 }
 0x36b   : > { %v1019_v12 = vmul.f32 %v1015_v11, %v1007_v9 }
 0x36c   : > { %vm1020_vm12 = vcmp.ge.f32.partialorder %v1018_v10, 0.0  ;;  %v1022_v13 = vmul.f32 0.1, %v1018_v10 }
 0x36d   : > { %vm1021_vm13 = vcmp.ge.f32.partialorder %v1019_v12, 0.0  ;;  %v1023_v14 = vmul.f32 0.1, %v1019_v12 }
 0x36e   : > { %v1024_v15 = vsel %vm1020_vm12, %v1018_v10, %v1022_v13  ;;  %v2847_v10 = vld [vmem:[%s3789_s4 + $0x10] sm:$0xff]  ;;  %v1579_v13 = vld [vmem:[#allocation7 + $0x38] sm:$0xff] }
 0x36f   : > { %1032 = vrot.lane.b32.xlu0 %v1024_v15, %s3287_s12  ;;  %v1025_v17 = vsel %vm1021_vm13, %v1019_v12, %v1023_v14 }
 0x370   : > { %1034 = vrot.lane.b32.xlu1 %v1025_v17, %s3287_s12 }
 0x373   : > { %1190 = vrot.lane.b32.xlu0 %v1024_v15, %s3288_s13 }
 0x374   : > { %1192 = vrot.lane.b32.xlu1 %v1025_v17, %s3288_s13  ;;  %s3294_s13 = smov 8  }
 0x377   : > { %1278 = vperm.xlu0 %3029, %v2839_v18   ;;  %v1577_v18 = vld [vmem:[#allocation7 + $0x30] sm:$0xff] }
 0x378   : > { %3036 = vrot.lane.b32.xlu1 %v3604_v16, %s3289_s9 }
 0x37b   : > { %1287 = vrot.lane.b32.xlu0 %v3280_v0, %s3289_s9 }
 0x3e1   : > { %v1033_v19 = vpop.permute.xlu0 %1032 }
 0x3e2   : > { %v1035_v20 = vpop.permute.xlu1 %1034 }
 0x3e3   : > { %v1037_v22 = vsel %vm1036_vm14, %v1033_v19, %v1035_v20  ;;  %1043 = vmatprep.subr.mxu0 %v1035_v20  ;;  %v1739_v20 = vld [vmem:[#allocation7 + $0x40] sm:$0xff] }
 0x3e4   : > { %1044 = vmatpush1.msra.mxu0 %v1037_v22 }
 0x3e5   : > { %2836 = vmatmul.mubr.msk.f32.vlgmr.msra.gmra.mrb[2].mxu0 %vm475_vm5, %v1029_v21  ;;  %1117 = vmatprep.subr.mxu0 %v1025_v17  ;;  %v1191_v24 = vpop.permute.xlu0 %1190 }
 0x3e6   : > { %v1193_v23 = vpop.permute.xlu1 %1192  ;;  %1118 = vmatpush1.msra.mxu0 %v1024_v15  ;;  %1181 = vmatprep.mubr.f32.mxu0 %v3280_v0 }
 0x3e7   : > { %1201 = vmatprep.subr.mxu0 %v1193_v23  ;;  %v1195_v26 = vsel %vm1194_vm15, %v1191_v24, %v1193_v23 }
 0x3ea   : > { %v3037_v28 = vpop.permute.xlu1 %3036 }
 0x3eb   : > { %v3039_v30 = vunpack.i.h.bf16 %v3037_v28  ;;  %v3038_v31 = vunpack.i.l.bf16 %v3037_v28 }
 0x3ed   : > { %2837 = vmatmul.mubr.msk.f32.vlgmr.msra.gmra.mrb[2].mxu0 %vm475_vm5, %v1027_v25  ;;  %v1290_v34 = vsel %vm1289_vm0, %v3038_v31, %v3039_v30 }
 0x3ee   : > { %1202 = vmatpush1.msra.mxu0 %v1195_v26  ;;  %1265 = vmatprep.mubr.f32.mxu0 %v3280_v0 }
 0x3f5   : > { %2838 = vmatmul.mubr.msk.f32.vlgmr.msra.gmra.mrb[2].mxu0 %vm475_vm5, %v1189_v27 }
 0x3f6   : > { %1657 = vmatprep.mubr.f32.mxu0 %v3280_v0  ;;  %v1279_v29 = vpop.permute.xlu0 %1278 }
 0x3fa   : > { %v1288_v32 = vpop.permute.xlu0 %1287 }
 0x3fb   : > { %v1291_v37 = vsel %vm1289_vm0, %v3039_v30, %v1288_v32  ;;  %vm2135_vm0 = vcmask 990208  }
 0x4c8   : > { %v1267_v33 = vpop.f32.mrb[2].mxu0 }
 0x4c9   : > { %v1281_v35 = vadd.f32 %v1279_v29, %v1267_v33  ;;  %v1269_v36 = vpop.f32.mrb[3].mxu0 }
 0x4ca   : > { %v1282_v38 = vadd.f32 %v1279_v29, %v1269_v36 }
 0x4cb   : > { %v1294_v39 = vmul.f32 %v1290_v34, %v1281_v35 }
 0x4cc   : > { %v1295_v40 = vmul.f32 %v1291_v37, %v1282_v38  ;;  %v2851_v38 = vld [vmem:[%s3791_s6 + $0x10] sm:$0xff] }
 0x4cd   : > { %vm1296_vm1 = vcmp.ge.f32.partialorder %v1294_v39, 0.0  ;;  %v1298_v41 = vmul.f32 0.1, %v1294_v39 }
 0x4ce   : > { %vm1297_vm2 = vcmp.ge.f32.partialorder %v1295_v40, 0.0  ;;  %v1299_v42 = vmul.f32 0.1, %v1295_v40 }
 0x4cf   : > { %v1300_v43 = vsel %vm1296_vm1, %v1294_v39, %v1298_v41  ;;  %v1855_v41 = vld [vmem:[#allocation8 + $0x38] sm:$0xff]  ;;  %vm2293_vm1 = vcmask 932864  }
 0x4d0   : > { %1308 = vrot.lane.b32.xlu1 %v1300_v43, %s3285_s14  ;;  %v1301_v44 = vsel %vm1297_vm2, %v1295_v40, %v1299_v42  ;;  %vm2388_vm2 = vcmask 7168  }
 0x4d1   : > { %1310 = vrot.lane.b32.xlu0 %v1301_v44, %s3285_s14 }
 0x4d4   : > { %1465 = vrot.lane.b32.xlu1 %v1300_v43, %s3286_s3 }
 0x4d5   : > { %1467 = vrot.lane.b32.xlu0 %v1301_v44, %s3286_s3 }
 0x4d8   : > { %1552 = vperm.xlu1 %3023, %v2843_v45   ;;  %v1853_v45 = vld [vmem:[#allocation8 + $0x30] sm:$0xff] }
 0x4d9   : > { %3041 = vrot.lane.b32.xlu0 %v3604_v16, %s3290_s30 }
 0x4dc   : > { %1561 = vrot.lane.b32.xlu1 %v3280_v0, %s3290_s30 }
 0x542   : > { %v1309_v46 = vpop.permute.xlu1 %1308 }
 0x543   : > { %v1311_v47 = vpop.permute.xlu0 %1310 }
 0x544   : > { %v1312_v49 = vsel %vm762_vm10, %v1309_v46, %v1311_v47  ;;  %1318 = vmatprep.subr.mxu1 %v1311_v47  ;;  %v2014_v47 = vld [vmem:[#allocation8 + $0x40] sm:$0xff] }
 0x545   : > { %1319 = vmatpush1.msra.mxu1 %v1312_v49 }
 0x546   : > { %2840 = vmatmul.mubr.msk.f32.vlgmr.msra.gmra.mrb[2].mxu1 %vm475_vm5, %v1305_v48  ;;  %1392 = vmatprep.subr.mxu1 %v1301_v44  ;;  %v1466_v51 = vpop.permute.xlu1 %1465 }
 0x547   : > { %1393 = vmatpush1.msra.mxu1 %v1300_v43  ;;  %v1468_v50 = vpop.permute.xlu0 %1467  ;;  %1456 = vmatprep.mubr.f32.mxu1 %v3280_v0 }
 0x548   : > { %1475 = vmatprep.subr.mxu1 %v1468_v50  ;;  %v1469_v53 = vsel %vm920_vm11, %v1466_v51, %v1468_v50 }
 0x54b   : > { %v3042_v55 = vpop.permute.xlu0 %3041 }
 0x54c   : > { %v3044_v57 = vunpack.i.h.bf16 %v3042_v55  ;;  %v3043_v58 = vunpack.i.l.bf16 %v3042_v55 }
 0x54e   : > { %2841 = vmatmul.mubr.msk.f32.vlgmr.msra.gmra.mrb[2].mxu1 %vm475_vm5, %v1303_v52  ;;  %v1564_v61 = vsel %vm1563_vm3, %v3043_v58, %v3044_v57 }
 0x54f   : > { %1476 = vmatpush1.msra.mxu1 %v1469_v53  ;;  %1539 = vmatprep.mubr.f32.mxu1 %v3280_v0 }
 0x556   : > { %2842 = vmatmul.mubr.msk.f32.vlgmr.msra.gmra.mrb[2].mxu1 %vm475_vm5, %v1464_v54 }
 0x557   : > { %1932 = vmatprep.mubr.f32.mxu1 %v3280_v0  ;;  %v1553_v56 = vpop.permute.xlu1 %1552 }
 0x55b   : > { %v1562_v59 = vpop.permute.xlu1 %1561 }
 0x55c   : > { %v1565_v2 = vsel %vm1563_vm3, %v3044_v57, %v1562_v59  ;;  %vm3298_vm3 = vmmov 0  }
 0x629   : > { %v1541_v60 = vpop.f32.mrb[2].mxu1 }
 0x62a   : > { %v1555_v62 = vadd.f32 %v1553_v56, %v1541_v60  ;;  %v1543_v63 = vpop.f32.mrb[3].mxu1 }
 0x62b   : > { %v1556_v3 = vadd.f32 %v1553_v56, %v1543_v63 }
 0x62c   : > { %v1568_v4 = vmul.f32 %v1564_v61, %v1555_v62 }
 0x62d   : > { %v1569_v5 = vmul.f32 %v1565_v2, %v1556_v3  ;;  %v2855_v3 = vld [vmem:[%s3789_s4 + $0x18] sm:$0xff] }
 0x62e   : > { %vm1570_vm4 = vcmp.ge.f32.partialorder %v1568_v4, 0.0  ;;  %v1572_v6 = vmul.f32 0.1, %v1568_v4 }
 0x62f   : > { %vm1571_vm6 = vcmp.ge.f32.partialorder %v1569_v5, 0.0  ;;  %v1573_v7 = vmul.f32 0.1, %v1569_v5 }
 0x630   : > { %v1574_v8 = vsel %vm1570_vm4, %v1568_v4, %v1572_v6  ;;  %v2128_v6 = vld [vmem:[#allocation7 + $0x50] sm:$0xff] }
 0x631   : > { %1582 = vrot.lane.b32.xlu0 %v1574_v8, %s3291_s18  ;;  %v1575_v9 = vsel %vm1571_vm6, %v1569_v5, %v1573_v7 }
 0x632   : > { %1584 = vrot.lane.b32.xlu1 %v1575_v9, %s3291_s18 }
 0x635   : > { %1740 = vrot.lane.b32.xlu0 %v1574_v8, %s3292_s19 }
 0x636   : > { %1742 = vrot.lane.b32.xlu1 %v1575_v9, %s3292_s19 }
 0x639   : > { %1828 = vperm.xlu0 %3029, %v2847_v10   ;;  %v2126_v10 = vld [vmem:[#allocation7 + $0x48] sm:$0xff] }
 0x63a   : > { %3046 = vrot.lane.b32.xlu1 %v3604_v16, %s3293_s10 }
 0x63d   : > { %1837 = vrot.lane.b32.xlu0 %v3280_v0, %s3293_s10 }
 0x6a3   : > { %v1583_v11 = vpop.permute.xlu0 %1582 }
 0x6a4   : > { %v1585_v12 = vpop.permute.xlu1 %1584 }
 0x6a5   : > { %v1587_v14 = vsel %vm1586_vm7, %v1583_v11, %v1585_v12  ;;  %1593 = vmatprep.subr.mxu0 %v1585_v12  ;;  %v2288_v12 = vld [vmem:[#allocation7 + $0x58] sm:$0xff] }
 0x6a6   : > { %1594 = vmatpush1.msra.mxu0 %v1587_v14 }
 0x6a7   : > { %2844 = vmatmul.mubr.msk.f32.vlgmr.msra.gmra.mrb[4].mxu0 %vm475_vm5, %v1579_v13  ;;  %1667 = vmatprep.subr.mxu0 %v1575_v9  ;;  %v1741_v17 = vpop.permute.xlu0 %1740 }
 0x6a8   : > { %v1743_v15 = vpop.permute.xlu1 %1742  ;;  %1668 = vmatpush1.msra.mxu0 %v1574_v8  ;;  %1731 = vmatprep.mubr.f32.mxu0 %v3280_v0 }
 0x6a9   : > { %1751 = vmatprep.subr.mxu0 %v1743_v15  ;;  %v1745_v19 = vsel %vm1744_vm8, %v1741_v17, %v1743_v15 }
 0x6ac   : > { %v3047_v21 = vpop.permute.xlu1 %3046 }
 0x6ad   : > { %v3049_v23 = vunpack.i.h.bf16 %v3047_v21  ;;  %v3048_v24 = vunpack.i.l.bf16 %v3047_v21 }
 0x6af   : > { %2845 = vmatmul.mubr.msk.f32.vlgmr.msra.gmra.mrb[4].mxu0 %vm475_vm5, %v1577_v18  ;;  %v1840_v27 = vsel %vm1839_vm9, %v3048_v24, %v3049_v23 }
 0x6b0   : > { %1752 = vmatpush1.msra.mxu0 %v1745_v19  ;;  %1815 = vmatprep.mubr.f32.mxu0 %v3280_v0 }
 0x6b7   : > { %2846 = vmatmul.mubr.msk.f32.vlgmr.msra.gmra.mrb[4].mxu0 %vm475_vm5, %v1739_v20 }
 0x6b8   : > { %2206 = vmatprep.mubr.f32.mxu0 %v3280_v0  ;;  %v1829_v22 = vpop.permute.xlu0 %1828 }
 0x6bc   : > { %v1838_v25 = vpop.permute.xlu0 %1837 }
 0x6bd   : > { %v1841_v30 = vsel %vm1839_vm9, %v3049_v23, %v1838_v25 }
 0x78a   : > { %v1817_v26 = vpop.f32.mrb[4].mxu0 }
 0x78b   : > { %v1831_v28 = vadd.f32 %v1829_v22, %v1817_v26  ;;  %v1819_v29 = vpop.f32.mrb[5].mxu0 }
 0x78c   : > { %v1832_v31 = vadd.f32 %v1829_v22, %v1819_v29 }
 0x78d   : > { %v1844_v32 = vmul.f32 %v1840_v27, %v1831_v28 }
 0x78e   : > { %v1845_v33 = vmul.f32 %v1841_v30, %v1832_v31  ;;  %v2859_v31 = vld [vmem:[%s3791_s6 + $0x18] sm:$0xff] }
 0x78f   : > { %vm1846_vm12 = vcmp.ge.f32.partialorder %v1844_v32, 0.0  ;;  %v1848_v34 = vmul.f32 0.1, %v1844_v32 }
 0x790   : > { %vm1847_vm13 = vcmp.ge.f32.partialorder %v1845_v33, 0.0  ;;  %v1849_v35 = vmul.f32 0.1, %v1845_v33 }
 0x791   : > { %v1850_v36 = vsel %vm1846_vm12, %v1844_v32, %v1848_v34  ;;  %v2404_v34 = vld [vmem:[#allocation8 + $0x50] sm:$0xff] }
 0x792   : > { %1858 = vrot.lane.b32.xlu1 %v1850_v36, %s3285_s14  ;;  %v1851_v37 = vsel %vm1847_vm13, %v1845_v33, %v1849_v35 }
 0x793   : > { %1860 = vrot.lane.b32.xlu0 %v1851_v37, %s3285_s14 }
 0x796   : > { %2015 = vrot.lane.b32.xlu1 %v1850_v36, %s3286_s3 }
 0x797   : > { %2017 = vrot.lane.b32.xlu0 %v1851_v37, %s3286_s3 }
 0x79a   : > { %2102 = vperm.xlu1 %3023, %v2851_v38   ;;  %v2402_v38 = vld [vmem:[#allocation8 + $0x48] sm:$0xff] }
 0x79b   : > { %3051 = vrot.lane.b32.xlu0 %v3604_v16, %s3294_s13 }
 0x79e   : > { %2111 = vrot.lane.b32.xlu1 %v3280_v0, %s3294_s13 }
 0x804   : > { %v1859_v39 = vpop.permute.xlu1 %1858 }
 0x805   : > { %v1861_v40 = vpop.permute.xlu0 %1860 }
 0x806   : > { %v1862_v42 = vsel %vm762_vm10, %v1859_v39, %v1861_v40  ;;  %1868 = vmatprep.subr.mxu1 %v1861_v40  ;;  %v2560_v40 = vld [vmem:[#allocation8 + $0x58] sm:$0xff] }
 0x807   : > { %1869 = vmatpush1.msra.mxu1 %v1862_v42 }
 0x808   : > { %2848 = vmatmul.mubr.msk.f32.vlgmr.msra.gmra.mrb[4].mxu1 %vm475_vm5, %v1855_v41  ;;  %1942 = vmatprep.subr.mxu1 %v1851_v37  ;;  %v2016_v44 = vpop.permute.xlu1 %2015 }
 0x809   : > { %1943 = vmatpush1.msra.mxu1 %v1850_v36  ;;  %v2018_v43 = vpop.permute.xlu0 %2017  ;;  %2006 = vmatprep.mubr.f32.mxu1 %v3280_v0 }
 0x80a   : > { %2025 = vmatprep.subr.mxu1 %v2018_v43  ;;  %v2019_v46 = vsel %vm920_vm11, %v2016_v44, %v2018_v43 }
 0x80d   : > { %v3052_v48 = vpop.permute.xlu0 %3051 }
 0x80e   : > { %v3054_v50 = vunpack.i.h.bf16 %v3052_v48  ;;  %v3053_v51 = vunpack.i.l.bf16 %v3052_v48 }
 0x810   : > { %2849 = vmatmul.mubr.msk.f32.vlgmr.msra.gmra.mrb[4].mxu1 %vm475_vm5, %v1853_v45  ;;  %v2113_v54 = vsel %vm475_vm5, %v3053_v51, %v3054_v50 }
 0x811   : > { %2026 = vmatpush1.msra.mxu1 %v2019_v46  ;;  %2089 = vmatprep.mubr.f32.mxu1 %v3280_v0 }
 0x812   : > { %2870 = vmatprep.subr.mxu1 %v3280_v0 }
 0x818   : > { %2850 = vmatmul.mubr.msk.f32.vlgmr.msra.gmra.mrb[4].mxu1 %vm475_vm5, %v2014_v47 }
 0x819   : > { %v2103_v49 = vpop.permute.xlu1 %2102  ;;  %2872 = vmatprep.mubr.msk.f32.mxu1 %vm3298_vm3, %v3280_v0 }
 0x81d   : > { %v2112_v52 = vpop.permute.xlu1 %2111 }
 0x81e   : > { %v2114_v57 = vsel %vm475_vm5, %v3054_v50, %v2112_v52 }
 0x8eb   : > { %v2091_v53 = vpop.f32.mrb[4].mxu1 }
 0x8ec   : > { %v2105_v55 = vadd.f32 %v2103_v49, %v2091_v53  ;;  %v2093_v56 = vpop.f32.mrb[5].mxu1 }
 0x8ed   : > { %v2106_v58 = vadd.f32 %v2103_v49, %v2093_v56 }
 0x8ee   : > { %v2117_v59 = vmul.f32 %v2113_v54, %v2105_v55 }
 0x8ef   : > { %v2118_v60 = vmul.f32 %v2114_v57, %v2106_v58 }
 0x8f0   : > { %vm2119_vm14 = vcmp.ge.f32.partialorder %v2117_v59, 0.0  ;;  %v2121_v61 = vmul.f32 0.1, %v2117_v59 }
 0x8f1   : > { %vm2120_vm15 = vcmp.ge.f32.partialorder %v2118_v60, 0.0  ;;  %v2122_v62 = vmul.f32 0.1, %v2118_v60 }
 0x8f2   : > { %v2123_v63 = vsel %vm2119_vm14, %v2117_v59, %v2121_v61 }
 0x8f3   : > { %2131 = vrot.lane.b32.xlu0 %v2123_v63, %s3295_s15  ;;  %v2124_v2 = vsel %vm2120_vm15, %v2118_v60, %v2122_v62 }
 0x8f4   : > { %2133 = vrot.lane.b32.xlu1 %v2124_v2, %s3295_s15 }
 0x8f7   : > { %2289 = vrot.lane.b32.xlu0 %v2123_v63, %s3296_s5 }
 0x8f8   : > { %2291 = vrot.lane.b32.xlu1 %v2124_v2, %s3296_s5 }
 0x8fb   : > { %2377 = vperm.xlu0 %3029, %v2855_v3  }
 0x8fc   : > { %3056 = vrot.lane.b32.xlu1 %v3604_v16, %s3297_s20 }
 0x8ff   : > { %2386 = vrot.lane.b32.xlu0 %v3280_v0, %s3297_s20 }
 0x965   : > { %v2132_v4 = vpop.permute.xlu0 %2131 }
 0x966   : > { %v2134_v5 = vpop.permute.xlu1 %2133 }
 0x967   : > { %v2136_v7 = vsel %vm2135_vm0, %v2132_v4, %v2134_v5  ;;  %2142 = vmatprep.subr.mxu0 %v2134_v5 }
 0x968   : > { %2143 = vmatpush1.msra.mxu0 %v2136_v7 }
 0x969   : > { %2852 = vmatmul.mubr.msk.f32.vlgmr.msra.gmra.mrb[6].mxu0 %vm475_vm5, %v2128_v6  ;;  %2216 = vmatprep.subr.mxu0 %v2124_v2  ;;  %v2290_v9 = vpop.permute.xlu0 %2289 }
 0x96a   : > { %v2292_v8 = vpop.permute.xlu1 %2291  ;;  %2217 = vmatpush1.msra.mxu0 %v2123_v63  ;;  %2280 = vmatprep.mubr.f32.mxu0 %v3280_v0 }
 0x96b   : > { %2300 = vmatprep.subr.mxu0 %v2292_v8  ;;  %v2294_v11 = vsel %vm2293_vm1, %v2290_v9, %v2292_v8 }
 0x96e   : > { %v3057_v13 = vpop.permute.xlu1 %3056 }
 0x96f   : > { %v3059_v15 = vunpack.i.h.bf16 %v3057_v13  ;;  %v3058_v17 = vunpack.i.l.bf16 %v3057_v13 }
 0x971   : > { %2853 = vmatmul.mubr.msk.f32.vlgmr.msra.gmra.mrb[6].mxu0 %vm475_vm5, %v2126_v10  ;;  %v2389_v20 = vsel %vm2388_vm2, %v3058_v17, %v3059_v15 }
 0x972   : > { %2301 = vmatpush1.msra.mxu0 %v2294_v11  ;;  %2364 = vmatprep.mubr.f32.mxu0 %v3280_v0 }
 0x979   : > { %2854 = vmatmul.mubr.msk.f32.vlgmr.msra.gmra.mrb[6].mxu0 %vm475_vm5, %v2288_v12 }
 0x97a   : > { %v2378_v14 = vpop.permute.xlu0 %2377 }
 0x97e   : > { %v2387_v18 = vpop.permute.xlu0 %2386 }
 0x97f   : > { %v2390_v23 = vsel %vm2388_vm2, %v3059_v15, %v2387_v18 }
 0xa4c   : > { %v2366_v19 = vpop.f32.mrb[6].mxu0 }
 0xa4d   : > { %v2380_v21 = vadd.f32 %v2378_v14, %v2366_v19  ;;  %v2368_v22 = vpop.f32.mrb[7].mxu0 }
 0xa4e   : > { %v2381_v24 = vadd.f32 %v2378_v14, %v2368_v22 }
 0xa4f   : > { %v2393_v25 = vmul.f32 %v2389_v20, %v2380_v21 }
 0xa50   : > { %v2394_v26 = vmul.f32 %v2390_v23, %v2381_v24 }
 0xa51   : > { %vm2395_vm4 = vcmp.ge.f32.partialorder %v2393_v25, 0.0  ;;  %v2397_v27 = vmul.f32 0.1, %v2393_v25 }
 0xa52   : > { %vm2396_vm6 = vcmp.ge.f32.partialorder %v2394_v26, 0.0  ;;  %v2398_v28 = vmul.f32 0.1, %v2394_v26 }
 0xa53   : > { %v2399_v29 = vsel %vm2395_vm4, %v2393_v25, %v2397_v27 }
 0xa54   : > { %2407 = vrot.lane.b32.xlu1 %v2399_v29, %s3285_s14  ;;  %v2400_v30 = vsel %vm2396_vm6, %v2394_v26, %v2398_v28 }
 0xa55   : > { %2409 = vrot.lane.b32.xlu0 %v2400_v30, %s3285_s14  ;;  %s2861_s14 = sshll.u32 %s3264_s27, 7  ;;  %s3299_s27 = smov [#allocation10]  }
 0xa56   : > { %s3736_s10 = scalar_lea.hbm %s3792_s7, %s2861_s14 }
 0xa58   : > { %2561 = vrot.lane.b32.xlu1 %v2399_v29, %s3286_s3 }
 0xa59   : > { %2563 = vrot.lane.b32.xlu0 %v2400_v30, %s3286_s3  ;;  %s410_s3 = scalar_lea.vmem [#allocation10], %s3563_s21  ;;  %s3182_s21 = sshll.u32 %s3299_s27, 4  ;;  %s3183_s21 = int_to_ptr.vmem [resolvable:$false] %s3182_s21 }
 0xa5a   : > { %s2667_s19 = sshll.u32 %s410_s3, 4  ;;  %s3184_s13 = scalar_lea.vmem %s3183_s21, 256  ;;  %s3738_s19 = int_to_ptr.vmem [resolvable:$true] %s2667_s19 }
 0xa5b   : > { %s3178_s12 = scalar_lea.vmem %s3738_s19, 128  ;;  %p3185_p9 = scmp.lt.s32.totalorder %s3738_s19, %s3183_s21 }
 0xa5c   : > { %2645 = vperm.xlu1 %3023, %v2859_v31   ;;  %p3179_p6 = scmp.ne.s32.totalorder %s3738_s19, %s3178_s12  ;;  %p3186_p5 = scmp.lt.s32.totalorder %s3184_s13, %s3178_s12 }
 0xa5e   : > { %p3180_p3 = pnand %p3179_p6, %p3823_p10  ;;  %p3187_p7 = por %p3186_p5, %p3185_p9 }
 0xa60   : > { %p3181_p4 = pneg %p3180_p3 }
 0xa62   : > { %p3188_p13 = pnand %p3187_p7, %p3181_p4 }
 0xac6   : > { %v2408_v32 = vpop.permute.xlu1 %2407 }
 0xac7   : > { %v2410_v33 = vpop.permute.xlu0 %2409 }
 0xac8   : > { %v2411_v35 = vsel %vm762_vm10, %v2408_v32, %v2410_v33 }
 0xac9   : > { %2871 = vmatpush3.msra.mxu1 %v2411_v35 }
 0xaca   : > { %v2562_v36 = vpop.permute.xlu1 %2561  ;;  %2873 = vmatmul.mubr.msk.f32.vlgmr.msra.gmra.mrb[6].mxu1 %vm475_vm5, %v2404_v34  ;;  %2875 = vmatprep.subr.mxu1 %v3280_v0 }
 0xacb   : > { %2876 = vmatpush3.msra.mxu1 %v2399_v29  ;;  %v2564_v37 = vpop.permute.xlu0 %2563  ;;  %2877 = vmatprep.mubr.msk.f32.mxu1 %vm3298_vm3, %v3280_v0 }
 0xacc   : > { %v2565_v39 = vsel %vm920_vm11, %v2562_v36, %v2564_v37  ;;  %2880 = vmatprep.subr.mxu1 %v3280_v0 }
 0xace   : > { %2878 = vmatmul.mubr.msk.f32.vlgmr.msra.gmra.mrb[8].mxu1 %vm475_vm5, %v2402_v38 }
 0xacf   : > { %2881 = vmatpush3.msra.mxu1 %v2565_v39  ;;  %2882 = vmatprep.mubr.msk.f32.mxu1 %vm3298_vm3, %v3280_v0 }
 0xad2   : > { %2883 = vmatmul.mubr.msk.f32.vlgmr.msra.gmra.mrb[10].mxu1 %vm475_vm5, %v2560_v40 }
 0xadb   : > { %v2646_v49 = vpop.permute.xlu1 %2645 }
 0xb9d   : > { %v2482_v41 = vpop.f32.mrb[6].mxu1 }
 0xb9e   : > { %v2874_v42 = vpop.f32.mrb[7].mxu1 }
 0xba1   : > { %v2555_v43 = vpop.f32.mrb[8].mxu1 }
 0xba2   : > { %v2556_v44 = vadd.f32 %v2555_v43, %v2482_v41  ;;  %v2879_v45 = vpop.f32.mrb[9].mxu1 }
 0xba5   : > { %v2636_v46 = vpop.f32.mrb[10].mxu1 }
 0xba6   : > { %v2640_v47 = vadd.f32 %v2636_v46, %v2556_v44  ;;  %v2884_v48 = vpop.f32.mrb[11].mxu1 }
 0xba8   : > { %v2648_v50 = vadd.f32 %v2646_v49, %v2640_v47 }
 0xbaa   : > { %v2649_v0 = vmul.f32 %v3604_v16, %v2648_v50 }
 0xbac   : > { %v2650_v51 = vadd.f32 %v2649_v0, %v3592_v1 }
 0xbae   : > { %2651 = vst [vmem:[%s410_s3] sm:$0xff] %v2650_v51 }
 0xbaf   : > { %3191 = shalt.err (!%p3188_p13)
}
 0xbb0   : > { %s3192_s1 = scalar_lea.hbm %s3736_s10, 128  ;;  %s3196_s9 = scalar_lea.hbm %s3792_s7, 256 }
 0xbb1   : > { %p3193_p8 = scmp.ne.s32.totalorder %s3736_s10, %s3192_s1  ;;  %p3197_p11 = scmp.lt.u32.totalorder %s3736_s10, %s3792_s7 }
 0xbb2   : > { %p3198_p0 = scmp.lt.u32.totalorder %s3196_s9, %s3192_s1  ;;  %p3200_p6 = scmp.lt.u32.totalorder %s3192_s1, %s3736_s10 }
 0xbb3   : > { %p3194_p12 = pnand %p3193_p8, %p3823_p10 }
 0xbb4   : > { %p3199_p1 = por %p3198_p0, %p3197_p11 }
 0xbb5   : > { %p3195_p2 = pneg %p3194_p12 }
 0xbb6   : > { %p3201_p3 = por %p3200_p6, %p3199_p1 }
 0xbb8   : > { %p3202_p4 = pnand %p3201_p3, %p3195_p2 }
 0xbba   : > { %3205 = shalt.err (!%p3202_p4)
}
 0xbbb   : > { %2926 = dma.vmem_to_hbm [thread:$0]  (%p3823_p10), %s3738_s19, 128, %s3736_s10, %s2653_s11  }
 0xbbc PF: > { %s3824_s30 = sld [smem:[#allocation16_spill]]  ;;  %s2679_s18 = sand.u32 1, %s3252_s24  }
 0xbbd   : > { %p3826_p5 = scmp.ge.s32.totalorder %s3272_s29, 2  ;;  %s2680_s14 = scalar_lea.sflag [#allocation4], %s2679_s18 }
 0xbc2   : > { %p3825_p9 = scmp.ne.s32.totalorder %s3824_s30, 0 }
 0xbc4   : > { %p2943_p7 = pnand %p3826_p5, %p3825_p9 }
 0xbc6   : > { %3247 = dma.done.wait (!%p2943_p7), %s2680_s14, 128  }
 0xbc7   : > { %3249 = vsyncadd (!%p2943_p7), %s2680_s14, 4294967168  ;;  %s27_s29 = sadd.s32 1, %s3272_s29   ;;  %s3827_s16 = sld [smem:[#allocation17_spill]] }
 0xbc8   : > { %p24_p13 = scmp.ge.s32.totalorder %s27_s29, 4   ;;  %s3828_s24 = smov %s3256_s25 }
 0xbc9   : > { %s3829_s25 = smov %s3260_s26  ;;  %s3830_s26 = smov %s3484_s22 }
 0xbca   : > { %s3831_s27 = smov %s3268_s28  ;;  %26 = sbr.rel (!%p24_p13) target bundleno = 13 (0xd), region = 145 }
 0xbcd   : > { %s3832_s28 = smov %s3827_s16 }
 0xbd1   :  { %2685 = vsyncpa [#allocation3], 1 }
 0xbd2   :  { %2687 = vsyncpa [#allocation3 + $0x1], 1 }
 0xbd3   :  { %2688 = vsyncpa [#allocation6], 1 }
 0xbd4   :  { %2690 = vsyncpa [#allocation6 + $0x1], 1 }
 0xbd5   :  { %2691 = vsyncpa [#allocation9], 1 }
 0xbd6   :  { %2692 = vsyncpa [#allocation4], 1 }
 0xbd7   :  { %2694 = vsyncpa [#allocation4 + $0x1], 1 }

// kernel: tpu_custom_call.1
= control target key start
LH: loop header
LB: loop body
LE: loop exit
PB: predicated region body
PF: predicated region fallthrough
CT: control target
= control target key end

     0   :  { %s3785_s0 = inlined_call_operand.vmem [shape: f32[2,8,384], index: 0, kind: input, shape index: {}]   ;;  %s3786_s1 = inlined_call_operand.hbm [shape: f32[2,8,384], index: 1, kind: input, shape index: {}]   ;;  %s3787_s2 = inlined_call_operand.hbm [shape: f32[2,8,384], index: 2, kind: input, shape index: {}]   ;;  %s3788_s3 = inlined_call_operand.hbm [shape: f32[4,3,8,8], index: 3, kind: input, shape index: {}]   ;;  %s3789_s4 = inlined_call_operand.vmem [shape: f32[4,8,1], index: 4, kind: input, shape index: {}]   ;;  %s3790_s5 = inlined_call_operand.hbm [shape: f32[4,3,8,8], index: 5, kind: input, shape index: {}]   ;;  %s3791_s6 = inlined_call_operand.vmem [shape: f32[4,8,1], index: 6, kind: input, shape index: {}]   ;;  %s3792_s7 = inlined_call_operand.hbm [shape: f32[2,8,128], index: 7, kind: output, shape index: {}]  }
   0x1   :  { %3800 = sst [smem:[#allocation18_spill]] %s3786_s1 }
   0x2   :  { %3801 = sst [smem:[#allocation19_spill]] %s3788_s3 }
   0x3   :  { %3802 = sst [smem:[#allocation20_spill]] %s3790_s5 }
   0x4   :  { %12 = vsyncpa [#allocation3], 0 }
   0x5   :  { %14 = vsyncpa [#allocation3 + $0x1], 0 }
   0x6   :  { %15 = vsyncpa [#allocation6], 0 }
   0x7   :  { %17 = vsyncpa [#allocation6 + $0x1], 0 }
   0x8   :  { %18 = vsyncpa [#allocation9], 0 }
   0x9   :  { %19 = vsyncpa [#allocation4], 0 }
   0xa   :  { %21 = vsyncpa [#allocation4 + $0x1], 0  ;;  %s3340_s24 = smov 0   ;;  %s3342_s25 = smov 0  }
   0xb   :  { %s3344_s26 = smov 0   ;;  %s3346_s27 = smov 0  }
   0xc   :  { %s3348_s28 = smov 0   ;;  %s3350_s29 = smov 0  }
   0xd LB: > { %s3371_s30 = sadd.s32 4294967295, %s3272_s29   ;;  %s2813_s8 = sadd.s32 4294967294, %s3272_s29   ;;  %s3272_s29 = sphi %s3350_s29, %s27_s29   ;;  %s3268_s28 = sphi %s3348_s28, %s3832_s28   ;;  %s3264_s27 = sphi %s3346_s27, %s3831_s27   ;;  %s3260_s26 = sphi %s3344_s26, %s3830_s26   ;;  %s3256_s25 = sphi %s3342_s25, %s3829_s25   ;;  %s3252_s24 = sphi %s3340_s24, %s3828_s24  }
   0xe   : > { %p91_p0 = scmp.ne.s32.totalorder %s3256_s25, %s3252_s24  ;;  %p3793_p1 = scmp.eq.s32.totalorder %s3371_s30, 0 }
   0xf   : > { %p237_p3 = scmp.eq.s32.totalorder %s2813_s8, 1  ;;  %p2814_p5 = scmp.ge.s32.totalorder %s3272_s29, 1 }
  0x10   : > { %p3380_p4 = por %p3793_p1, %p91_p0  ;;  %p244_p7 = scmp.lt.s32.totalorder %s3272_s29, 3 }
  0x11   : > { %p3385_p6 = por %p237_p3, %p91_p0  ;;  %s3274_s12 = smov [#allocation7]  }
  0x12   : > { %s3803_s9 = scalar_select %p3380_p4, 1, 0 }
  0x13   : > { %s3804_s10 = scalar_select %p3385_p6, 1, 0 }
  0x14   : > { %p3390_p8 = pnand %p2814_p5, %p244_p7  ;;  %s256_s13 = sshll.u32 %s3274_s12, 4  ;;  %s3394_s13 = int_to_ptr.vmem [resolvable:$true] %s256_s13 }
  0x15   : > { %3805 = sst [smem:[#allocation16_spill]] %s3804_s10  ;;  %s3275_s15 = smov [#allocation8]  }
  0x16   : > { %s3806_s11 = scalar_select %p3390_p8, 1, 0 }
  0x17   : > { %p2928_p9 = pneg %p3390_p8  ;;  %s272_s16 = sshll.u32 %s3275_s15, 4  ;;  %s3405_s16 = int_to_ptr.vmem [resolvable:$true] %s272_s16 }
  0x18   : > { %s3808_s3 = sld [smem:[#allocation19_spill]] }
  0x19   : > { %p3401_p11 = pnand %p2928_p9, %p3793_p1 }
  0x1b   : > { %p3062_p13 = pneg %p3401_p11 }
  0x1e   : > { %s3060_s19 = scalar_lea.hbm %s3808_s3, 1536 }
  0x1f   : > { %p3061_p12 = scmp.ne.s32.totalorder %s3808_s3, %s3060_s19  ;;  %p3067_p5 = scmp.lt.u32.totalorder %s3060_s19, %s3808_s3 }
  0x21   : > { %p3063_p0 = pnand %p3062_p13, %p3061_p12 }
  0x23   : > { %p3064_p3 = pneg %p3063_p0 }
  0x25   : > { %p3069_p7 = pnand %p3067_p5, %p3064_p3 }
  0x27   : > { %3072 = shalt.err (!%p3069_p7)
}
  0x28   : > { %s3073_s8 = scalar_lea.vmem %s3394_s13, 1536  ;;  %p3081_p2 = scmp.lt.s32.totalorder %s3394_s13, %s3394_s13 }
  0x29   : > { %p3074_p9 = scmp.ne.s32.totalorder %s3394_s13, %s3073_s8  ;;  %p3082_p12 = scmp.lt.s32.totalorder %s3073_s8, %s3073_s8 }
  0x2b   : > { %p3076_p10 = pnand %p3074_p9, %p3062_p13  ;;  %p3083_p0 = por %p3082_p12, %p3081_p2 }
  0x2d   : > { %p3077_p1 = pneg %p3076_p10 }
  0x2f   : > { %p3084_p6 = pnand %p3083_p0, %p3077_p1 }
  0x31   : > { %3087 = shalt.err (!%p3084_p6)
}
  0x32   : > { %s3276_s12 = smov 128   ;;  %s3277_s15 = smov 8  }
  0x33   : > { %2931 = dma.hbm_to_vmem [thread:$0]  (!%p3401_p11), %s3808_s3, 1536, %s3394_s13, [#allocation6], %s3276_s12, %s3276_s12, %s3277_s15  }
  0x34   : > { %s3809_s5 = sld [smem:[#allocation20_spill]] }
  0x3a   : > { %s3088_s21 = scalar_lea.hbm %s3809_s5, 1536 }
  0x3b   : > { %p3089_p2 = scmp.ne.s32.totalorder %s3809_s5, %s3088_s21  ;;  %p3095_p10 = scmp.lt.u32.totalorder %s3088_s21, %s3809_s5 }
  0x3d   : > { %p3091_p1 = pnand %p3089_p2, %p3062_p13 }
  0x3f   : > { %p3092_p6 = pneg %p3091_p1 }
  0x41   : > { %p3097_p3 = pnand %p3095_p10, %p3092_p6 }
  0x43   : > { %3100 = shalt.err (!%p3097_p3)
}
  0x44   : > { %s3101_s13 = scalar_lea.vmem %s3405_s16, 1536  ;;  %p3109_p12 = scmp.lt.s32.totalorder %s3405_s16, %s3405_s16 }
  0x45   : > { %p3102_p5 = scmp.ne.s32.totalorder %s3405_s16, %s3101_s13  ;;  %p3110_p0 = scmp.lt.s32.totalorder %s3101_s13, %s3101_s13 }
  0x47   : > { %p3104_p7 = pnand %p3102_p5, %p3062_p13  ;;  %p3111_p2 = por %p3110_p0, %p3109_p12 }
  0x49   : > { %p3105_p9 = pneg %p3104_p7 }
  0x4b   : > { %p3112_p1 = pnand %p3111_p2, %p3105_p9 }
  0x4d   : > { %3115 = shalt.err (!%p3112_p1)
}
  0x4e   : > { %2934 = dma.hbm_to_vmem [thread:$0]  (!%p3401_p11), %s3809_s5, 1536, %s3405_s16, [#allocation9], %s3276_s12, %s3276_s12, %s3277_s15  }
  0x4f   : > { %s39_s18 = sadd.s32 1, %s3268_s28  ;;  %s78_s19 = sadd.s32 1, %s3260_s26 }
  0x50   : > { %p41_p13 = scmp.ge.s32.totalorder %s39_s18, 2  ;;  %p85_p6 = scmp.ne.s32.totalorder %s3260_s26, %s3256_s25 }
  0x51   : > { %p86_p10 = scmp.eq.s32.totalorder %s3272_s29, 0  ;;  %p2948_p3 = scmp.lt.s32.totalorder %s3272_s29, 2 }
  0x52   : > { %s3834_s18 = smov (%p41_p13, %s39_s18), 0  ;;  %p3812_p7 = scmp.eq.s32.totalorder %s3371_s30, 1 }
  0x53   : > { %3810 = sst [smem:[#allocation17_spill]] %s3834_s18  ;;  %p3467_p5 = por %p86_p10, %p85_p6 }
  0x54   : > { %p3473_p9 = por %p3812_p7, %p85_p6  ;;  %s73_s12 = ssub.s32 %s3268_s28, %s3834_s18 }
  0x55   : > { %s300_s15 = sand.u32 1, %s3260_s26   ;;  %p76_p11 = scmp.eq.s32.totalorder %s73_s12, 0 }
  0x56   : > { %s3813_s16 = scalar_select %p3473_p9, 1, 0 }
  0x57   : > { %s3480_s20 = sshll.u32 %s300_s15, 3  ;;  %s3795_s21 = smul.u32 384, %s3268_s28 }
  0x58   : > { %s3484_s22 = scalar_select %p76_p11, %s3260_s26, %s78_s19  }
  0x59   : > { %s3814_s1 = sld [smem:[#allocation18_spill]]  ;;  %s304_s17 = scalar_lea.vmem [#allocation2], %s3480_s20 }
  0x5a   : > { %s314_s3 = sshll.u32 %s304_s17, 4  ;;  %p3500_p12 = pnand %p2948_p3, %p3467_p5  ;;  %s3494_s3 = int_to_ptr.vmem [resolvable:$true] %s314_s3 }
  0x5b   : > { %s321_s19 = sand.u32 1, %s3272_s29   ;;  %s301_s23 = scalar_lea.sflag [#allocation3], %s300_s15 }
  0x5c   : > { %p3118_p2 = pneg %p3500_p12 }
  0x5f   : > { %s2705_s13 = scalar_lea.hbm %s3814_s1, %s3795_s21  ;;  %s3121_s14 = scalar_lea.hbm %s3814_s1, 768 }
  0x60   : > { %s3491_s10 = scalar_lea.hbm %s2705_s13, 128  ;;  %s3146_s8 = scalar_lea.hbm %s2705_s13, 256 }
  0x61   : > { %p3117_p0 = scmp.ne.s32.totalorder %s3491_s10, %s3146_s8  ;;  %p3122_p6 = scmp.lt.u32.totalorder %s3491_s10, %s3814_s1 }
  0x62   : > { %p3123_p10 = scmp.lt.u32.totalorder %s3121_s14, %s3146_s8  ;;  %p3125_p5 = scmp.lt.u32.totalorder %s3146_s8, %s3491_s10 }
  0x63   : > { %p3119_p1 = pnand %p3118_p2, %p3117_p0 }
  0x64   : > { %p3124_p3 = por %p3123_p10, %p3122_p6 }
  0x65   : > { %p3120_p13 = pneg %p3119_p1 }
  0x66   : > { %p3126_p7 = por %p3125_p5, %p3124_p3 }
  0x68   : > { %p3127_p11 = pnand %p3126_p7, %p3120_p13 }
  0x6a   : > { %3130 = shalt.err (!%p3127_p11)
}
  0x6b   : > { %s3131_s15 = scalar_lea.vmem %s3494_s3, 128  ;;  %s3278_s21 = smov [#allocation2]  }
  0x6c   : > { %p3132_p0 = scmp.ne.s32.totalorder %s3494_s3, %s3131_s15  ;;  %s3136_s13 = sshll.u32 %s3278_s21, 4  ;;  %s3137_s13 = int_to_ptr.vmem [resolvable:$false] %s3136_s13 }
  0x6d   : > { %s3138_s5 = scalar_lea.vmem %s3137_s13, 256  ;;  %p3139_p4 = scmp.lt.s32.totalorder %s3494_s3, %s3137_s13 }
  0x6e   : > { %p3134_p1 = pnand %p3132_p0, %p3118_p2  ;;  %p3140_p6 = scmp.lt.s32.totalorder %s3138_s5, %s3131_s15 }
  0x70   : > { %p3135_p9 = pneg %p3134_p1  ;;  %p3141_p10 = por %p3140_p6, %p3139_p4 }
  0x72   : > { %p3142_p3 = pnand %p3141_p10, %p3135_p9 }
  0x74   : > { %3145 = shalt.err (!%p3142_p3)
}
  0x75   : > { %2938 = dma.hbm_to_vmem [thread:$0]  (!%p3500_p12), %s3491_s10, 128, %s3494_s3, %s301_s23  }
  0x76   : > { %s3816_s18 = smul.u32 384, %s3268_s28  ;;  %s325_s21 = scalar_lea.vmem [#allocation5], %s3480_s20 }
  0x77   : > { %s335_s13 = sshll.u32 %s325_s21, 4  ;;  %s322_s5 = scalar_lea.sflag [#allocation6], %s321_s19  ;;  %s336_s13 = int_to_ptr.vmem [resolvable:$true] %s335_s13 }
  0x78   : > { %s2713_s14 = scalar_lea.hbm %s3787_s2, %s3816_s18  ;;  %s3152_s23 = scalar_lea.hbm %s3787_s2, 768 }
  0x79   : > { %s3535_s15 = scalar_lea.hbm %s2713_s14, 256  ;;  %s3177_s1 = scalar_lea.hbm %s2713_s14, 384 }
  0x7a   : > { %p3148_p4 = scmp.ne.s32.totalorder %s3535_s15, %s3177_s1  ;;  %p3153_p5 = scmp.lt.u32.totalorder %s3535_s15, %s3787_s2 }
  0x7b   : > { %p3154_p7 = scmp.lt.u32.totalorder %s3152_s23, %s3177_s1  ;;  %p3156_p0 = scmp.lt.u32.totalorder %s3177_s1, %s3535_s15 }
  0x7c   : > { %p3150_p9 = pnand %p3148_p4, %p3118_p2 }
  0x7d   : > { %p3155_p11 = por %p3154_p7, %p3153_p5 }
  0x7e   : > { %p3151_p13 = pneg %p3150_p9 }
  0x7f   : > { %p3157_p1 = por %p3156_p0, %p3155_p11 }
  0x81   : > { %p3158_p6 = pnand %p3157_p1, %p3151_p13 }
  0x83   : > { %3161 = shalt.err (!%p3158_p6)
}
  0x84   : > { %s3162_s19 = scalar_lea.vmem %s336_s13, 128  ;;  %s3279_s8 = smov [#allocation5]  }
  0x85   : > { %p3163_p10 = scmp.ne.s32.totalorder %s336_s13, %s3162_s19  ;;  %s3167_s17 = sshll.u32 %s3279_s8, 4  ;;  %s3168_s17 = int_to_ptr.vmem [resolvable:$false] %s3167_s17 }
  0x86   : > { %s3169_s14 = scalar_lea.vmem %s3168_s17, 256  ;;  %p3170_p9 = scmp.lt.s32.totalorder %s336_s13, %s3168_s17 }
  0x87   : > { %p3165_p3 = pnand %p3163_p10, %p3118_p2  ;;  %p3171_p8 = scmp.lt.s32.totalorder %s3169_s14, %s3162_s19 }
  0x89   : > { %p3166_p4 = pneg %p3165_p3  ;;  %p3172_p5 = por %p3171_p8, %p3170_p9 }
  0x8b   : > { %p3173_p7 = pnand %p3172_p5, %p3166_p4 }
  0x8d   : > { %3176 = shalt.err (!%p3173_p7)
}
  0x8e   : > { %2941 = dma.hbm_to_vmem [thread:$0]  (!%p3500_p12), %s3535_s15, 128, %s336_s13, %s322_s5  }
  0x8f   : > { %p3817_p13 = scmp.ne.s32.totalorder %s3806_s11, 0 }
  0x90   : > { %s3560_s1 = sand.u32 (!%p3817_p13), 1, %s3256_s25   ;;  %p3818_p8 = scmp.ne.s32.totalorder (!%p3817_p13), %s3803_s9, 0 }
  0x91   : > { %344 = sbr.rel (%p3817_p13) target bundleno = 3004 (0xbbc), region = 48  ;;  %s3563_s21 = sshll.u32 (!%p3817_p13), %s3560_s1, 3 }
  0x92   : > { %s347_s3 = scalar_lea.sflag (!%p3817_p13), [#allocation3], %s3560_s1  ;;  %s350_s10 = scalar_lea.vmem (!%p3817_p13), [#allocation2], %s3563_s21 }
  0x98   : > { %3231 = dma.done.wait (%p3818_p8), %s347_s3, 128  }
  0x99   : > { %3233 = vsyncadd (%p3818_p8), %s347_s3, 4294967168  ;;  %s355_s11 = sand.u32 1, %s3371_s30   ;;  %s359_s13 = scalar_lea.vmem [#allocation5], %s3563_s21 }
  0x9a   : > { %s356_s12 = scalar_lea.sflag [#allocation6], %s355_s11 }
  0x9b   : > { %3235 = dma.done.wait (%p3818_p8), %s356_s12, 128  }
  0x9c   : > { %3237 = vsyncadd (%p3818_p8), %s356_s12, 4294967168  ;;  %p3819_p12 = scmp.eq.s32.totalorder %s3371_s30, 0 }
  0x9e   : > { %3239 = dma.done.wait (%p3819_p12), [#allocation6], 1536   ;;  %p3820_p2 = pmov %p3819_p12 }
  0xa0   : > { %3241 = vsyncadd (%p3820_p2), [#allocation6], 4294965760  ;;  %p3821_p11 = pmov %p3820_p2 }
  0xa1   : > { %p3822_p0 = pmov %p3820_p2 }
  0xa2   : > { %3243 = dma.done.wait (%p3821_p11), [#allocation9], 1536  }
  0xa3   : > { %3245 = vsyncadd (%p3822_p0), [#allocation9], 4294965760  ;;  %p411_p1 = scmp.lt.s32.totalorder %s3264_s27, 1  ;;  %v3280_v0 = vmov 0.0   ;;  %v3592_v1 = vld [vmem:[%s350_s10] sm:$0xff]  ;;  %v423_v3 = vld [vmem:[%s359_s13] sm:$0xff]  ;;  %v426_v10 = vlaneseq }
  0xa4   : > { %543 = vmatprep.mubr.f32.mxu0 %v3280_v0  ;;  %833 = vmatprep.mubr.f32.mxu1 %v3280_v0  ;;  %vm450_vm0 = vcmp.ge.f32.partialorder %v3592_v1, 0.0  ;;  %v453_v4 = vmul.f32 0.1, %v3592_v1  ;;  %vm451_vm2 = vcmp.ge.f32.partialorder %v423_v3, 0.0  ;;  %v454_v6 = vmul.f32 0.1, %v423_v3 }
  0xa5   : > { %s412_s15 = scalar_select %p411_p1, %s3264_s27, 1  ;;  %v3283_v11 = vmov 0   ;;  %v427_v12 = vand.u32 127, %v426_v10  ;;  %v724_v13 = vld [vmem:[%s3789_s4] sm:$0xff]  ;;  %vm470_vm4 = vcmask 154624   ;;  %v460_v22 = vld [vmem:[#allocation7 + $0x8] sm:$0xff] }
  0xa6   : > { %v456_v7 = vsel %vm450_vm0, %v3592_v1, %v453_v4  ;;  %s3281_s30 = smov 19   ;;  %v457_v9 = vsel %vm451_vm2, %v423_v3, %v454_v6  ;;  %s3282_s18 = smov 20   ;;  %3023 = vset.pattern.permute.xlu1 %v3283_v11  ;;  %3029 = vset.pattern.permute.xlu0 %v3283_v11  ;;  %vm475_vm5 = vcmask 64512   ;;  %vm556_vm6 = vcmask 162816   ;;  %v458_v31 = vld [vmem:[#allocation7] sm:$0xff]  ;;  %v636_v34 = vld [vmem:[#allocation7 + $0x10] sm:$0xff] }
  0xa7   : > { %s2913_s5 = smul.u32 24, %s412_s15  ;;  %466 = vrot.lane.b32.xlu0 %v456_v7, %s3281_s30  ;;  %s3284_s19 = smov 18   ;;  %v428_v14 = vadd.s32 128, %v427_v12  ;;  %vm643_vm7 = vcmask 146432   ;;  %v1000_v52 = vld [vmem:[%s3791_s6] sm:$0xff]  ;;  %vm762_vm10 = vcmask 1039360  }
  0xa8   : > { %s3285_s14 = smov 127   ;;  %s3286_s3 = smov 126   ;;  %v755_v55 = vld [vmem:[#allocation8 + $0x8] sm:$0xff]  ;;  %vm920_vm11 = vcmask 1031168   ;;  %v753_v59 = vld [vmem:[#allocation8] sm:$0xff]  ;;  %v915_v61 = vld [vmem:[#allocation8 + $0x10] sm:$0xff] }
  0xa9   : > { %s418_s20 = scalar_lea.vmem %s3785_s0, %s2913_s5  ;;  %v432_v15 = vadd.s32 4294967168, %v428_v14  ;;  %s3287_s12 = smov 125   ;;  %vm1036_vm14 = vcmask 1022976   ;;  %vm1194_vm15 = vcmask 998400   ;;  %vm1289_vm0 = vcmask 121856  }
  0xaa   : > { %v421_v2 = vld [vmem:[%s418_s20] sm:$0xff]  ;;  %s3288_s13 = smov 122   ;;  %s3289_s9 = smov 15  }
  0xab   : > { %vm449_vm1 = vcmp.ge.f32.partialorder %v421_v2, 0.0  ;;  %v452_v5 = vmul.f32 0.1, %v421_v2  ;;  %468 = vrot.lane.b32.xlu0 %v457_v9, %s3281_s30  ;;  %vm438_vm3 = vcmp.lt.s32.totalorder %v432_v15, 16  ;;  %s3293_s10 = smov 9   ;;  %s3295_s15 = smov 121  }
  0xac   : > { %v3604_v16 = vsel %vm438_vm3, 1.0, %v3280_v0  ;;  %vm1563_vm3 = vcmask 113664   ;;  %s3296_s5 = smov 114   ;;  %s3297_s20 = smov 1  }
  0xad   : > { %v455_v8 = vsel %vm449_vm1, %v421_v2, %v452_v5  ;;  %s2653_s11 = scalar_lea.sflag [#allocation4], %s3560_s1  ;;  %p3823_p10 = scmp.ne.s32.totalorder %s3813_s16, 0 }
  0xae   : > { %464 = vrot.lane.b32.xlu1 %v455_v8, %s3281_s30 }
  0xaf   : > { %554 = vrot.lane.b32.xlu0 %v457_v9, %s3282_s18 }
  0xb2   : > { %552 = vrot.lane.b32.xlu1 %v456_v7, %s3282_s18 }
  0xb3   : > { %639 = vrot.lane.b32.xlu0 %v456_v7, %s3284_s19 }
  0xb6   : > { %550 = vrot.lane.b32.xlu1 %v455_v8, %s3282_s18  ;;  %s3291_s18 = smov 123  }
  0xb7   : > { %637 = vrot.lane.b32.xlu0 %v455_v8, %s3284_s19 }
  0xba   : > { %641 = vrot.lane.b32.xlu1 %v457_v9, %s3284_s19 }
  0xbb   : > { %3025 = vrot.lane.b32.xlu0 %v3604_v16, %s3281_s30 }
  0xbe   : > { %727 = vperm.xlu1 %3023, %v724_v13  }
  0xc2   : > { %739 = vrot.lane.b32.xlu1 %v3280_v0, %s3281_s30  ;;  %s3290_s30 = smov 14  }
 0x119   : > { %v467_v17 = vpop.permute.xlu0 %466 }
 0x11d   : > { %v469_v19 = vpop.permute.xlu0 %468 }
 0x11e   : > { %v472_v21 = vsel %vm470_vm4, %v467_v17, %v469_v19 }
 0x11f   : > { %479 = vmatprep.subr.mxu0 %v472_v21  ;;  %v1029_v21 = vld [vmem:[#allocation7 + $0x20] sm:$0xff] }
 0x120   : > { %v465_v18 = vpop.permute.xlu1 %464 }
 0x121   : > { %v471_v23 = vsel %vm470_vm4, %v465_v18, %v467_v17  ;;  %v555_v24 = vpop.permute.xlu0 %554  ;;  %v2839_v18 = vld [vmem:[%s3789_s4 + $0x8] sm:$0xff] }
 0x122   : > { %480 = vmatpush1.msra.mxu0 %v471_v23 }
 0x123   : > { %2830 = vmatmul.mubr.msk.f32.vlgmr.msra.gmra.mrb[0].mxu0 %vm475_vm5, %v460_v22 }
 0x124   : > { %v553_v20 = vpop.permute.xlu1 %552  ;;  %628 = vmatprep.mubr.f32.mxu0 %v3280_v0 }
 0x125   : > { %v558_v27 = vsel %vm556_vm6, %v553_v20, %v555_v24  ;;  %v640_v28 = vpop.permute.xlu0 %639 }
 0x126   : > { %564 = vmatprep.subr.mxu0 %v558_v27  ;;  %v1189_v27 = vld [vmem:[#allocation7 + $0x28] sm:$0xff] }
 0x128   : > { %v551_v25 = vpop.permute.xlu1 %550 }
 0x129   : > { %v557_v26 = vsel %vm556_vm6, %v551_v25, %v553_v20  ;;  %v638_v32 = vpop.permute.xlu0 %637  ;;  %v1027_v25 = vld [vmem:[#allocation7 + $0x18] sm:$0xff] }
 0x12a   : > { %565 = vmatpush1.msra.mxu0 %v557_v26  ;;  %v644_v33 = vsel %vm643_vm7, %v638_v32, %v640_v28 }
 0x12b   : > { %2831 = vmatmul.mubr.msk.f32.vlgmr.msra.gmra.mrb[0].mxu0 %vm475_vm5, %v458_v31 }
 0x12c   : > { %v642_v29 = vpop.permute.xlu1 %641  ;;  %715 = vmatprep.mubr.f32.mxu0 %v3280_v0 }
 0x12d   : > { %v645_v30 = vsel %vm643_vm7, %v640_v28, %v642_v29  ;;  %v3026_v36 = vpop.permute.xlu0 %3025 }
 0x12e   : > { %651 = vmatprep.subr.mxu0 %v645_v30  ;;  %v3028_v37 = vunpack.i.h.bf16 %v3026_v36  ;;  %v3027_v38 = vunpack.i.l.bf16 %v3026_v36 }
 0x12f   : > { %652 = vmatpush1.msra.mxu0 %v644_v33 }
 0x130   : > { %v741_v41 = vsel %vm470_vm4, %v3027_v38, %v3028_v37 }
 0x133   : > { %2832 = vmatmul.mubr.msk.f32.vlgmr.msra.gmra.mrb[0].mxu0 %vm475_vm5, %v636_v34 }
 0x134   : > { %1107 = vmatprep.mubr.f32.mxu0 %v3280_v0 }
 0x13d   : > { %v728_v35 = vpop.permute.xlu1 %727 }
 0x141   : > { %v740_v39 = vpop.permute.xlu1 %739 }
 0x142   : > { %v742_v44 = vsel %vm470_vm4, %v3028_v37, %v740_v39 }
 0x206   : > { %v717_v40 = vpop.f32.mrb[0].mxu0 }
 0x207   : > { %v730_v42 = vadd.f32 %v728_v35, %v717_v40  ;;  %v719_v43 = vpop.f32.mrb[1].mxu0 }
 0x208   : > { %v731_v45 = vadd.f32 %v728_v35, %v719_v43 }
 0x209   : > { %v745_v46 = vmul.f32 %v741_v41, %v730_v42 }
 0x20a   : > { %v746_v47 = vmul.f32 %v742_v44, %v731_v45  ;;  %v2843_v45 = vld [vmem:[%s3791_s6 + $0x8] sm:$0xff] }
 0x20b   : > { %vm747_vm8 = vcmp.ge.f32.partialorder %v745_v46, 0.0  ;;  %v749_v48 = vmul.f32 0.1, %v745_v46 }
 0x20c   : > { %vm748_vm9 = vcmp.ge.f32.partialorder %v746_v47, 0.0  ;;  %v750_v49 = vmul.f32 0.1, %v746_v47 }
 0x20d   : > { %v751_v50 = vsel %vm747_vm8, %v745_v46, %v749_v48  ;;  %v1305_v48 = vld [vmem:[#allocation8 + $0x20] sm:$0xff]  ;;  %vm1744_vm8 = vcmask 965632  }
 0x20e   : > { %758 = vrot.lane.b32.xlu0 %v751_v50, %s3285_s14  ;;  %v752_v51 = vsel %vm748_vm9, %v746_v47, %v750_v49  ;;  %vm1839_vm9 = vcmask 72704  }
 0x20f   : > { %760 = vrot.lane.b32.xlu1 %v752_v51, %s3285_s14 }
 0x212   : > { %916 = vrot.lane.b32.xlu0 %v751_v50, %s3286_s3 }
 0x213   : > { %918 = vrot.lane.b32.xlu1 %v752_v51, %s3286_s3 }
 0x216   : > { %1003 = vperm.xlu0 %3029, %v1000_v52   ;;  %v1303_v52 = vld [vmem:[#allocation8 + $0x18] sm:$0xff] }
 0x217   : > { %3031 = vrot.lane.b32.xlu1 %v3604_v16, %s3284_s19 }
 0x21b   : > { %1012 = vrot.lane.b32.xlu1 %v3280_v0, %s3284_s19  ;;  %s3292_s19 = smov 118  }
 0x280   : > { %v759_v53 = vpop.permute.xlu0 %758 }
 0x281   : > { %v761_v54 = vpop.permute.xlu1 %760 }
 0x282   : > { %769 = vmatprep.subr.mxu1 %v761_v54  ;;  %v763_v56 = vsel %vm762_vm10, %v759_v53, %v761_v54  ;;  %v1464_v54 = vld [vmem:[#allocation8 + $0x28] sm:$0xff] }
 0x283   : > { %770 = vmatpush1.msra.mxu1 %v763_v56 }
 0x284   : > { %2833 = vmatmul.mubr.msk.f32.vlgmr.msra.gmra.mrb[0].mxu1 %vm475_vm5, %v755_v55  ;;  %843 = vmatprep.subr.mxu1 %v752_v51  ;;  %v917_v58 = vpop.permute.xlu0 %916 }
 0x285   : > { %844 = vmatpush1.msra.mxu1 %v751_v50  ;;  %v919_v57 = vpop.permute.xlu1 %918  ;;  %907 = vmatprep.mubr.f32.mxu1 %v3280_v0 }
 0x286   : > { %927 = vmatprep.subr.mxu1 %v919_v57  ;;  %v921_v60 = vsel %vm920_vm11, %v917_v58, %v919_v57 }
 0x289   : > { %v3032_v62 = vpop.permute.xlu1 %3031 }
 0x28a   : > { %v3034_v63 = vunpack.i.h.bf16 %v3032_v62  ;;  %v3033_v2 = vunpack.i.l.bf16 %v3032_v62 }
 0x28c   : > { %2834 = vmatmul.mubr.msk.f32.vlgmr.msra.gmra.mrb[0].mxu1 %vm475_vm5, %v753_v59  ;;  %v1014_v5 = vsel %vm643_vm7, %v3033_v2, %v3034_v63 }
 0x28d   : > { %928 = vmatpush1.msra.mxu1 %v921_v60  ;;  %991 = vmatprep.mubr.f32.mxu1 %v3280_v0  ;;  %v1013_v6 = vpop.permute.xlu1 %1012 }
 0x28e   : > { %v1015_v11 = vsel %vm643_vm7, %v3034_v63, %v1013_v6  ;;  %vm1586_vm7 = vcmask 1006592  }
 0x294   : > { %2835 = vmatmul.mubr.msk.f32.vlgmr.msra.gmra.mrb[0].mxu1 %vm475_vm5, %v915_v61 }
 0x295   : > { %1382 = vmatprep.mubr.f32.mxu1 %v3280_v0  ;;  %v1004_v3 = vpop.permute.xlu0 %1003 }
 0x367   : > { %v993_v4 = vpop.f32.mrb[0].mxu1 }
 0x368   : > { %v1006_v7 = vadd.f32 %v1004_v3, %v993_v4  ;;  %v995_v8 = vpop.f32.mrb[1].mxu1 }
 0x369   : > { %v1007_v9 = vadd.f32 %v1004_v3, %v995_v8 }
 0x36a   : > { %v1018_v10 = vmul.f32 %v1014_v5, %v1006_v7 }
 0x36b   : > { %v1019_v12 = vmul.f32 %v1015_v11, %v1007_v9 }
 0x36c   : > { %vm1020_vm12 = vcmp.ge.f32.partialorder %v1018_v10, 0.0  ;;  %v1022_v13 = vmul.f32 0.1, %v1018_v10 }
 0x36d   : > { %vm1021_vm13 = vcmp.ge.f32.partialorder %v1019_v12, 0.0  ;;  %v1023_v14 = vmul.f32 0.1, %v1019_v12 }
 0x36e   : > { %v1024_v15 = vsel %vm1020_vm12, %v1018_v10, %v1022_v13  ;;  %v2847_v10 = vld [vmem:[%s3789_s4 + $0x10] sm:$0xff]  ;;  %v1579_v13 = vld [vmem:[#allocation7 + $0x38] sm:$0xff] }
 0x36f   : > { %1032 = vrot.lane.b32.xlu0 %v1024_v15, %s3287_s12  ;;  %v1025_v17 = vsel %vm1021_vm13, %v1019_v12, %v1023_v14 }
 0x370   : > { %1034 = vrot.lane.b32.xlu1 %v1025_v17, %s3287_s12 }
 0x373   : > { %1190 = vrot.lane.b32.xlu0 %v1024_v15, %s3288_s13 }
 0x374   : > { %1192 = vrot.lane.b32.xlu1 %v1025_v17, %s3288_s13  ;;  %s3294_s13 = smov 8  }
 0x377   : > { %1278 = vperm.xlu0 %3029, %v2839_v18   ;;  %v1577_v18 = vld [vmem:[#allocation7 + $0x30] sm:$0xff] }
 0x378   : > { %3036 = vrot.lane.b32.xlu1 %v3604_v16, %s3289_s9 }
 0x37b   : > { %1287 = vrot.lane.b32.xlu0 %v3280_v0, %s3289_s9 }
 0x3e1   : > { %v1033_v19 = vpop.permute.xlu0 %1032 }
 0x3e2   : > { %v1035_v20 = vpop.permute.xlu1 %1034 }
 0x3e3   : > { %v1037_v22 = vsel %vm1036_vm14, %v1033_v19, %v1035_v20  ;;  %1043 = vmatprep.subr.mxu0 %v1035_v20  ;;  %v1739_v20 = vld [vmem:[#allocation7 + $0x40] sm:$0xff] }
 0x3e4   : > { %1044 = vmatpush1.msra.mxu0 %v1037_v22 }
 0x3e5   : > { %2836 = vmatmul.mubr.msk.f32.vlgmr.msra.gmra.mrb[2].mxu0 %vm475_vm5, %v1029_v21  ;;  %1117 = vmatprep.subr.mxu0 %v1025_v17  ;;  %v1191_v24 = vpop.permute.xlu0 %1190 }
 0x3e6   : > { %v1193_v23 = vpop.permute.xlu1 %1192  ;;  %1118 = vmatpush1.msra.mxu0 %v1024_v15  ;;  %1181 = vmatprep.mubr.f32.mxu0 %v3280_v0 }
 0x3e7   : > { %1201 = vmatprep.subr.mxu0 %v1193_v23  ;;  %v1195_v26 = vsel %vm1194_vm15, %v1191_v24, %v1193_v23 }
 0x3ea   : > { %v3037_v28 = vpop.permute.xlu1 %3036 }
 0x3eb   : > { %v3039_v30 = vunpack.i.h.bf16 %v3037_v28  ;;  %v3038_v31 = vunpack.i.l.bf16 %v3037_v28 }
 0x3ed   : > { %2837 = vmatmul.mubr.msk.f32.vlgmr.msra.gmra.mrb[2].mxu0 %vm475_vm5, %v1027_v25  ;;  %v1290_v34 = vsel %vm1289_vm0, %v3038_v31, %v3039_v30 }
 0x3ee   : > { %1202 = vmatpush1.msra.mxu0 %v1195_v26  ;;  %1265 = vmatprep.mubr.f32.mxu0 %v3280_v0 }
 0x3f5   : > { %2838 = vmatmul.mubr.msk.f32.vlgmr.msra.gmra.mrb[2].mxu0 %vm475_vm5, %v1189_v27 }
 0x3f6   : > { %1657 = vmatprep.mubr.f32.mxu0 %v3280_v0  ;;  %v1279_v29 = vpop.permute.xlu0 %1278 }
 0x3fa   : > { %v1288_v32 = vpop.permute.xlu0 %1287 }
 0x3fb   : > { %v1291_v37 = vsel %vm1289_vm0, %v3039_v30, %v1288_v32  ;;  %vm2135_vm0 = vcmask 990208  }
 0x4c8   : > { %v1267_v33 = vpop.f32.mrb[2].mxu0 }
 0x4c9   : > { %v1281_v35 = vadd.f32 %v1279_v29, %v1267_v33  ;;  %v1269_v36 = vpop.f32.mrb[3].mxu0 }
 0x4ca   : > { %v1282_v38 = vadd.f32 %v1279_v29, %v1269_v36 }
 0x4cb   : > { %v1294_v39 = vmul.f32 %v1290_v34, %v1281_v35 }
 0x4cc   : > { %v1295_v40 = vmul.f32 %v1291_v37, %v1282_v38  ;;  %v2851_v38 = vld [vmem:[%s3791_s6 + $0x10] sm:$0xff] }
 0x4cd   : > { %vm1296_vm1 = vcmp.ge.f32.partialorder %v1294_v39, 0.0  ;;  %v1298_v41 = vmul.f32 0.1, %v1294_v39 }
 0x4ce   : > { %vm1297_vm2 = vcmp.ge.f32.partialorder %v1295_v40, 0.0  ;;  %v1299_v42 = vmul.f32 0.1, %v1295_v40 }
 0x4cf   : > { %v1300_v43 = vsel %vm1296_vm1, %v1294_v39, %v1298_v41  ;;  %v1855_v41 = vld [vmem:[#allocation8 + $0x38] sm:$0xff]  ;;  %vm2293_vm1 = vcmask 932864  }
 0x4d0   : > { %1308 = vrot.lane.b32.xlu1 %v1300_v43, %s3285_s14  ;;  %v1301_v44 = vsel %vm1297_vm2, %v1295_v40, %v1299_v42  ;;  %vm2388_vm2 = vcmask 7168  }
 0x4d1   : > { %1310 = vrot.lane.b32.xlu0 %v1301_v44, %s3285_s14 }
 0x4d4   : > { %1465 = vrot.lane.b32.xlu1 %v1300_v43, %s3286_s3 }
 0x4d5   : > { %1467 = vrot.lane.b32.xlu0 %v1301_v44, %s3286_s3 }
 0x4d8   : > { %1552 = vperm.xlu1 %3023, %v2843_v45   ;;  %v1853_v45 = vld [vmem:[#allocation8 + $0x30] sm:$0xff] }
 0x4d9   : > { %3041 = vrot.lane.b32.xlu0 %v3604_v16, %s3290_s30 }
 0x4dc   : > { %1561 = vrot.lane.b32.xlu1 %v3280_v0, %s3290_s30 }
 0x542   : > { %v1309_v46 = vpop.permute.xlu1 %1308 }
 0x543   : > { %v1311_v47 = vpop.permute.xlu0 %1310 }
 0x544   : > { %v1312_v49 = vsel %vm762_vm10, %v1309_v46, %v1311_v47  ;;  %1318 = vmatprep.subr.mxu1 %v1311_v47  ;;  %v2014_v47 = vld [vmem:[#allocation8 + $0x40] sm:$0xff] }
 0x545   : > { %1319 = vmatpush1.msra.mxu1 %v1312_v49 }
 0x546   : > { %2840 = vmatmul.mubr.msk.f32.vlgmr.msra.gmra.mrb[2].mxu1 %vm475_vm5, %v1305_v48  ;;  %1392 = vmatprep.subr.mxu1 %v1301_v44  ;;  %v1466_v51 = vpop.permute.xlu1 %1465 }
 0x547   : > { %1393 = vmatpush1.msra.mxu1 %v1300_v43  ;;  %v1468_v50 = vpop.permute.xlu0 %1467  ;;  %1456 = vmatprep.mubr.f32.mxu1 %v3280_v0 }
 0x548   : > { %1475 = vmatprep.subr.mxu1 %v1468_v50  ;;  %v1469_v53 = vsel %vm920_vm11, %v1466_v51, %v1468_v50 }
 0x54b   : > { %v3042_v55 = vpop.permute.xlu0 %3041 }
 0x54c   : > { %v3044_v57 = vunpack.i.h.bf16 %v3042_v55  ;;  %v3043_v58 = vunpack.i.l.bf16 %v3042_v55 }
 0x54e   : > { %2841 = vmatmul.mubr.msk.f32.vlgmr.msra.gmra.mrb[2].mxu1 %vm475_vm5, %v1303_v52  ;;  %v1564_v61 = vsel %vm1563_vm3, %v3043_v58, %v3044_v57 }
 0x54f   : > { %1476 = vmatpush1.msra.mxu1 %v1469_v53  ;;  %1539 = vmatprep.mubr.f32.mxu1 %v3280_v0 }
 0x556   : > { %2842 = vmatmul.mubr.msk.f32.vlgmr.msra.gmra.mrb[2].mxu1 %vm475_vm5, %v1464_v54 }
 0x557   : > { %1932 = vmatprep.mubr.f32.mxu1 %v3280_v0  ;;  %v1553_v56 = vpop.permute.xlu1 %1552 }
 0x55b   : > { %v1562_v59 = vpop.permute.xlu1 %1561 }
 0x55c   : > { %v1565_v2 = vsel %vm1563_vm3, %v3044_v57, %v1562_v59  ;;  %vm3298_vm3 = vmmov 0  }
 0x629   : > { %v1541_v60 = vpop.f32.mrb[2].mxu1 }
 0x62a   : > { %v1555_v62 = vadd.f32 %v1553_v56, %v1541_v60  ;;  %v1543_v63 = vpop.f32.mrb[3].mxu1 }
 0x62b   : > { %v1556_v3 = vadd.f32 %v1553_v56, %v1543_v63 }
 0x62c   : > { %v1568_v4 = vmul.f32 %v1564_v61, %v1555_v62 }
 0x62d   : > { %v1569_v5 = vmul.f32 %v1565_v2, %v1556_v3  ;;  %v2855_v3 = vld [vmem:[%s3789_s4 + $0x18] sm:$0xff] }
 0x62e   : > { %vm1570_vm4 = vcmp.ge.f32.partialorder %v1568_v4, 0.0  ;;  %v1572_v6 = vmul.f32 0.1, %v1568_v4 }
 0x62f   : > { %vm1571_vm6 = vcmp.ge.f32.partialorder %v1569_v5, 0.0  ;;  %v1573_v7 = vmul.f32 0.1, %v1569_v5 }
 0x630   : > { %v1574_v8 = vsel %vm1570_vm4, %v1568_v4, %v1572_v6  ;;  %v2128_v6 = vld [vmem:[#allocation7 + $0x50] sm:$0xff] }
 0x631   : > { %1582 = vrot.lane.b32.xlu0 %v1574_v8, %s3291_s18  ;;  %v1575_v9 = vsel %vm1571_vm6, %v1569_v5, %v1573_v7 }
 0x632   : > { %1584 = vrot.lane.b32.xlu1 %v1575_v9, %s3291_s18 }
 0x635   : > { %1740 = vrot.lane.b32.xlu0 %v1574_v8, %s3292_s19 }
 0x636   : > { %1742 = vrot.lane.b32.xlu1 %v1575_v9, %s3292_s19 }
 0x639   : > { %1828 = vperm.xlu0 %3029, %v2847_v10   ;;  %v2126_v10 = vld [vmem:[#allocation7 + $0x48] sm:$0xff] }
 0x63a   : > { %3046 = vrot.lane.b32.xlu1 %v3604_v16, %s3293_s10 }
 0x63d   : > { %1837 = vrot.lane.b32.xlu0 %v3280_v0, %s3293_s10 }
 0x6a3   : > { %v1583_v11 = vpop.permute.xlu0 %1582 }
 0x6a4   : > { %v1585_v12 = vpop.permute.xlu1 %1584 }
 0x6a5   : > { %v1587_v14 = vsel %vm1586_vm7, %v1583_v11, %v1585_v12  ;;  %1593 = vmatprep.subr.mxu0 %v1585_v12  ;;  %v2288_v12 = vld [vmem:[#allocation7 + $0x58] sm:$0xff] }
 0x6a6   : > { %1594 = vmatpush1.msra.mxu0 %v1587_v14 }
 0x6a7   : > { %2844 = vmatmul.mubr.msk.f32.vlgmr.msra.gmra.mrb[4].mxu0 %vm475_vm5, %v1579_v13  ;;  %1667 = vmatprep.subr.mxu0 %v1575_v9  ;;  %v1741_v17 = vpop.permute.xlu0 %1740 }
 0x6a8   : > { %v1743_v15 = vpop.permute.xlu1 %1742  ;;  %1668 = vmatpush1.msra.mxu0 %v1574_v8  ;;  %1731 = vmatprep.mubr.f32.mxu0 %v3280_v0 }
 0x6a9   : > { %1751 = vmatprep.subr.mxu0 %v1743_v15  ;;  %v1745_v19 = vsel %vm1744_vm8, %v1741_v17, %v1743_v15 }
 0x6ac   : > { %v3047_v21 = vpop.permute.xlu1 %3046 }
 0x6ad   : > { %v3049_v23 = vunpack.i.h.bf16 %v3047_v21  ;;  %v3048_v24 = vunpack.i.l.bf16 %v3047_v21 }
 0x6af   : > { %2845 = vmatmul.mubr.msk.f32.vlgmr.msra.gmra.mrb[4].mxu0 %vm475_vm5, %v1577_v18  ;;  %v1840_v27 = vsel %vm1839_vm9, %v3048_v24, %v3049_v23 }
 0x6b0   : > { %1752 = vmatpush1.msra.mxu0 %v1745_v19  ;;  %1815 = vmatprep.mubr.f32.mxu0 %v3280_v0 }
 0x6b7   : > { %2846 = vmatmul.mubr.msk.f32.vlgmr.msra.gmra.mrb[4].mxu0 %vm475_vm5, %v1739_v20 }
 0x6b8   : > { %2206 = vmatprep.mubr.f32.mxu0 %v3280_v0  ;;  %v1829_v22 = vpop.permute.xlu0 %1828 }
 0x6bc   : > { %v1838_v25 = vpop.permute.xlu0 %1837 }
 0x6bd   : > { %v1841_v30 = vsel %vm1839_vm9, %v3049_v23, %v1838_v25 }
 0x78a   : > { %v1817_v26 = vpop.f32.mrb[4].mxu0 }
 0x78b   : > { %v1831_v28 = vadd.f32 %v1829_v22, %v1817_v26  ;;  %v1819_v29 = vpop.f32.mrb[5].mxu0 }
 0x78c   : > { %v1832_v31 = vadd.f32 %v1829_v22, %v1819_v29 }
 0x78d   : > { %v1844_v32 = vmul.f32 %v1840_v27, %v1831_v28 }
 0x78e   : > { %v1845_v33 = vmul.f32 %v1841_v30, %v1832_v31  ;;  %v2859_v31 = vld [vmem:[%s3791_s6 + $0x18] sm:$0xff] }
 0x78f   : > { %vm1846_vm12 = vcmp.ge.f32.partialorder %v1844_v32, 0.0  ;;  %v1848_v34 = vmul.f32 0.1, %v1844_v32 }
 0x790   : > { %vm1847_vm13 = vcmp.ge.f32.partialorder %v1845_v33, 0.0  ;;  %v1849_v35 = vmul.f32 0.1, %v1845_v33 }
 0x791   : > { %v1850_v36 = vsel %vm1846_vm12, %v1844_v32, %v1848_v34  ;;  %v2404_v34 = vld [vmem:[#allocation8 + $0x50] sm:$0xff] }
 0x792   : > { %1858 = vrot.lane.b32.xlu1 %v1850_v36, %s3285_s14  ;;  %v1851_v37 = vsel %vm1847_vm13, %v1845_v33, %v1849_v35 }
 0x793   : > { %1860 = vrot.lane.b32.xlu0 %v1851_v37, %s3285_s14 }
 0x796   : > { %2015 = vrot.lane.b32.xlu1 %v1850_v36, %s3286_s3 }
 0x797   : > { %2017 = vrot.lane.b32.xlu0 %v1851_v37, %s3286_s3 }
 0x79a   : > { %2102 = vperm.xlu1 %3023, %v2851_v38   ;;  %v2402_v38 = vld [vmem:[#allocation8 + $0x48] sm:$0xff] }
 0x79b   : > { %3051 = vrot.lane.b32.xlu0 %v3604_v16, %s3294_s13 }
 0x79e   : > { %2111 = vrot.lane.b32.xlu1 %v3280_v0, %s3294_s13 }
 0x804   : > { %v1859_v39 = vpop.permute.xlu1 %1858 }
 0x805   : > { %v1861_v40 = vpop.permute.xlu0 %1860 }
 0x806   : > { %v1862_v42 = vsel %vm762_vm10, %v1859_v39, %v1861_v40  ;;  %1868 = vmatprep.subr.mxu1 %v1861_v40  ;;  %v2560_v40 = vld [vmem:[#allocation8 + $0x58] sm:$0xff] }
 0x807   : > { %1869 = vmatpush1.msra.mxu1 %v1862_v42 }
 0x808   : > { %2848 = vmatmul.mubr.msk.f32.vlgmr.msra.gmra.mrb[4].mxu1 %vm475_vm5, %v1855_v41  ;;  %1942 = vmatprep.subr.mxu1 %v1851_v37  ;;  %v2016_v44 = vpop.permute.xlu1 %2015 }
 0x809   : > { %1943 = vmatpush1.msra.mxu1 %v1850_v36  ;;  %v2018_v43 = vpop.permute.xlu0 %2017  ;;  %2006 = vmatprep.mubr.f32.mxu1 %v3280_v0 }
 0x80a   : > { %2025 = vmatprep.subr.mxu1 %v2018_v43  ;;  %v2019_v46 = vsel %vm920_vm11, %v2016_v44, %v2018_v43 }
 0x80d   : > { %v3052_v48 = vpop.permute.xlu0 %3051 }
 0x80e   : > { %v3054_v50 = vunpack.i.h.bf16 %v3052_v48  ;;  %v3053_v51 = vunpack.i.l.bf16 %v3052_v48 }
 0x810   : > { %2849 = vmatmul.mubr.msk.f32.vlgmr.msra.gmra.mrb[4].mxu1 %vm475_vm5, %v1853_v45  ;;  %v2113_v54 = vsel %vm475_vm5, %v3053_v51, %v3054_v50 }
 0x811   : > { %2026 = vmatpush1.msra.mxu1 %v2019_v46  ;;  %2089 = vmatprep.mubr.f32.mxu1 %v3280_v0 }
 0x812   : > { %2870 = vmatprep.subr.mxu1 %v3280_v0 }
 0x818   : > { %2850 = vmatmul.mubr.msk.f32.vlgmr.msra.gmra.mrb[4].mxu1 %vm475_vm5, %v2014_v47 }
 0x819   : > { %v2103_v49 = vpop.permute.xlu1 %2102  ;;  %2872 = vmatprep.mubr.msk.f32.mxu1 %vm3298_vm3, %v3280_v0 }
 0x81d   : > { %v2112_v52 = vpop.permute.xlu1 %2111 }
 0x81e   : > { %v2114_v57 = vsel %vm475_vm5, %v3054_v50, %v2112_v52 }
 0x8eb   : > { %v2091_v53 = vpop.f32.mrb[4].mxu1 }
 0x8ec   : > { %v2105_v55 = vadd.f32 %v2103_v49, %v2091_v53  ;;  %v2093_v56 = vpop.f32.mrb[5].mxu1 }
 0x8ed   : > { %v2106_v58 = vadd.f32 %v2103_v49, %v2093_v56 }
 0x8ee   : > { %v2117_v59 = vmul.f32 %v2113_v54, %v2105_v55 }
 0x8ef   : > { %v2118_v60 = vmul.f32 %v2114_v57, %v2106_v58 }
 0x8f0   : > { %vm2119_vm14 = vcmp.ge.f32.partialorder %v2117_v59, 0.0  ;;  %v2121_v61 = vmul.f32 0.1, %v2117_v59 }
 0x8f1   : > { %vm2120_vm15 = vcmp.ge.f32.partialorder %v2118_v60, 0.0  ;;  %v2122_v62 = vmul.f32 0.1, %v2118_v60 }
 0x8f2   : > { %v2123_v63 = vsel %vm2119_vm14, %v2117_v59, %v2121_v61 }
 0x8f3   : > { %2131 = vrot.lane.b32.xlu0 %v2123_v63, %s3295_s15  ;;  %v2124_v2 = vsel %vm2120_vm15, %v2118_v60, %v2122_v62 }
 0x8f4   : > { %2133 = vrot.lane.b32.xlu1 %v2124_v2, %s3295_s15 }
 0x8f7   : > { %2289 = vrot.lane.b32.xlu0 %v2123_v63, %s3296_s5 }
 0x8f8   : > { %2291 = vrot.lane.b32.xlu1 %v2124_v2, %s3296_s5 }
 0x8fb   : > { %2377 = vperm.xlu0 %3029, %v2855_v3  }
 0x8fc   : > { %3056 = vrot.lane.b32.xlu1 %v3604_v16, %s3297_s20 }
 0x8ff   : > { %2386 = vrot.lane.b32.xlu0 %v3280_v0, %s3297_s20 }
 0x965   : > { %v2132_v4 = vpop.permute.xlu0 %2131 }
 0x966   : > { %v2134_v5 = vpop.permute.xlu1 %2133 }
 0x967   : > { %v2136_v7 = vsel %vm2135_vm0, %v2132_v4, %v2134_v5  ;;  %2142 = vmatprep.subr.mxu0 %v2134_v5 }
 0x968   : > { %2143 = vmatpush1.msra.mxu0 %v2136_v7 }
 0x969   : > { %2852 = vmatmul.mubr.msk.f32.vlgmr.msra.gmra.mrb[6].mxu0 %vm475_vm5, %v2128_v6  ;;  %2216 = vmatprep.subr.mxu0 %v2124_v2  ;;  %v2290_v9 = vpop.permute.xlu0 %2289 }
 0x96a   : > { %v2292_v8 = vpop.permute.xlu1 %2291  ;;  %2217 = vmatpush1.msra.mxu0 %v2123_v63  ;;  %2280 = vmatprep.mubr.f32.mxu0 %v3280_v0 }
 0x96b   : > { %2300 = vmatprep.subr.mxu0 %v2292_v8  ;;  %v2294_v11 = vsel %vm2293_vm1, %v2290_v9, %v2292_v8 }
 0x96e   : > { %v3057_v13 = vpop.permute.xlu1 %3056 }
 0x96f   : > { %v3059_v15 = vunpack.i.h.bf16 %v3057_v13  ;;  %v3058_v17 = vunpack.i.l.bf16 %v3057_v13 }
 0x971   : > { %2853 = vmatmul.mubr.msk.f32.vlgmr.msra.gmra.mrb[6].mxu0 %vm475_vm5, %v2126_v10  ;;  %v2389_v20 = vsel %vm2388_vm2, %v3058_v17, %v3059_v15 }
 0x972   : > { %2301 = vmatpush1.msra.mxu0 %v2294_v11  ;;  %2364 = vmatprep.mubr.f32.mxu0 %v3280_v0 }
 0x979   : > { %2854 = vmatmul.mubr.msk.f32.vlgmr.msra.gmra.mrb[6].mxu0 %vm475_vm5, %v2288_v12 }
 0x97a   : > { %v2378_v14 = vpop.permute.xlu0 %2377 }
 0x97e   : > { %v2387_v18 = vpop.permute.xlu0 %2386 }
 0x97f   : > { %v2390_v23 = vsel %vm2388_vm2, %v3059_v15, %v2387_v18 }
 0xa4c   : > { %v2366_v19 = vpop.f32.mrb[6].mxu0 }
 0xa4d   : > { %v2380_v21 = vadd.f32 %v2378_v14, %v2366_v19  ;;  %v2368_v22 = vpop.f32.mrb[7].mxu0 }
 0xa4e   : > { %v2381_v24 = vadd.f32 %v2378_v14, %v2368_v22 }
 0xa4f   : > { %v2393_v25 = vmul.f32 %v2389_v20, %v2380_v21 }
 0xa50   : > { %v2394_v26 = vmul.f32 %v2390_v23, %v2381_v24 }
 0xa51   : > { %vm2395_vm4 = vcmp.ge.f32.partialorder %v2393_v25, 0.0  ;;  %v2397_v27 = vmul.f32 0.1, %v2393_v25 }
 0xa52   : > { %vm2396_vm6 = vcmp.ge.f32.partialorder %v2394_v26, 0.0  ;;  %v2398_v28 = vmul.f32 0.1, %v2394_v26 }
 0xa53   : > { %v2399_v29 = vsel %vm2395_vm4, %v2393_v25, %v2397_v27 }
 0xa54   : > { %2407 = vrot.lane.b32.xlu1 %v2399_v29, %s3285_s14  ;;  %v2400_v30 = vsel %vm2396_vm6, %v2394_v26, %v2398_v28 }
 0xa55   : > { %2409 = vrot.lane.b32.xlu0 %v2400_v30, %s3285_s14  ;;  %s2861_s14 = sshll.u32 %s3264_s27, 7  ;;  %s3299_s27 = smov [#allocation10]  }
 0xa56   : > { %s3736_s10 = scalar_lea.hbm %s3792_s7, %s2861_s14 }
 0xa58   : > { %2561 = vrot.lane.b32.xlu1 %v2399_v29, %s3286_s3 }
 0xa59   : > { %2563 = vrot.lane.b32.xlu0 %v2400_v30, %s3286_s3  ;;  %s410_s3 = scalar_lea.vmem [#allocation10], %s3563_s21  ;;  %s3182_s21 = sshll.u32 %s3299_s27, 4  ;;  %s3183_s21 = int_to_ptr.vmem [resolvable:$false] %s3182_s21 }
 0xa5a   : > { %s2667_s19 = sshll.u32 %s410_s3, 4  ;;  %s3184_s13 = scalar_lea.vmem %s3183_s21, 256  ;;  %s3738_s19 = int_to_ptr.vmem [resolvable:$true] %s2667_s19 }
 0xa5b   : > { %s3178_s12 = scalar_lea.vmem %s3738_s19, 128  ;;  %p3185_p9 = scmp.lt.s32.totalorder %s3738_s19, %s3183_s21 }
 0xa5c   : > { %2645 = vperm.xlu1 %3023, %v2859_v31   ;;  %p3179_p6 = scmp.ne.s32.totalorder %s3738_s19, %s3178_s12  ;;  %p3186_p5 = scmp.lt.s32.totalorder %s3184_s13, %s3178_s12 }
 0xa5e   : > { %p3180_p3 = pnand %p3179_p6, %p3823_p10  ;;  %p3187_p7 = por %p3186_p5, %p3185_p9 }
 0xa60   : > { %p3181_p4 = pneg %p3180_p3 }
 0xa62   : > { %p3188_p13 = pnand %p3187_p7, %p3181_p4 }
 0xac6   : > { %v2408_v32 = vpop.permute.xlu1 %2407 }
 0xac7   : > { %v2410_v33 = vpop.permute.xlu0 %2409 }
 0xac8   : > { %v2411_v35 = vsel %vm762_vm10, %v2408_v32, %v2410_v33 }
 0xac9   : > { %2871 = vmatpush3.msra.mxu1 %v2411_v35 }
 0xaca   : > { %v2562_v36 = vpop.permute.xlu1 %2561  ;;  %2873 = vmatmul.mubr.msk.f32.vlgmr.msra.gmra.mrb[6].mxu1 %vm475_vm5, %v2404_v34  ;;  %2875 = vmatprep.subr.mxu1 %v3280_v0 }
 0xacb   : > { %2876 = vmatpush3.msra.mxu1 %v2399_v29  ;;  %v2564_v37 = vpop.permute.xlu0 %2563  ;;  %2877 = vmatprep.mubr.msk.f32.mxu1 %vm3298_vm3, %v3280_v0 }
 0xacc   : > { %v2565_v39 = vsel %vm920_vm11, %v2562_v36, %v2564_v37  ;;  %2880 = vmatprep.subr.mxu1 %v3280_v0 }
 0xace   : > { %2878 = vmatmul.mubr.msk.f32.vlgmr.msra.gmra.mrb[8].mxu1 %vm475_vm5, %v2402_v38 }
 0xacf   : > { %2881 = vmatpush3.msra.mxu1 %v2565_v39  ;;  %2882 = vmatprep.mubr.msk.f32.mxu1 %vm3298_vm3, %v3280_v0 }
 0xad2   : > { %2883 = vmatmul.mubr.msk.f32.vlgmr.msra.gmra.mrb[10].mxu1 %vm475_vm5, %v2560_v40 }
 0xadb   : > { %v2646_v49 = vpop.permute.xlu1 %2645 }
 0xb9d   : > { %v2482_v41 = vpop.f32.mrb[6].mxu1 }
 0xb9e   : > { %v2874_v42 = vpop.f32.mrb[7].mxu1 }
 0xba1   : > { %v2555_v43 = vpop.f32.mrb[8].mxu1 }
 0xba2   : > { %v2556_v44 = vadd.f32 %v2555_v43, %v2482_v41  ;;  %v2879_v45 = vpop.f32.mrb[9].mxu1 }
 0xba5   : > { %v2636_v46 = vpop.f32.mrb[10].mxu1 }
 0xba6   : > { %v2640_v47 = vadd.f32 %v2636_v46, %v2556_v44  ;;  %v2884_v48 = vpop.f32.mrb[11].mxu1 }
 0xba8   : > { %v2648_v50 = vadd.f32 %v2646_v49, %v2640_v47 }
 0xbaa   : > { %v2649_v0 = vmul.f32 %v3604_v16, %v2648_v50 }
 0xbac   : > { %v2650_v51 = vadd.f32 %v2649_v0, %v3592_v1 }
 0xbae   : > { %2651 = vst [vmem:[%s410_s3] sm:$0xff] %v2650_v51 }
 0xbaf   : > { %3191 = shalt.err (!%p3188_p13)
}
 0xbb0   : > { %s3192_s1 = scalar_lea.hbm %s3736_s10, 128  ;;  %s3196_s9 = scalar_lea.hbm %s3792_s7, 256 }
 0xbb1   : > { %p3193_p8 = scmp.ne.s32.totalorder %s3736_s10, %s3192_s1  ;;  %p3197_p11 = scmp.lt.u32.totalorder %s3736_s10, %s3792_s7 }
 0xbb2   : > { %p3198_p0 = scmp.lt.u32.totalorder %s3196_s9, %s3192_s1  ;;  %p3200_p6 = scmp.lt.u32.totalorder %s3192_s1, %s3736_s10 }
 0xbb3   : > { %p3194_p12 = pnand %p3193_p8, %p3823_p10 }
 0xbb4   : > { %p3199_p1 = por %p3198_p0, %p3197_p11 }
 0xbb5   : > { %p3195_p2 = pneg %p3194_p12 }
 0xbb6   : > { %p3201_p3 = por %p3200_p6, %p3199_p1 }
 0xbb8   : > { %p3202_p4 = pnand %p3201_p3, %p3195_p2 }
 0xbba   : > { %3205 = shalt.err (!%p3202_p4)
}
 0xbbb   : > { %2926 = dma.vmem_to_hbm [thread:$0]  (%p3823_p10), %s3738_s19, 128, %s3736_s10, %s2653_s11  }
 0xbbc PF: > { %s3824_s30 = sld [smem:[#allocation16_spill]]  ;;  %s2679_s18 = sand.u32 1, %s3252_s24  }
 0xbbd   : > { %p3826_p5 = scmp.ge.s32.totalorder %s3272_s29, 2  ;;  %s2680_s14 = scalar_lea.sflag [#allocation4], %s2679_s18 }
 0xbc2   : > { %p3825_p9 = scmp.ne.s32.totalorder %s3824_s30, 0 }
 0xbc4   : > { %p2943_p7 = pnand %p3826_p5, %p3825_p9 }
 0xbc6   : > { %3247 = dma.done.wait (!%p2943_p7), %s2680_s14, 128  }
 0xbc7   : > { %3249 = vsyncadd (!%p2943_p7), %s2680_s14, 4294967168  ;;  %s27_s29 = sadd.s32 1, %s3272_s29   ;;  %s3827_s16 = sld [smem:[#allocation17_spill]] }
 0xbc8   : > { %p24_p13 = scmp.ge.s32.totalorder %s27_s29, 4   ;;  %s3828_s24 = smov %s3256_s25 }
 0xbc9   : > { %s3829_s25 = smov %s3260_s26  ;;  %s3830_s26 = smov %s3484_s22 }
 0xbca   : > { %s3831_s27 = smov %s3268_s28  ;;  %26 = sbr.rel (!%p24_p13) target bundleno = 13 (0xd), region = 145 }
 0xbcd   : > { %s3832_s28 = smov %s3827_s16 }
 0xbd1   :  { %2685 = vsyncpa [#allocation3], 1 }
 0xbd2   :  { %2687 = vsyncpa [#allocation3 + $0x1], 1 }
 0xbd3   :  { %2688 = vsyncpa [#allocation6], 1 }
 0xbd4   :  { %2690 = vsyncpa [#allocation6 + $0x1], 1 }
 0xbd5   :  { %2691 = vsyncpa [#allocation9], 1 }
 0xbd6   :  { %2692 = vsyncpa [#allocation4], 1 }
 0xbd7   :  { %2694 = vsyncpa [#allocation4 + $0x1], 1 }

</bundles_post_ra>
